<compile_context>
chip_gen: v7x
topology: tpu7x:2x2x1
jax: 0.10.0
libtpu: 0.0.40
codegen_flags: <defaults>
</compile_context>

<pallas_src>
import functools

import jax
import jax.numpy as jnp
from jax.experimental import pallas as pl
from jax.experimental.pallas import tpu as pltpu

KH = KW = 3                      # kernel size
RATE = 2                         # dilation rate
PAD = (KH - 1) * RATE // 2       # = 2 -> 'same' spatial size after valid conv

# Set to jnp.bfloat16 for production channel counts on v6e / v7x.
MATMUL_OPERAND_DTYPE = jnp.float32


# ----------------------------- in-kernel helpers --------------------------- #

def _reflect_index(r, n):
    """Static Python reflect of row index r into [0, n) (PyTorch 'reflect')."""
    if r < 0:
        return -r
    if r >= n:
        return 2 * (n - 1) - r
    return r


def _im2col_reflect_dilated(cols_ref, src, H, W):
    """Fill cols_ref (9*C, H*W) with the rate-2 3x3 reflect-padded im2col of
    src (C, H*W)  (channel-major, row-major flattened pixels).

    Built purely from static lane slices, tiny concatenates and strip stores
    into the VMEM scratch -- no layout-changing reshapes.
    """
    C = src.shape[0]

    # Column-reflected tap windows (kx = 0, 1, 2) for every source row.
    win = []
    for r in range(H):
        row = src[:, r * W:(r + 1) * W]                                # (C, W)
        w0 = jnp.concatenate(                                          # cols j-2 reflected
            [row[:, 2:3], row[:, 1:2], row[:, 0:W - 2]], axis=1)
        w2 = jnp.concatenate(                                          # cols j+2 reflected
            [row[:, 2:W], row[:, W - 2:W - 1], row[:, W - 3:W - 2]], axis=1)
        win.append((w0, row, w2))

    # One (9*C, W) strip per output row, stored lane-offset i*W into cols_ref.
    for i in range(H):
        pieces = []
        for ky in range(KH):
            r = _reflect_index(i + RATE * ky - PAD, H)
            pieces.extend(win[r])              # (kx = 0, 1, 2) for this ky
        cols_ref[:, i * W:(i + 1) * W] = jnp.concatenate(pieces, axis=0)


# --------------------------------- kernel ---------------------------------- #

def _fused_block_kernel(x_ref, w1_ref, b1_ref, w2_ref, b2_ref, o_ref,
                        cols1_ref, cols2_ref, *, H, W):
    # x_ref  : (1, Cin, H*W)        channel-major, flat pixels (lane-dense)
    # w1_ref : (C1, 9*Cin)          conv1 weight, im2col-matmul layout
    # b1_ref : (C1, 1)
    # w2_ref : (C2, 9*C1)           conv2 weight
    # b2_ref : (C2, 1)
    # o_ref  : (1, C2, H*W)         lane-dense output
    # cols*  : VMEM scratch (9*Cin, H*W) / (9*C1, H*W)
    x = x_ref[0].astype(jnp.float32)                       # (Cin, H*W)

    # ---- conv1: reflect pad + dilated 3x3 (single im2col matmul) + bias + ReLU
    _im2col_reflect_dilated(cols1_ref, x, H, W)
    h = jax.lax.dot_general(
        w1_ref[...],
        cols1_ref[...].astype(MATMUL_OPERAND_DTYPE),
        (((1,), (0,)), ((), ())),
        preferred_element_type=jnp.float32)                # (C1, H*W)
    h = jnp.maximum(h + b1_ref[...], 0.0)

    # ---- conv2 (no inner relu): pad/im2col of h entirely in VMEM, matmul, bias
    _im2col_reflect_dilated(cols2_ref, h, H, W)
    y = jax.lax.dot_general(
        w2_ref[...],
        cols2_ref[...].astype(MATMUL_OPERAND_DTYPE),
        (((1,), (0,)), ((), ())),
        preferred_element_type=jnp.float32)                # (C2, H*W)

    # ---- residual add (Cin == C2) + final ReLU, lane-dense store
    y = y + b2_ref[...] + x
    o_ref[0] = jnp.maximum(y, 0.0).astype(o_ref.dtype)


# --------------------------- module forward pass --------------------------- #

def dilated_residual_block(x_nchw, params):
    """Pallas forward pass.  x_nchw: (N, C, H, W) float32 -> (N, C, H, W)."""
    N, cin, H, W = x_nchw.shape
    c1 = params["w1"].shape[-1]
    c2 = params["w2"].shape[-1]
    assert H >= 3 and W >= 3, "reflect padding of 2 requires H, W >= 3"
    assert cin == c2, "residual add requires input_ch == output_ch"

    # Channels-first, flat-pixel layout (free row-major reshape, no transpose).
    x_flat = x_nchw.reshape(N, cin, H * W)

    # im2col-matmul weight layout: (KH, KW, Cin, Cout) -> (Cout, KH*KW*Cin).
    # Row-major flatten of (ky, kx, ci) matches the cols row ordering.
    w1 = jnp.transpose(params["w1"], (3, 0, 1, 2)).reshape(c1, KH * KW * cin)
    w2 = jnp.transpose(params["w2"], (3, 0, 1, 2)).reshape(c2, KH * KW * c1)
    w1 = w1.astype(MATMUL_OPERAND_DTYPE)
    w2 = w2.astype(MATMUL_OPERAND_DTYPE)
    b1 = params["b1"].reshape(c1, 1).astype(jnp.float32)
    b2 = params["b2"].reshape(c2, 1).astype(jnp.float32)

    flops = int(2 * N * H * W * KH * KW * (cin * c1 + c1 * c2))
    bytes_accessed = int(
        x_flat.size * x_flat.dtype.itemsize
        + N * c2 * H * W * 4
        + w1.size * w1.dtype.itemsize + w2.size * w2.dtype.itemsize
        + b1.size * 4 + b2.size * 4)
    cost = pl.CostEstimate(flops=flops, transcendentals=0,
                           bytes_accessed=bytes_accessed)

    kernel = functools.partial(_fused_block_kernel, H=H, W=W)

    out = pl.pallas_call(
        kernel,
        out_shape=jax.ShapeDtypeStruct((N, c2, H * W), x_nchw.dtype),
        grid=(N,),
        in_specs=[
            pl.BlockSpec((1, cin, H * W), lambda n: (n, 0, 0)),
            pl.BlockSpec((c1, KH * KW * cin), lambda n: (0, 0)),
            pl.BlockSpec((c1, 1), lambda n: (0, 0)),
            pl.BlockSpec((c2, KH * KW * c1), lambda n: (0, 0)),
            pl.BlockSpec((c2, 1), lambda n: (0, 0)),
        ],
        out_specs=pl.BlockSpec((1, c2, H * W), lambda n: (n, 0, 0)),
        scratch_shapes=[
            pltpu.VMEM((KH * KW * cin, H * W), jnp.float32),   # cols, conv1
            pltpu.VMEM((KH * KW * c1, H * W), jnp.float32),    # cols, conv2
        ],
        compiler_params=pltpu.CompilerParams(
            dimension_semantics=("parallel",)),
        cost_estimate=cost,
    )(x_flat, w1, b1, w2, b2)

    return out.reshape(N, c2, H, W)                      # free reshape (NCHW)


# ------------------------------- reference --------------------------------- #

def reference_block(x_nchw, params):
    """Pure-JAX reference (lax.conv_general_dilated) for verification."""
    x = jnp.transpose(x_nchw, (0, 2, 3, 1))
    xp = jnp.pad(x, ((0, 0), (PAD, PAD), (PAD, PAD), (0, 0)), mode="reflect")
    h = jax.lax.conv_general_dilated(
        xp, params["w1"], (1, 1), "VALID", rhs_dilation=(RATE, RATE),
        dimension_numbers=("NHWC", "HWIO", "NHWC"))
    h = jax.nn.relu(h + params["b1"][0])
    hp = jnp.pad(h, ((0, 0), (PAD, PAD), (PAD, PAD), (0, 0)), mode="reflect")
    o = jax.lax.conv_general_dilated(
        hp, params["w2"], (1, 1), "VALID", rhs_dilation=(RATE, RATE),
        dimension_numbers=("NHWC", "HWIO", "NHWC"))
    o = jax.nn.relu(o + params["b2"][0] + x)
    return jnp.transpose(o, (0, 3, 1, 2))


def init_params(key, input_ch, output_ch, deviation=0.01):
    k1, k2, k3, k4 = jax.random.split(key, 4)
    return {
        "w1": deviation * jax.random.normal(
            k1, (KH, KW, input_ch, output_ch), jnp.float32),
        "b1": deviation * jax.random.normal(k2, (1, output_ch), jnp.float32),
        "w2": deviation * jax.random.normal(
            k3, (KH, KW, output_ch, output_ch), jnp.float32),
        "b2": deviation * jax.random.normal(k4, (1, output_ch), jnp.float32),
    }


if __name__ == "__main__":
    key = jax.random.PRNGKey(0)
    k_x, k_p = jax.random.split(key)

    N, C, H, W = 2, 4, 16, 16        # residual add requires input_ch == output_ch
    x = jax.random.normal(k_x, (N, C, H, W), jnp.float32)
    params = init_params(k_p, input_ch=C, output_ch=C, deviation=0.01)

    fwd = jax.jit(dilated_residual_block)
    out = jax.block_until_ready(fwd(x, params))

    ref = jax.block_until_ready(reference_block(x, params))
    assert out.shape == (N, C, H, W)
    assert jnp.allclose(out, ref, rtol=1e-4, atol=1e-5), "mismatch vs reference"

    print("KERNEL_OK")
</pallas_src>

<mosaic_0001>
module attributes {stable_mosaic.version = 11 : i64} {
  func.func @_fused_block_kernel(%arg0: i32, %arg1: memref<1x4x256xf32, #tpu.memory_space<vmem>>, %arg2: memref<4x36xf32, #tpu.memory_space<vmem>>, %arg3: memref<4x1xf32, #tpu.memory_space<vmem>>, %arg4: memref<4x36xf32, #tpu.memory_space<vmem>>, %arg5: memref<4x1xf32, #tpu.memory_space<vmem>>, %arg6: memref<1x4x256xf32, #tpu.memory_space<vmem>>, %arg7: memref<36x256xf32, #tpu.memory_space<vmem>>, %arg8: memref<36x256xf32, #tpu.memory_space<vmem>>) attributes {dimension_semantics = [#tpu.dimension_semantics<parallel>], iteration_bounds = array<i64: 2>, scalar_prefetch = 0 : i64, scratch_operands = 2 : i64, tpu.core_type = #tpu.core_type<tc>, window_params = [{transform_indices = @transform_0, window_bounds = array<i64: 1, 4, 256>}, {pipeline_mode = #tpu.pipeline_mode<synchronous>, transform_indices = @transform_1, window_bounds = array<i64: 4, 36>}, {pipeline_mode = #tpu.pipeline_mode<synchronous>, transform_indices = @transform_2, window_bounds = array<i64: 4, 1>}, {pipeline_mode = #tpu.pipeline_mode<synchronous>, transform_indices = @transform_3, window_bounds = array<i64: 4, 36>}, {pipeline_mode = #tpu.pipeline_mode<synchronous>, transform_indices = @transform_4, window_bounds = array<i64: 4, 1>}, {transform_indices = @transform_5, window_bounds = array<i64: 1, 4, 256>}]} {
    %c0 = arith.constant 0 : index
    %c0_0 = arith.constant 0 : index
    %c0_1 = arith.constant 0 : index
    %0 = vector.load %arg1[%c0, %c0_0, %c0_1] : memref<1x4x256xf32, #tpu.memory_space<vmem>>, vector<1x4x256xf32>
    %1 = vector.shape_cast %0 : vector<1x4x256xf32> to vector<4x256xf32>
    %2 = vector.extract_strided_slice %1 {offsets = [0, 0], sizes = [4, 16], strides = [1, 1]} : vector<4x256xf32> to vector<4x16xf32>
    %3 = vector.extract_strided_slice %2 {offsets = [0, 2], sizes = [4, 1], strides = [1, 1]} : vector<4x16xf32> to vector<4x1xf32>
    %4 = vector.extract_strided_slice %2 {offsets = [0, 1], sizes = [4, 1], strides = [1, 1]} : vector<4x16xf32> to vector<4x1xf32>
    %5 = vector.extract_strided_slice %2 {offsets = [0, 0], sizes = [4, 14], strides = [1, 1]} : vector<4x16xf32> to vector<4x14xf32>
    %6 = tpu.concatenate %3, %4, %5 in 1 : vector<4x1xf32>, vector<4x1xf32>, vector<4x14xf32> -> vector<4x16xf32>
    %7 = vector.extract_strided_slice %2 {offsets = [0, 2], sizes = [4, 14], strides = [1, 1]} : vector<4x16xf32> to vector<4x14xf32>
    %8 = vector.extract_strided_slice %2 {offsets = [0, 14], sizes = [4, 1], strides = [1, 1]} : vector<4x16xf32> to vector<4x1xf32>
    %9 = vector.extract_strided_slice %2 {offsets = [0, 13], sizes = [4, 1], strides = [1, 1]} : vector<4x16xf32> to vector<4x1xf32>
    %10 = tpu.concatenate %7, %8, %9 in 1 : vector<4x14xf32>, vector<4x1xf32>, vector<4x1xf32> -> vector<4x16xf32>
    %11 = vector.extract_strided_slice %1 {offsets = [0, 16], sizes = [4, 16], strides = [1, 1]} : vector<4x256xf32> to vector<4x16xf32>
    %12 = vector.extract_strided_slice %11 {offsets = [0, 2], sizes = [4, 1], strides = [1, 1]} : vector<4x16xf32> to vector<4x1xf32>
    %13 = vector.extract_strided_slice %11 {offsets = [0, 1], sizes = [4, 1], strides = [1, 1]} : vector<4x16xf32> to vector<4x1xf32>
    %14 = vector.extract_strided_slice %11 {offsets = [0, 0], sizes = [4, 14], strides = [1, 1]} : vector<4x16xf32> to vector<4x14xf32>
    %15 = tpu.concatenate %12, %13, %14 in 1 : vector<4x1xf32>, vector<4x1xf32>, vector<4x14xf32> -> vector<4x16xf32>
    %16 = vector.extract_strided_slice %11 {offsets = [0, 2], sizes = [4, 14], strides = [1, 1]} : vector<4x16xf32> to vector<4x14xf32>
    %17 = vector.extract_strided_slice %11 {offsets = [0, 14], sizes = [4, 1], strides = [1, 1]} : vector<4x16xf32> to vector<4x1xf32>
    %18 = vector.extract_strided_slice %11 {offsets = [0, 13], sizes = [4, 1], strides = [1, 1]} : vector<4x16xf32> to vector<4x1xf32>
    %19 = tpu.concatenate %16, %17, %18 in 1 : vector<4x14xf32>, vector<4x1xf32>, vector<4x1xf32> -> vector<4x16xf32>
    %20 = vector.extract_strided_slice %1 {offsets = [0, 32], sizes = [4, 16], strides = [1, 1]} : vector<4x256xf32> to vector<4x16xf32>
    %21 = vector.extract_strided_slice %20 {offsets = [0, 2], sizes = [4, 1], strides = [1, 1]} : vector<4x16xf32> to vector<4x1xf32>
    %22 = vector.extract_strided_slice %20 {offsets = [0, 1], sizes = [4, 1], strides = [1, 1]} : vector<4x16xf32> to vector<4x1xf32>
    %23 = vector.extract_strided_slice %20 {offsets = [0, 0], sizes = [4, 14], strides = [1, 1]} : vector<4x16xf32> to vector<4x14xf32>
    %24 = tpu.concatenate %21, %22, %23 in 1 : vector<4x1xf32>, vector<4x1xf32>, vector<4x14xf32> -> vector<4x16xf32>
    %25 = vector.extract_strided_slice %20 {offsets = [0, 2], sizes = [4, 14], strides = [1, 1]} : vector<4x16xf32> to vector<4x14xf32>
    %26 = vector.extract_strided_slice %20 {offsets = [0, 14], sizes = [4, 1], strides = [1, 1]} : vector<4x16xf32> to vector<4x1xf32>
    %27 = vector.extract_strided_slice %20 {offsets = [0, 13], sizes = [4, 1], strides = [1, 1]} : vector<4x16xf32> to vector<4x1xf32>
    %28 = tpu.concatenate %25, %26, %27 in 1 : vector<4x14xf32>, vector<4x1xf32>, vector<4x1xf32> -> vector<4x16xf32>
    %29 = vector.extract_strided_slice %1 {offsets = [0, 48], sizes = [4, 16], strides = [1, 1]} : vector<4x256xf32> to vector<4x16xf32>
    %30 = vector.extract_strided_slice %29 {offsets = [0, 2], sizes = [4, 1], strides = [1, 1]} : vector<4x16xf32> to vector<4x1xf32>
    %31 = vector.extract_strided_slice %29 {offsets = [0, 1], sizes = [4, 1], strides = [1, 1]} : vector<4x16xf32> to vector<4x1xf32>
    %32 = vector.extract_strided_slice %29 {offsets = [0, 0], sizes = [4, 14], strides = [1, 1]} : vector<4x16xf32> to vector<4x14xf32>
    %33 = tpu.concatenate %30, %31, %32 in 1 : vector<4x1xf32>, vector<4x1xf32>, vector<4x14xf32> -> vector<4x16xf32>
    %34 = vector.extract_strided_slice %29 {offsets = [0, 2], sizes = [4, 14], strides = [1, 1]} : vector<4x16xf32> to vector<4x14xf32>
    %35 = vector.extract_strided_slice %29 {offsets = [0, 14], sizes = [4, 1], strides = [1, 1]} : vector<4x16xf32> to vector<4x1xf32>
    %36 = vector.extract_strided_slice %29 {offsets = [0, 13], sizes = [4, 1], strides = [1, 1]} : vector<4x16xf32> to vector<4x1xf32>
    %37 = tpu.concatenate %34, %35, %36 in 1 : vector<4x14xf32>, vector<4x1xf32>, vector<4x1xf32> -> vector<4x16xf32>
    %38 = vector.extract_strided_slice %1 {offsets = [0, 64], sizes = [4, 16], strides = [1, 1]} : vector<4x256xf32> to vector<4x16xf32>
    %39 = vector.extract_strided_slice %38 {offsets = [0, 2], sizes = [4, 1], strides = [1, 1]} : vector<4x16xf32> to vector<4x1xf32>
    %40 = vector.extract_strided_slice %38 {offsets = [0, 1], sizes = [4, 1], strides = [1, 1]} : vector<4x16xf32> to vector<4x1xf32>
    %41 = vector.extract_strided_slice %38 {offsets = [0, 0], sizes = [4, 14], strides = [1, 1]} : vector<4x16xf32> to vector<4x14xf32>
    %42 = tpu.concatenate %39, %40, %41 in 1 : vector<4x1xf32>, vector<4x1xf32>, vector<4x14xf32> -> vector<4x16xf32>
    %43 = vector.extract_strided_slice %38 {offsets = [0, 2], sizes = [4, 14], strides = [1, 1]} : vector<4x16xf32> to vector<4x14xf32>
    %44 = vector.extract_strided_slice %38 {offsets = [0, 14], sizes = [4, 1], strides = [1, 1]} : vector<4x16xf32> to vector<4x1xf32>
    %45 = vector.extract_strided_slice %38 {offsets = [0, 13], sizes = [4, 1], strides = [1, 1]} : vector<4x16xf32> to vector<4x1xf32>
    %46 = tpu.concatenate %43, %44, %45 in 1 : vector<4x14xf32>, vector<4x1xf32>, vector<4x1xf32> -> vector<4x16xf32>
    %47 = vector.extract_strided_slice %1 {offsets = [0, 80], sizes = [4, 16], strides = [1, 1]} : vector<4x256xf32> to vector<4x16xf32>
    %48 = vector.extract_strided_slice %47 {offsets = [0, 2], sizes = [4, 1], strides = [1, 1]} : vector<4x16xf32> to vector<4x1xf32>
    %49 = vector.extract_strided_slice %47 {offsets = [0, 1], sizes = [4, 1], strides = [1, 1]} : vector<4x16xf32> to vector<4x1xf32>
    %50 = vector.extract_strided_slice %47 {offsets = [0, 0], sizes = [4, 14], strides = [1, 1]} : vector<4x16xf32> to vector<4x14xf32>
    %51 = tpu.concatenate %48, %49, %50 in 1 : vector<4x1xf32>, vector<4x1xf32>, vector<4x14xf32> -> vector<4x16xf32>
    %52 = vector.extract_strided_slice %47 {offsets = [0, 2], sizes = [4, 14], strides = [1, 1]} : vector<4x16xf32> to vector<4x14xf32>
    %53 = vector.extract_strided_slice %47 {offsets = [0, 14], sizes = [4, 1], strides = [1, 1]} : vector<4x16xf32> to vector<4x1xf32>
    %54 = vector.extract_strided_slice %47 {offsets = [0, 13], sizes = [4, 1], strides = [1, 1]} : vector<4x16xf32> to vector<4x1xf32>
    %55 = tpu.concatenate %52, %53, %54 in 1 : vector<4x14xf32>, vector<4x1xf32>, vector<4x1xf32> -> vector<4x16xf32>
    %56 = vector.extract_strided_slice %1 {offsets = [0, 96], sizes = [4, 16], strides = [1, 1]} : vector<4x256xf32> to vector<4x16xf32>
    %57 = vector.extract_strided_slice %56 {offsets = [0, 2], sizes = [4, 1], strides = [1, 1]} : vector<4x16xf32> to vector<4x1xf32>
    %58 = vector.extract_strided_slice %56 {offsets = [0, 1], sizes = [4, 1], strides = [1, 1]} : vector<4x16xf32> to vector<4x1xf32>
    %59 = vector.extract_strided_slice %56 {offsets = [0, 0], sizes = [4, 14], strides = [1, 1]} : vector<4x16xf32> to vector<4x14xf32>
    %60 = tpu.concatenate %57, %58, %59 in 1 : vector<4x1xf32>, vector<4x1xf32>, vector<4x14xf32> -> vector<4x16xf32>
    %61 = vector.extract_strided_slice %56 {offsets = [0, 2], sizes = [4, 14], strides = [1, 1]} : vector<4x16xf32> to vector<4x14xf32>
    %62 = vector.extract_strided_slice %56 {offsets = [0, 14], sizes = [4, 1], strides = [1, 1]} : vector<4x16xf32> to vector<4x1xf32>
    %63 = vector.extract_strided_slice %56 {offsets = [0, 13], sizes = [4, 1], strides = [1, 1]} : vector<4x16xf32> to vector<4x1xf32>
    %64 = tpu.concatenate %61, %62, %63 in 1 : vector<4x14xf32>, vector<4x1xf32>, vector<4x1xf32> -> vector<4x16xf32>
    %65 = vector.extract_strided_slice %1 {offsets = [0, 112], sizes = [4, 16], strides = [1, 1]} : vector<4x256xf32> to vector<4x16xf32>
    %66 = vector.extract_strided_slice %65 {offsets = [0, 2], sizes = [4, 1], strides = [1, 1]} : vector<4x16xf32> to vector<4x1xf32>
    %67 = vector.extract_strided_slice %65 {offsets = [0, 1], sizes = [4, 1], strides = [1, 1]} : vector<4x16xf32> to vector<4x1xf32>
    %68 = vector.extract_strided_slice %65 {offsets = [0, 0], sizes = [4, 14], strides = [1, 1]} : vector<4x16xf32> to vector<4x14xf32>
    %69 = tpu.concatenate %66, %67, %68 in 1 : vector<4x1xf32>, vector<4x1xf32>, vector<4x14xf32> -> vector<4x16xf32>
    %70 = vector.extract_strided_slice %65 {offsets = [0, 2], sizes = [4, 14], strides = [1, 1]} : vector<4x16xf32> to vector<4x14xf32>
    %71 = vector.extract_strided_slice %65 {offsets = [0, 14], sizes = [4, 1], strides = [1, 1]} : vector<4x16xf32> to vector<4x1xf32>
    %72 = vector.extract_strided_slice %65 {offsets = [0, 13], sizes = [4, 1], strides = [1, 1]} : vector<4x16xf32> to vector<4x1xf32>
    %73 = tpu.concatenate %70, %71, %72 in 1 : vector<4x14xf32>, vector<4x1xf32>, vector<4x1xf32> -> vector<4x16xf32>
    %74 = vector.extract_strided_slice %1 {offsets = [0, 128], sizes = [4, 16], strides = [1, 1]} : vector<4x256xf32> to vector<4x16xf32>
    %75 = vector.extract_strided_slice %74 {offsets = [0, 2], sizes = [4, 1], strides = [1, 1]} : vector<4x16xf32> to vector<4x1xf32>
    %76 = vector.extract_strided_slice %74 {offsets = [0, 1], sizes = [4, 1], strides = [1, 1]} : vector<4x16xf32> to vector<4x1xf32>
    %77 = vector.extract_strided_slice %74 {offsets = [0, 0], sizes = [4, 14], strides = [1, 1]} : vector<4x16xf32> to vector<4x14xf32>
    %78 = tpu.concatenate %75, %76, %77 in 1 : vector<4x1xf32>, vector<4x1xf32>, vector<4x14xf32> -> vector<4x16xf32>
    %79 = vector.extract_strided_slice %74 {offsets = [0, 2], sizes = [4, 14], strides = [1, 1]} : vector<4x16xf32> to vector<4x14xf32>
    %80 = vector.extract_strided_slice %74 {offsets = [0, 14], sizes = [4, 1], strides = [1, 1]} : vector<4x16xf32> to vector<4x1xf32>
    %81 = vector.extract_strided_slice %74 {offsets = [0, 13], sizes = [4, 1], strides = [1, 1]} : vector<4x16xf32> to vector<4x1xf32>
    %82 = tpu.concatenate %79, %80, %81 in 1 : vector<4x14xf32>, vector<4x1xf32>, vector<4x1xf32> -> vector<4x16xf32>
    %83 = vector.extract_strided_slice %1 {offsets = [0, 144], sizes = [4, 16], strides = [1, 1]} : vector<4x256xf32> to vector<4x16xf32>
    %84 = vector.extract_strided_slice %83 {offsets = [0, 2], sizes = [4, 1], strides = [1, 1]} : vector<4x16xf32> to vector<4x1xf32>
    %85 = vector.extract_strided_slice %83 {offsets = [0, 1], sizes = [4, 1], strides = [1, 1]} : vector<4x16xf32> to vector<4x1xf32>
    %86 = vector.extract_strided_slice %83 {offsets = [0, 0], sizes = [4, 14], strides = [1, 1]} : vector<4x16xf32> to vector<4x14xf32>
    %87 = tpu.concatenate %84, %85, %86 in 1 : vector<4x1xf32>, vector<4x1xf32>, vector<4x14xf32> -> vector<4x16xf32>
    %88 = vector.extract_strided_slice %83 {offsets = [0, 2], sizes = [4, 14], strides = [1, 1]} : vector<4x16xf32> to vector<4x14xf32>
    %89 = vector.extract_strided_slice %83 {offsets = [0, 14], sizes = [4, 1], strides = [1, 1]} : vector<4x16xf32> to vector<4x1xf32>
    %90 = vector.extract_strided_slice %83 {offsets = [0, 13], sizes = [4, 1], strides = [1, 1]} : vector<4x16xf32> to vector<4x1xf32>
    %91 = tpu.concatenate %88, %89, %90 in 1 : vector<4x14xf32>, vector<4x1xf32>, vector<4x1xf32> -> vector<4x16xf32>
    %92 = vector.extract_strided_slice %1 {offsets = [0, 160], sizes = [4, 16], strides = [1, 1]} : vector<4x256xf32> to vector<4x16xf32>
    %93 = vector.extract_strided_slice %92 {offsets = [0, 2], sizes = [4, 1], strides = [1, 1]} : vector<4x16xf32> to vector<4x1xf32>
    %94 = vector.extract_strided_slice %92 {offsets = [0, 1], sizes = [4, 1], strides = [1, 1]} : vector<4x16xf32> to vector<4x1xf32>
    %95 = vector.extract_strided_slice %92 {offsets = [0, 0], sizes = [4, 14], strides = [1, 1]} : vector<4x16xf32> to vector<4x14xf32>
    %96 = tpu.concatenate %93, %94, %95 in 1 : vector<4x1xf32>, vector<4x1xf32>, vector<4x14xf32> -> vector<4x16xf32>
    %97 = vector.extract_strided_slice %92 {offsets = [0, 2], sizes = [4, 14], strides = [1, 1]} : vector<4x16xf32> to vector<4x14xf32>
    %98 = vector.extract_strided_slice %92 {offsets = [0, 14], sizes = [4, 1], strides = [1, 1]} : vector<4x16xf32> to vector<4x1xf32>
    %99 = vector.extract_strided_slice %92 {offsets = [0, 13], sizes = [4, 1], strides = [1, 1]} : vector<4x16xf32> to vector<4x1xf32>
    %100 = tpu.concatenate %97, %98, %99 in 1 : vector<4x14xf32>, vector<4x1xf32>, vector<4x1xf32> -> vector<4x16xf32>
    %101 = vector.extract_strided_slice %1 {offsets = [0, 176], sizes = [4, 16], strides = [1, 1]} : vector<4x256xf32> to vector<4x16xf32>
    %102 = vector.extract_strided_slice %101 {offsets = [0, 2], sizes = [4, 1], strides = [1, 1]} : vector<4x16xf32> to vector<4x1xf32>
    %103 = vector.extract_strided_slice %101 {offsets = [0, 1], sizes = [4, 1], strides = [1, 1]} : vector<4x16xf32> to vector<4x1xf32>
    %104 = vector.extract_strided_slice %101 {offsets = [0, 0], sizes = [4, 14], strides = [1, 1]} : vector<4x16xf32> to vector<4x14xf32>
    %105 = tpu.concatenate %102, %103, %104 in 1 : vector<4x1xf32>, vector<4x1xf32>, vector<4x14xf32> -> vector<4x16xf32>
    %106 = vector.extract_strided_slice %101 {offsets = [0, 2], sizes = [4, 14], strides = [1, 1]} : vector<4x16xf32> to vector<4x14xf32>
    %107 = vector.extract_strided_slice %101 {offsets = [0, 14], sizes = [4, 1], strides = [1, 1]} : vector<4x16xf32> to vector<4x1xf32>
    %108 = vector.extract_strided_slice %101 {offsets = [0, 13], sizes = [4, 1], strides = [1, 1]} : vector<4x16xf32> to vector<4x1xf32>
    %109 = tpu.concatenate %106, %107, %108 in 1 : vector<4x14xf32>, vector<4x1xf32>, vector<4x1xf32> -> vector<4x16xf32>
    %110 = vector.extract_strided_slice %1 {offsets = [0, 192], sizes = [4, 16], strides = [1, 1]} : vector<4x256xf32> to vector<4x16xf32>
    %111 = vector.extract_strided_slice %110 {offsets = [0, 2], sizes = [4, 1], strides = [1, 1]} : vector<4x16xf32> to vector<4x1xf32>
    %112 = vector.extract_strided_slice %110 {offsets = [0, 1], sizes = [4, 1], strides = [1, 1]} : vector<4x16xf32> to vector<4x1xf32>
    %113 = vector.extract_strided_slice %110 {offsets = [0, 0], sizes = [4, 14], strides = [1, 1]} : vector<4x16xf32> to vector<4x14xf32>
    %114 = tpu.concatenate %111, %112, %113 in 1 : vector<4x1xf32>, vector<4x1xf32>, vector<4x14xf32> -> vector<4x16xf32>
    %115 = vector.extract_strided_slice %110 {offsets = [0, 2], sizes = [4, 14], strides = [1, 1]} : vector<4x16xf32> to vector<4x14xf32>
    %116 = vector.extract_strided_slice %110 {offsets = [0, 14], sizes = [4, 1], strides = [1, 1]} : vector<4x16xf32> to vector<4x1xf32>
    %117 = vector.extract_strided_slice %110 {offsets = [0, 13], sizes = [4, 1], strides = [1, 1]} : vector<4x16xf32> to vector<4x1xf32>
    %118 = tpu.concatenate %115, %116, %117 in 1 : vector<4x14xf32>, vector<4x1xf32>, vector<4x1xf32> -> vector<4x16xf32>
    %119 = vector.extract_strided_slice %1 {offsets = [0, 208], sizes = [4, 16], strides = [1, 1]} : vector<4x256xf32> to vector<4x16xf32>
    %120 = vector.extract_strided_slice %119 {offsets = [0, 2], sizes = [4, 1], strides = [1, 1]} : vector<4x16xf32> to vector<4x1xf32>
    %121 = vector.extract_strided_slice %119 {offsets = [0, 1], sizes = [4, 1], strides = [1, 1]} : vector<4x16xf32> to vector<4x1xf32>
    %122 = vector.extract_strided_slice %119 {offsets = [0, 0], sizes = [4, 14], strides = [1, 1]} : vector<4x16xf32> to vector<4x14xf32>
    %123 = tpu.concatenate %120, %121, %122 in 1 : vector<4x1xf32>, vector<4x1xf32>, vector<4x14xf32> -> vector<4x16xf32>
    %124 = vector.extract_strided_slice %119 {offsets = [0, 2], sizes = [4, 14], strides = [1, 1]} : vector<4x16xf32> to vector<4x14xf32>
    %125 = vector.extract_strided_slice %119 {offsets = [0, 14], sizes = [4, 1], strides = [1, 1]} : vector<4x16xf32> to vector<4x1xf32>
    %126 = vector.extract_strided_slice %119 {offsets = [0, 13], sizes = [4, 1], strides = [1, 1]} : vector<4x16xf32> to vector<4x1xf32>
    %127 = tpu.concatenate %124, %125, %126 in 1 : vector<4x14xf32>, vector<4x1xf32>, vector<4x1xf32> -> vector<4x16xf32>
    %128 = vector.extract_strided_slice %1 {offsets = [0, 224], sizes = [4, 16], strides = [1, 1]} : vector<4x256xf32> to vector<4x16xf32>
    %129 = vector.extract_strided_slice %128 {offsets = [0, 2], sizes = [4, 1], strides = [1, 1]} : vector<4x16xf32> to vector<4x1xf32>
    %130 = vector.extract_strided_slice %128 {offsets = [0, 1], sizes = [4, 1], strides = [1, 1]} : vector<4x16xf32> to vector<4x1xf32>
    %131 = vector.extract_strided_slice %128 {offsets = [0, 0], sizes = [4, 14], strides = [1, 1]} : vector<4x16xf32> to vector<4x14xf32>
    %132 = tpu.concatenate %129, %130, %131 in 1 : vector<4x1xf32>, vector<4x1xf32>, vector<4x14xf32> -> vector<4x16xf32>
    %133 = vector.extract_strided_slice %128 {offsets = [0, 2], sizes = [4, 14], strides = [1, 1]} : vector<4x16xf32> to vector<4x14xf32>
    %134 = vector.extract_strided_slice %128 {offsets = [0, 14], sizes = [4, 1], strides = [1, 1]} : vector<4x16xf32> to vector<4x1xf32>
    %135 = vector.extract_strided_slice %128 {offsets = [0, 13], sizes = [4, 1], strides = [1, 1]} : vector<4x16xf32> to vector<4x1xf32>
    %136 = tpu.concatenate %133, %134, %135 in 1 : vector<4x14xf32>, vector<4x1xf32>, vector<4x1xf32> -> vector<4x16xf32>
    %137 = vector.extract_strided_slice %1 {offsets = [0, 240], sizes = [4, 16], strides = [1, 1]} : vector<4x256xf32> to vector<4x16xf32>
    %138 = vector.extract_strided_slice %137 {offsets = [0, 2], sizes = [4, 1], strides = [1, 1]} : vector<4x16xf32> to vector<4x1xf32>
    %139 = vector.extract_strided_slice %137 {offsets = [0, 1], sizes = [4, 1], strides = [1, 1]} : vector<4x16xf32> to vector<4x1xf32>
    %140 = vector.extract_strided_slice %137 {offsets = [0, 0], sizes = [4, 14], strides = [1, 1]} : vector<4x16xf32> to vector<4x14xf32>
    %141 = tpu.concatenate %138, %139, %140 in 1 : vector<4x1xf32>, vector<4x1xf32>, vector<4x14xf32> -> vector<4x16xf32>
    %142 = vector.extract_strided_slice %137 {offsets = [0, 2], sizes = [4, 14], strides = [1, 1]} : vector<4x16xf32> to vector<4x14xf32>
    %143 = vector.extract_strided_slice %137 {offsets = [0, 14], sizes = [4, 1], strides = [1, 1]} : vector<4x16xf32> to vector<4x1xf32>
    %144 = vector.extract_strided_slice %137 {offsets = [0, 13], sizes = [4, 1], strides = [1, 1]} : vector<4x16xf32> to vector<4x1xf32>
    %145 = tpu.concatenate %142, %143, %144 in 1 : vector<4x14xf32>, vector<4x1xf32>, vector<4x1xf32> -> vector<4x16xf32>
    %146 = tpu.concatenate %24, %20, %28, %6, %2, %10, %24, %20, %28 in 0 : vector<4x16xf32>, vector<4x16xf32>, vector<4x16xf32>, vector<4x16xf32>, vector<4x16xf32>, vector<4x16xf32>, vector<4x16xf32>, vector<4x16xf32>, vector<4x16xf32> -> vector<36x16xf32>
    %c0_2 = arith.constant 0 : index
    %c0_3 = arith.constant 0 : index
    %147 = vector.load %arg7[%c0_2, %c0_3] : memref<36x256xf32, #tpu.memory_space<vmem>>, vector<36x16xf32>
    tpu.vector_store %arg7[%c0_2, %c0_3], %146 {strides = array<i32>} : memref<36x256xf32, #tpu.memory_space<vmem>>, vector<36x16xf32>,
    %148 = tpu.concatenate %15, %11, %19, %15, %11, %19, %33, %29, %37 in 0 : vector<4x16xf32>, vector<4x16xf32>, vector<4x16xf32>, vector<4x16xf32>, vector<4x16xf32>, vector<4x16xf32>, vector<4x16xf32>, vector<4x16xf32>, vector<4x16xf32> -> vector<36x16xf32>
    %c0_4 = arith.constant 0 : index
    %c16 = arith.constant 16 : index
    %149 = vector.load %arg7[%c0_4, %c16] : memref<36x256xf32, #tpu.memory_space<vmem>>, vector<36x16xf32>
    tpu.vector_store %arg7[%c0_4, %c16], %148 {strides = array<i32>} : memref<36x256xf32, #tpu.memory_space<vmem>>, vector<36x16xf32>,
    %150 = tpu.concatenate %6, %2, %10, %24, %20, %28, %42, %38, %46 in 0 : vector<4x16xf32>, vector<4x16xf32>, vector<4x16xf32>, vector<4x16xf32>, vector<4x16xf32>, vector<4x16xf32>, vector<4x16xf32>, vector<4x16xf32>, vector<4x16xf32> -> vector<36x16xf32>
    %c0_5 = arith.constant 0 : index
    %c32 = arith.constant 32 : index
    %151 = vector.load %arg7[%c0_5, %c32] : memref<36x256xf32, #tpu.memory_space<vmem>>, vector<36x16xf32>
    tpu.vector_store %arg7[%c0_5, %c32], %150 {strides = array<i32>} : memref<36x256xf32, #tpu.memory_space<vmem>>, vector<36x16xf32>,
    %152 = tpu.concatenate %15, %11, %19, %33, %29, %37, %51, %47, %55 in 0 : vector<4x16xf32>, vector<4x16xf32>, vector<4x16xf32>, vector<4x16xf32>, vector<4x16xf32>, vector<4x16xf32>, vector<4x16xf32>, vector<4x16xf32>, vector<4x16xf32> -> vector<36x16xf32>
    %c0_6 = arith.constant 0 : index
    %c48 = arith.constant 48 : index
    %153 = vector.load %arg7[%c0_6, %c48] : memref<36x256xf32, #tpu.memory_space<vmem>>, vector<36x16xf32>
    tpu.vector_store %arg7[%c0_6, %c48], %152 {strides = array<i32>} : memref<36x256xf32, #tpu.memory_space<vmem>>, vector<36x16xf32>,
    %154 = tpu.concatenate %24, %20, %28, %42, %38, %46, %60, %56, %64 in 0 : vector<4x16xf32>, vector<4x16xf32>, vector<4x16xf32>, vector<4x16xf32>, vector<4x16xf32>, vector<4x16xf32>, vector<4x16xf32>, vector<4x16xf32>, vector<4x16xf32> -> vector<36x16xf32>
    %c0_7 = arith.constant 0 : index
    %c64 = arith.constant 64 : index
    %155 = vector.load %arg7[%c0_7, %c64] : memref<36x256xf32, #tpu.memory_space<vmem>>, vector<36x16xf32>
    tpu.vector_store %arg7[%c0_7, %c64], %154 {strides = array<i32>} : memref<36x256xf32, #tpu.memory_space<vmem>>, vector<36x16xf32>,
    %156 = tpu.concatenate %33, %29, %37, %51, %47, %55, %69, %65, %73 in 0 : vector<4x16xf32>, vector<4x16xf32>, vector<4x16xf32>, vector<4x16xf32>, vector<4x16xf32>, vector<4x16xf32>, vector<4x16xf32>, vector<4x16xf32>, vector<4x16xf32> -> vector<36x16xf32>
    %c0_8 = arith.constant 0 : index
    %c80 = arith.constant 80 : index
    %157 = vector.load %arg7[%c0_8, %c80] : memref<36x256xf32, #tpu.memory_space<vmem>>, vector<36x16xf32>
    tpu.vector_store %arg7[%c0_8, %c80], %156 {strides = array<i32>} : memref<36x256xf32, #tpu.memory_space<vmem>>, vector<36x16xf32>,
    %158 = tpu.concatenate %42, %38, %46, %60, %56, %64, %78, %74, %82 in 0 : vector<4x16xf32>, vector<4x16xf32>, vector<4x16xf32>, vector<4x16xf32>, vector<4x16xf32>, vector<4x16xf32>, vector<4x16xf32>, vector<4x16xf32>, vector<4x16xf32> -> vector<36x16xf32>
    %c0_9 = arith.constant 0 : index
    %c96 = arith.constant 96 : index
    %159 = vector.load %arg7[%c0_9, %c96] : memref<36x256xf32, #tpu.memory_space<vmem>>, vector<36x16xf32>
    tpu.vector_store %arg7[%c0_9, %c96], %158 {strides = array<i32>} : memref<36x256xf32, #tpu.memory_space<vmem>>, vector<36x16xf32>,
    %160 = tpu.concatenate %51, %47, %55, %69, %65, %73, %87, %83, %91 in 0 : vector<4x16xf32>, vector<4x16xf32>, vector<4x16xf32>, vector<4x16xf32>, vector<4x16xf32>, vector<4x16xf32>, vector<4x16xf32>, vector<4x16xf32>, vector<4x16xf32> -> vector<36x16xf32>
    %c0_10 = arith.constant 0 : index
    %c112 = arith.constant 112 : index
    %161 = vector.load %arg7[%c0_10, %c112] : memref<36x256xf32, #tpu.memory_space<vmem>>, vector<36x16xf32>
    tpu.vector_store %arg7[%c0_10, %c112], %160 {strides = array<i32>} : memref<36x256xf32, #tpu.memory_space<vmem>>, vector<36x16xf32>,
    %162 = tpu.concatenate %60, %56, %64, %78, %74, %82, %96, %92, %100 in 0 : vector<4x16xf32>, vector<4x16xf32>, vector<4x16xf32>, vector<4x16xf32>, vector<4x16xf32>, vector<4x16xf32>, vector<4x16xf32>, vector<4x16xf32>, vector<4x16xf32> -> vector<36x16xf32>
    %c0_11 = arith.constant 0 : index
    %c128 = arith.constant 128 : index
    %163 = vector.load %arg7[%c0_11, %c128] : memref<36x256xf32, #tpu.memory_space<vmem>>, vector<36x16xf32>
    tpu.vector_store %arg7[%c0_11, %c128], %162 {strides = array<i32>} : memref<36x256xf32, #tpu.memory_space<vmem>>, vector<36x16xf32>,
    %164 = tpu.concatenate %69, %65, %73, %87, %83, %91, %105, %101, %109 in 0 : vector<4x16xf32>, vector<4x16xf32>, vector<4x16xf32>, vector<4x16xf32>, vector<4x16xf32>, vector<4x16xf32>, vector<4x16xf32>, vector<4x16xf32>, vector<4x16xf32> -> vector<36x16xf32>
    %c0_12 = arith.constant 0 : index
    %c144 = arith.constant 144 : index
    %165 = vector.load %arg7[%c0_12, %c144] : memref<36x256xf32, #tpu.memory_space<vmem>>, vector<36x16xf32>
    tpu.vector_store %arg7[%c0_12, %c144], %164 {strides = array<i32>} : memref<36x256xf32, #tpu.memory_space<vmem>>, vector<36x16xf32>,
    %166 = tpu.concatenate %78, %74, %82, %96, %92, %100, %114, %110, %118 in 0 : vector<4x16xf32>, vector<4x16xf32>, vector<4x16xf32>, vector<4x16xf32>, vector<4x16xf32>, vector<4x16xf32>, vector<4x16xf32>, vector<4x16xf32>, vector<4x16xf32> -> vector<36x16xf32>
    %c0_13 = arith.constant 0 : index
    %c160 = arith.constant 160 : index
    %167 = vector.load %arg7[%c0_13, %c160] : memref<36x256xf32, #tpu.memory_space<vmem>>, vector<36x16xf32>
    tpu.vector_store %arg7[%c0_13, %c160], %166 {strides = array<i32>} : memref<36x256xf32, #tpu.memory_space<vmem>>, vector<36x16xf32>,
    %168 = tpu.concatenate %87, %83, %91, %105, %101, %109, %123, %119, %127 in 0 : vector<4x16xf32>, vector<4x16xf32>, vector<4x16xf32>, vector<4x16xf32>, vector<4x16xf32>, vector<4x16xf32>, vector<4x16xf32>, vector<4x16xf32>, vector<4x16xf32> -> vector<36x16xf32>
    %c0_14 = arith.constant 0 : index
    %c176 = arith.constant 176 : index
    %169 = vector.load %arg7[%c0_14, %c176] : memref<36x256xf32, #tpu.memory_space<vmem>>, vector<36x16xf32>
    tpu.vector_store %arg7[%c0_14, %c176], %168 {strides = array<i32>} : memref<36x256xf32, #tpu.memory_space<vmem>>, vector<36x16xf32>,
    %170 = tpu.concatenate %96, %92, %100, %114, %110, %118, %132, %128, %136 in 0 : vector<4x16xf32>, vector<4x16xf32>, vector<4x16xf32>, vector<4x16xf32>, vector<4x16xf32>, vector<4x16xf32>, vector<4x16xf32>, vector<4x16xf32>, vector<4x16xf32> -> vector<36x16xf32>
    %c0_15 = arith.constant 0 : index
    %c192 = arith.constant 192 : index
    %171 = vector.load %arg7[%c0_15, %c192] : memref<36x256xf32, #tpu.memory_space<vmem>>, vector<36x16xf32>
    tpu.vector_store %arg7[%c0_15, %c192], %170 {strides = array<i32>} : memref<36x256xf32, #tpu.memory_space<vmem>>, vector<36x16xf32>,
    %172 = tpu.concatenate %105, %101, %109, %123, %119, %127, %141, %137, %145 in 0 : vector<4x16xf32>, vector<4x16xf32>, vector<4x16xf32>, vector<4x16xf32>, vector<4x16xf32>, vector<4x16xf32>, vector<4x16xf32>, vector<4x16xf32>, vector<4x16xf32> -> vector<36x16xf32>
    %c0_16 = arith.constant 0 : index
    %c208 = arith.constant 208 : index
    %173 = vector.load %arg7[%c0_16, %c208] : memref<36x256xf32, #tpu.memory_space<vmem>>, vector<36x16xf32>
    tpu.vector_store %arg7[%c0_16, %c208], %172 {strides = array<i32>} : memref<36x256xf32, #tpu.memory_space<vmem>>, vector<36x16xf32>,
    %174 = tpu.concatenate %114, %110, %118, %132, %128, %136, %132, %128, %136 in 0 : vector<4x16xf32>, vector<4x16xf32>, vector<4x16xf32>, vector<4x16xf32>, vector<4x16xf32>, vector<4x16xf32>, vector<4x16xf32>, vector<4x16xf32>, vector<4x16xf32> -> vector<36x16xf32>
    %c0_17 = arith.constant 0 : index
    %c224 = arith.constant 224 : index
    %175 = vector.load %arg7[%c0_17, %c224] : memref<36x256xf32, #tpu.memory_space<vmem>>, vector<36x16xf32>
    tpu.vector_store %arg7[%c0_17, %c224], %174 {strides = array<i32>} : memref<36x256xf32, #tpu.memory_space<vmem>>, vector<36x16xf32>,
    %176 = tpu.concatenate %123, %119, %127, %141, %137, %145, %123, %119, %127 in 0 : vector<4x16xf32>, vector<4x16xf32>, vector<4x16xf32>, vector<4x16xf32>, vector<4x16xf32>, vector<4x16xf32>, vector<4x16xf32>, vector<4x16xf32>, vector<4x16xf32> -> vector<36x16xf32>
    %c0_18 = arith.constant 0 : index
    %c240 = arith.constant 240 : index
    %177 = vector.load %arg7[%c0_18, %c240] : memref<36x256xf32, #tpu.memory_space<vmem>>, vector<36x16xf32>
    tpu.vector_store %arg7[%c0_18, %c240], %176 {strides = array<i32>} : memref<36x256xf32, #tpu.memory_space<vmem>>, vector<36x16xf32>,
    %c0_19 = arith.constant 0 : index
    %c0_20 = arith.constant 0 : index
    %178 = vector.load %arg2[%c0_19, %c0_20] : memref<4x36xf32, #tpu.memory_space<vmem>>, vector<4x36xf32>
    %c0_21 = arith.constant 0 : index
    %c0_22 = arith.constant 0 : index
    %179 = vector.load %arg7[%c0_21, %c0_22] : memref<36x256xf32, #tpu.memory_space<vmem>>, vector<36x256xf32>
    %cst = arith.constant dense<0.000000e+00> : vector<4x256xf32>
    %180 = tpu.matmul %178, %179, %cst {dimension_numbers = #tpu.dot_dimension_numbers<[1], [0], [0], [1], [0, 0, 1, 1], [], []>} : vector<4x36xf32>, vector<36x256xf32>, vector<4x256xf32> -> vector<4x256xf32>
    %c0_23 = arith.constant 0 : index
    %c0_24 = arith.constant 0 : index
    %181 = vector.load %arg3[%c0_23, %c0_24] : memref<4x1xf32, #tpu.memory_space<vmem>>, vector<4x1xf32>
    %182 = vector.broadcast %181 : vector<4x1xf32> to vector<4x256xf32>
    %183 = arith.addf %180, %182 : vector<4x256xf32>
    %cst_25 = arith.constant 0.000000e+00 : f32
    %184 = vector.broadcast %cst_25 : f32 to vector<4x256xf32>
    %185 = arith.maximumf %183, %184 : vector<4x256xf32>
    %186 = vector.extract_strided_slice %185 {offsets = [0, 0], sizes = [4, 16], strides = [1, 1]} : vector<4x256xf32> to vector<4x16xf32>
    %187 = vector.extract_strided_slice %186 {offsets = [0, 2], sizes = [4, 1], strides = [1, 1]} : vector<4x16xf32> to vector<4x1xf32>
    %188 = vector.extract_strided_slice %186 {offsets = [0, 1], sizes = [4, 1], strides = [1, 1]} : vector<4x16xf32> to vector<4x1xf32>
    %189 = vector.extract_strided_slice %186 {offsets = [0, 0], sizes = [4, 14], strides = [1, 1]} : vector<4x16xf32> to vector<4x14xf32>
    %190 = tpu.concatenate %187, %188, %189 in 1 : vector<4x1xf32>, vector<4x1xf32>, vector<4x14xf32> -> vector<4x16xf32>
    %191 = vector.extract_strided_slice %186 {offsets = [0, 2], sizes = [4, 14], strides = [1, 1]} : vector<4x16xf32> to vector<4x14xf32>
    %192 = vector.extract_strided_slice %186 {offsets = [0, 14], sizes = [4, 1], strides = [1, 1]} : vector<4x16xf32> to vector<4x1xf32>
    %193 = vector.extract_strided_slice %186 {offsets = [0, 13], sizes = [4, 1], strides = [1, 1]} : vector<4x16xf32> to vector<4x1xf32>
    %194 = tpu.concatenate %191, %192, %193 in 1 : vector<4x14xf32>, vector<4x1xf32>, vector<4x1xf32> -> vector<4x16xf32>
    %195 = vector.extract_strided_slice %185 {offsets = [0, 16], sizes = [4, 16], strides = [1, 1]} : vector<4x256xf32> to vector<4x16xf32>
    %196 = vector.extract_strided_slice %195 {offsets = [0, 2], sizes = [4, 1], strides = [1, 1]} : vector<4x16xf32> to vector<4x1xf32>
    %197 = vector.extract_strided_slice %195 {offsets = [0, 1], sizes = [4, 1], strides = [1, 1]} : vector<4x16xf32> to vector<4x1xf32>
    %198 = vector.extract_strided_slice %195 {offsets = [0, 0], sizes = [4, 14], strides = [1, 1]} : vector<4x16xf32> to vector<4x14xf32>
    %199 = tpu.concatenate %196, %197, %198 in 1 : vector<4x1xf32>, vector<4x1xf32>, vector<4x14xf32> -> vector<4x16xf32>
    %200 = vector.extract_strided_slice %195 {offsets = [0, 2], sizes = [4, 14], strides = [1, 1]} : vector<4x16xf32> to vector<4x14xf32>
    %201 = vector.extract_strided_slice %195 {offsets = [0, 14], sizes = [4, 1], strides = [1, 1]} : vector<4x16xf32> to vector<4x1xf32>
    %202 = vector.extract_strided_slice %195 {offsets = [0, 13], sizes = [4, 1], strides = [1, 1]} : vector<4x16xf32> to vector<4x1xf32>
    %203 = tpu.concatenate %200, %201, %202 in 1 : vector<4x14xf32>, vector<4x1xf32>, vector<4x1xf32> -> vector<4x16xf32>
    %204 = vector.extract_strided_slice %185 {offsets = [0, 32], sizes = [4, 16], strides = [1, 1]} : vector<4x256xf32> to vector<4x16xf32>
    %205 = vector.extract_strided_slice %204 {offsets = [0, 2], sizes = [4, 1], strides = [1, 1]} : vector<4x16xf32> to vector<4x1xf32>
    %206 = vector.extract_strided_slice %204 {offsets = [0, 1], sizes = [4, 1], strides = [1, 1]} : vector<4x16xf32> to vector<4x1xf32>
    %207 = vector.extract_strided_slice %204 {offsets = [0, 0], sizes = [4, 14], strides = [1, 1]} : vector<4x16xf32> to vector<4x14xf32>
    %208 = tpu.concatenate %205, %206, %207 in 1 : vector<4x1xf32>, vector<4x1xf32>, vector<4x14xf32> -> vector<4x16xf32>
    %209 = vector.extract_strided_slice %204 {offsets = [0, 2], sizes = [4, 14], strides = [1, 1]} : vector<4x16xf32> to vector<4x14xf32>
    %210 = vector.extract_strided_slice %204 {offsets = [0, 14], sizes = [4, 1], strides = [1, 1]} : vector<4x16xf32> to vector<4x1xf32>
    %211 = vector.extract_strided_slice %204 {offsets = [0, 13], sizes = [4, 1], strides = [1, 1]} : vector<4x16xf32> to vector<4x1xf32>
    %212 = tpu.concatenate %209, %210, %211 in 1 : vector<4x14xf32>, vector<4x1xf32>, vector<4x1xf32> -> vector<4x16xf32>
    %213 = vector.extract_strided_slice %185 {offsets = [0, 48], sizes = [4, 16], strides = [1, 1]} : vector<4x256xf32> to vector<4x16xf32>
    %214 = vector.extract_strided_slice %213 {offsets = [0, 2], sizes = [4, 1], strides = [1, 1]} : vector<4x16xf32> to vector<4x1xf32>
    %215 = vector.extract_strided_slice %213 {offsets = [0, 1], sizes = [4, 1], strides = [1, 1]} : vector<4x16xf32> to vector<4x1xf32>
    %216 = vector.extract_strided_slice %213 {offsets = [0, 0], sizes = [4, 14], strides = [1, 1]} : vector<4x16xf32> to vector<4x14xf32>
    %217 = tpu.concatenate %214, %215, %216 in 1 : vector<4x1xf32>, vector<4x1xf32>, vector<4x14xf32> -> vector<4x16xf32>
    %218 = vector.extract_strided_slice %213 {offsets = [0, 2], sizes = [4, 14], strides = [1, 1]} : vector<4x16xf32> to vector<4x14xf32>
    %219 = vector.extract_strided_slice %213 {offsets = [0, 14], sizes = [4, 1], strides = [1, 1]} : vector<4x16xf32> to vector<4x1xf32>
    %220 = vector.extract_strided_slice %213 {offsets = [0, 13], sizes = [4, 1], strides = [1, 1]} : vector<4x16xf32> to vector<4x1xf32>
    %221 = tpu.concatenate %218, %219, %220 in 1 : vector<4x14xf32>, vector<4x1xf32>, vector<4x1xf32> -> vector<4x16xf32>
    %222 = vector.extract_strided_slice %185 {offsets = [0, 64], sizes = [4, 16], strides = [1, 1]} : vector<4x256xf32> to vector<4x16xf32>
    %223 = vector.extract_strided_slice %222 {offsets = [0, 2], sizes = [4, 1], strides = [1, 1]} : vector<4x16xf32> to vector<4x1xf32>
    %224 = vector.extract_strided_slice %222 {offsets = [0, 1], sizes = [4, 1], strides = [1, 1]} : vector<4x16xf32> to vector<4x1xf32>
    %225 = vector.extract_strided_slice %222 {offsets = [0, 0], sizes = [4, 14], strides = [1, 1]} : vector<4x16xf32> to vector<4x14xf32>
    %226 = tpu.concatenate %223, %224, %225 in 1 : vector<4x1xf32>, vector<4x1xf32>, vector<4x14xf32> -> vector<4x16xf32>
    %227 = vector.extract_strided_slice %222 {offsets = [0, 2], sizes = [4, 14], strides = [1, 1]} : vector<4x16xf32> to vector<4x14xf32>
    %228 = vector.extract_strided_slice %222 {offsets = [0, 14], sizes = [4, 1], strides = [1, 1]} : vector<4x16xf32> to vector<4x1xf32>
    %229 = vector.extract_strided_slice %222 {offsets = [0, 13], sizes = [4, 1], strides = [1, 1]} : vector<4x16xf32> to vector<4x1xf32>
    %230 = tpu.concatenate %227, %228, %229 in 1 : vector<4x14xf32>, vector<4x1xf32>, vector<4x1xf32> -> vector<4x16xf32>
    %231 = vector.extract_strided_slice %185 {offsets = [0, 80], sizes = [4, 16], strides = [1, 1]} : vector<4x256xf32> to vector<4x16xf32>
    %232 = vector.extract_strided_slice %231 {offsets = [0, 2], sizes = [4, 1], strides = [1, 1]} : vector<4x16xf32> to vector<4x1xf32>
    %233 = vector.extract_strided_slice %231 {offsets = [0, 1], sizes = [4, 1], strides = [1, 1]} : vector<4x16xf32> to vector<4x1xf32>
    %234 = vector.extract_strided_slice %231 {offsets = [0, 0], sizes = [4, 14], strides = [1, 1]} : vector<4x16xf32> to vector<4x14xf32>
    %235 = tpu.concatenate %232, %233, %234 in 1 : vector<4x1xf32>, vector<4x1xf32>, vector<4x14xf32> -> vector<4x16xf32>
    %236 = vector.extract_strided_slice %231 {offsets = [0, 2], sizes = [4, 14], strides = [1, 1]} : vector<4x16xf32> to vector<4x14xf32>
    %237 = vector.extract_strided_slice %231 {offsets = [0, 14], sizes = [4, 1], strides = [1, 1]} : vector<4x16xf32> to vector<4x1xf32>
    %238 = vector.extract_strided_slice %231 {offsets = [0, 13], sizes = [4, 1], strides = [1, 1]} : vector<4x16xf32> to vector<4x1xf32>
    %239 = tpu.concatenate %236, %237, %238 in 1 : vector<4x14xf32>, vector<4x1xf32>, vector<4x1xf32> -> vector<4x16xf32>
    %240 = vector.extract_strided_slice %185 {offsets = [0, 96], sizes = [4, 16], strides = [1, 1]} : vector<4x256xf32> to vector<4x16xf32>
    %241 = vector.extract_strided_slice %240 {offsets = [0, 2], sizes = [4, 1], strides = [1, 1]} : vector<4x16xf32> to vector<4x1xf32>
    %242 = vector.extract_strided_slice %240 {offsets = [0, 1], sizes = [4, 1], strides = [1, 1]} : vector<4x16xf32> to vector<4x1xf32>
    %243 = vector.extract_strided_slice %240 {offsets = [0, 0], sizes = [4, 14], strides = [1, 1]} : vector<4x16xf32> to vector<4x14xf32>
    %244 = tpu.concatenate %241, %242, %243 in 1 : vector<4x1xf32>, vector<4x1xf32>, vector<4x14xf32> -> vector<4x16xf32>
    %245 = vector.extract_strided_slice %240 {offsets = [0, 2], sizes = [4, 14], strides = [1, 1]} : vector<4x16xf32> to vector<4x14xf32>
    %246 = vector.extract_strided_slice %240 {offsets = [0, 14], sizes = [4, 1], strides = [1, 1]} : vector<4x16xf32> to vector<4x1xf32>
    %247 = vector.extract_strided_slice %240 {offsets = [0, 13], sizes = [4, 1], strides = [1, 1]} : vector<4x16xf32> to vector<4x1xf32>
    %248 = tpu.concatenate %245, %246, %247 in 1 : vector<4x14xf32>, vector<4x1xf32>, vector<4x1xf32> -> vector<4x16xf32>
    %249 = vector.extract_strided_slice %185 {offsets = [0, 112], sizes = [4, 16], strides = [1, 1]} : vector<4x256xf32> to vector<4x16xf32>
    %250 = vector.extract_strided_slice %249 {offsets = [0, 2], sizes = [4, 1], strides = [1, 1]} : vector<4x16xf32> to vector<4x1xf32>
    %251 = vector.extract_strided_slice %249 {offsets = [0, 1], sizes = [4, 1], strides = [1, 1]} : vector<4x16xf32> to vector<4x1xf32>
    %252 = vector.extract_strided_slice %249 {offsets = [0, 0], sizes = [4, 14], strides = [1, 1]} : vector<4x16xf32> to vector<4x14xf32>
    %253 = tpu.concatenate %250, %251, %252 in 1 : vector<4x1xf32>, vector<4x1xf32>, vector<4x14xf32> -> vector<4x16xf32>
    %254 = vector.extract_strided_slice %249 {offsets = [0, 2], sizes = [4, 14], strides = [1, 1]} : vector<4x16xf32> to vector<4x14xf32>
    %255 = vector.extract_strided_slice %249 {offsets = [0, 14], sizes = [4, 1], strides = [1, 1]} : vector<4x16xf32> to vector<4x1xf32>
    %256 = vector.extract_strided_slice %249 {offsets = [0, 13], sizes = [4, 1], strides = [1, 1]} : vector<4x16xf32> to vector<4x1xf32>
    %257 = tpu.concatenate %254, %255, %256 in 1 : vector<4x14xf32>, vector<4x1xf32>, vector<4x1xf32> -> vector<4x16xf32>
    %258 = vector.extract_strided_slice %185 {offsets = [0, 128], sizes = [4, 16], strides = [1, 1]} : vector<4x256xf32> to vector<4x16xf32>
    %259 = vector.extract_strided_slice %258 {offsets = [0, 2], sizes = [4, 1], strides = [1, 1]} : vector<4x16xf32> to vector<4x1xf32>
    %260 = vector.extract_strided_slice %258 {offsets = [0, 1], sizes = [4, 1], strides = [1, 1]} : vector<4x16xf32> to vector<4x1xf32>
    %261 = vector.extract_strided_slice %258 {offsets = [0, 0], sizes = [4, 14], strides = [1, 1]} : vector<4x16xf32> to vector<4x14xf32>
    %262 = tpu.concatenate %259, %260, %261 in 1 : vector<4x1xf32>, vector<4x1xf32>, vector<4x14xf32> -> vector<4x16xf32>
    %263 = vector.extract_strided_slice %258 {offsets = [0, 2], sizes = [4, 14], strides = [1, 1]} : vector<4x16xf32> to vector<4x14xf32>
    %264 = vector.extract_strided_slice %258 {offsets = [0, 14], sizes = [4, 1], strides = [1, 1]} : vector<4x16xf32> to vector<4x1xf32>
    %265 = vector.extract_strided_slice %258 {offsets = [0, 13], sizes = [4, 1], strides = [1, 1]} : vector<4x16xf32> to vector<4x1xf32>
    %266 = tpu.concatenate %263, %264, %265 in 1 : vector<4x14xf32>, vector<4x1xf32>, vector<4x1xf32> -> vector<4x16xf32>
    %267 = vector.extract_strided_slice %185 {offsets = [0, 144], sizes = [4, 16], strides = [1, 1]} : vector<4x256xf32> to vector<4x16xf32>
    %268 = vector.extract_strided_slice %267 {offsets = [0, 2], sizes = [4, 1], strides = [1, 1]} : vector<4x16xf32> to vector<4x1xf32>
    %269 = vector.extract_strided_slice %267 {offsets = [0, 1], sizes = [4, 1], strides = [1, 1]} : vector<4x16xf32> to vector<4x1xf32>
    %270 = vector.extract_strided_slice %267 {offsets = [0, 0], sizes = [4, 14], strides = [1, 1]} : vector<4x16xf32> to vector<4x14xf32>
    %271 = tpu.concatenate %268, %269, %270 in 1 : vector<4x1xf32>, vector<4x1xf32>, vector<4x14xf32> -> vector<4x16xf32>
    %272 = vector.extract_strided_slice %267 {offsets = [0, 2], sizes = [4, 14], strides = [1, 1]} : vector<4x16xf32> to vector<4x14xf32>
    %273 = vector.extract_strided_slice %267 {offsets = [0, 14], sizes = [4, 1], strides = [1, 1]} : vector<4x16xf32> to vector<4x1xf32>
    %274 = vector.extract_strided_slice %267 {offsets = [0, 13], sizes = [4, 1], strides = [1, 1]} : vector<4x16xf32> to vector<4x1xf32>
    %275 = tpu.concatenate %272, %273, %274 in 1 : vector<4x14xf32>, vector<4x1xf32>, vector<4x1xf32> -> vector<4x16xf32>
    %276 = vector.extract_strided_slice %185 {offsets = [0, 160], sizes = [4, 16], strides = [1, 1]} : vector<4x256xf32> to vector<4x16xf32>
    %277 = vector.extract_strided_slice %276 {offsets = [0, 2], sizes = [4, 1], strides = [1, 1]} : vector<4x16xf32> to vector<4x1xf32>
    %278 = vector.extract_strided_slice %276 {offsets = [0, 1], sizes = [4, 1], strides = [1, 1]} : vector<4x16xf32> to vector<4x1xf32>
    %279 = vector.extract_strided_slice %276 {offsets = [0, 0], sizes = [4, 14], strides = [1, 1]} : vector<4x16xf32> to vector<4x14xf32>
    %280 = tpu.concatenate %277, %278, %279 in 1 : vector<4x1xf32>, vector<4x1xf32>, vector<4x14xf32> -> vector<4x16xf32>
    %281 = vector.extract_strided_slice %276 {offsets = [0, 2], sizes = [4, 14], strides = [1, 1]} : vector<4x16xf32> to vector<4x14xf32>
    %282 = vector.extract_strided_slice %276 {offsets = [0, 14], sizes = [4, 1], strides = [1, 1]} : vector<4x16xf32> to vector<4x1xf32>
    %283 = vector.extract_strided_slice %276 {offsets = [0, 13], sizes = [4, 1], strides = [1, 1]} : vector<4x16xf32> to vector<4x1xf32>
    %284 = tpu.concatenate %281, %282, %283 in 1 : vector<4x14xf32>, vector<4x1xf32>, vector<4x1xf32> -> vector<4x16xf32>
    %285 = vector.extract_strided_slice %185 {offsets = [0, 176], sizes = [4, 16], strides = [1, 1]} : vector<4x256xf32> to vector<4x16xf32>
    %286 = vector.extract_strided_slice %285 {offsets = [0, 2], sizes = [4, 1], strides = [1, 1]} : vector<4x16xf32> to vector<4x1xf32>
    %287 = vector.extract_strided_slice %285 {offsets = [0, 1], sizes = [4, 1], strides = [1, 1]} : vector<4x16xf32> to vector<4x1xf32>
    %288 = vector.extract_strided_slice %285 {offsets = [0, 0], sizes = [4, 14], strides = [1, 1]} : vector<4x16xf32> to vector<4x14xf32>
    %289 = tpu.concatenate %286, %287, %288 in 1 : vector<4x1xf32>, vector<4x1xf32>, vector<4x14xf32> -> vector<4x16xf32>
    %290 = vector.extract_strided_slice %285 {offsets = [0, 2], sizes = [4, 14], strides = [1, 1]} : vector<4x16xf32> to vector<4x14xf32>
    %291 = vector.extract_strided_slice %285 {offsets = [0, 14], sizes = [4, 1], strides = [1, 1]} : vector<4x16xf32> to vector<4x1xf32>
    %292 = vector.extract_strided_slice %285 {offsets = [0, 13], sizes = [4, 1], strides = [1, 1]} : vector<4x16xf32> to vector<4x1xf32>
    %293 = tpu.concatenate %290, %291, %292 in 1 : vector<4x14xf32>, vector<4x1xf32>, vector<4x1xf32> -> vector<4x16xf32>
    %294 = vector.extract_strided_slice %185 {offsets = [0, 192], sizes = [4, 16], strides = [1, 1]} : vector<4x256xf32> to vector<4x16xf32>
    %295 = vector.extract_strided_slice %294 {offsets = [0, 2], sizes = [4, 1], strides = [1, 1]} : vector<4x16xf32> to vector<4x1xf32>
    %296 = vector.extract_strided_slice %294 {offsets = [0, 1], sizes = [4, 1], strides = [1, 1]} : vector<4x16xf32> to vector<4x1xf32>
    %297 = vector.extract_strided_slice %294 {offsets = [0, 0], sizes = [4, 14], strides = [1, 1]} : vector<4x16xf32> to vector<4x14xf32>
    %298 = tpu.concatenate %295, %296, %297 in 1 : vector<4x1xf32>, vector<4x1xf32>, vector<4x14xf32> -> vector<4x16xf32>
    %299 = vector.extract_strided_slice %294 {offsets = [0, 2], sizes = [4, 14], strides = [1, 1]} : vector<4x16xf32> to vector<4x14xf32>
    %300 = vector.extract_strided_slice %294 {offsets = [0, 14], sizes = [4, 1], strides = [1, 1]} : vector<4x16xf32> to vector<4x1xf32>
    %301 = vector.extract_strided_slice %294 {offsets = [0, 13], sizes = [4, 1], strides = [1, 1]} : vector<4x16xf32> to vector<4x1xf32>
    %302 = tpu.concatenate %299, %300, %301 in 1 : vector<4x14xf32>, vector<4x1xf32>, vector<4x1xf32> -> vector<4x16xf32>
    %303 = vector.extract_strided_slice %185 {offsets = [0, 208], sizes = [4, 16], strides = [1, 1]} : vector<4x256xf32> to vector<4x16xf32>
    %304 = vector.extract_strided_slice %303 {offsets = [0, 2], sizes = [4, 1], strides = [1, 1]} : vector<4x16xf32> to vector<4x1xf32>
    %305 = vector.extract_strided_slice %303 {offsets = [0, 1], sizes = [4, 1], strides = [1, 1]} : vector<4x16xf32> to vector<4x1xf32>
    %306 = vector.extract_strided_slice %303 {offsets = [0, 0], sizes = [4, 14], strides = [1, 1]} : vector<4x16xf32> to vector<4x14xf32>
    %307 = tpu.concatenate %304, %305, %306 in 1 : vector<4x1xf32>, vector<4x1xf32>, vector<4x14xf32> -> vector<4x16xf32>
    %308 = vector.extract_strided_slice %303 {offsets = [0, 2], sizes = [4, 14], strides = [1, 1]} : vector<4x16xf32> to vector<4x14xf32>
    %309 = vector.extract_strided_slice %303 {offsets = [0, 14], sizes = [4, 1], strides = [1, 1]} : vector<4x16xf32> to vector<4x1xf32>
    %310 = vector.extract_strided_slice %303 {offsets = [0, 13], sizes = [4, 1], strides = [1, 1]} : vector<4x16xf32> to vector<4x1xf32>
    %311 = tpu.concatenate %308, %309, %310 in 1 : vector<4x14xf32>, vector<4x1xf32>, vector<4x1xf32> -> vector<4x16xf32>
    %312 = vector.extract_strided_slice %185 {offsets = [0, 224], sizes = [4, 16], strides = [1, 1]} : vector<4x256xf32> to vector<4x16xf32>
    %313 = vector.extract_strided_slice %312 {offsets = [0, 2], sizes = [4, 1], strides = [1, 1]} : vector<4x16xf32> to vector<4x1xf32>
    %314 = vector.extract_strided_slice %312 {offsets = [0, 1], sizes = [4, 1], strides = [1, 1]} : vector<4x16xf32> to vector<4x1xf32>
    %315 = vector.extract_strided_slice %312 {offsets = [0, 0], sizes = [4, 14], strides = [1, 1]} : vector<4x16xf32> to vector<4x14xf32>
    %316 = tpu.concatenate %313, %314, %315 in 1 : vector<4x1xf32>, vector<4x1xf32>, vector<4x14xf32> -> vector<4x16xf32>
    %317 = vector.extract_strided_slice %312 {offsets = [0, 2], sizes = [4, 14], strides = [1, 1]} : vector<4x16xf32> to vector<4x14xf32>
    %318 = vector.extract_strided_slice %312 {offsets = [0, 14], sizes = [4, 1], strides = [1, 1]} : vector<4x16xf32> to vector<4x1xf32>
    %319 = vector.extract_strided_slice %312 {offsets = [0, 13], sizes = [4, 1], strides = [1, 1]} : vector<4x16xf32> to vector<4x1xf32>
    %320 = tpu.concatenate %317, %318, %319 in 1 : vector<4x14xf32>, vector<4x1xf32>, vector<4x1xf32> -> vector<4x16xf32>
    %321 = vector.extract_strided_slice %185 {offsets = [0, 240], sizes = [4, 16], strides = [1, 1]} : vector<4x256xf32> to vector<4x16xf32>
    %322 = vector.extract_strided_slice %321 {offsets = [0, 2], sizes = [4, 1], strides = [1, 1]} : vector<4x16xf32> to vector<4x1xf32>
    %323 = vector.extract_strided_slice %321 {offsets = [0, 1], sizes = [4, 1], strides = [1, 1]} : vector<4x16xf32> to vector<4x1xf32>
    %324 = vector.extract_strided_slice %321 {offsets = [0, 0], sizes = [4, 14], strides = [1, 1]} : vector<4x16xf32> to vector<4x14xf32>
    %325 = tpu.concatenate %322, %323, %324 in 1 : vector<4x1xf32>, vector<4x1xf32>, vector<4x14xf32> -> vector<4x16xf32>
    %326 = vector.extract_strided_slice %321 {offsets = [0, 2], sizes = [4, 14], strides = [1, 1]} : vector<4x16xf32> to vector<4x14xf32>
    %327 = vector.extract_strided_slice %321 {offsets = [0, 14], sizes = [4, 1], strides = [1, 1]} : vector<4x16xf32> to vector<4x1xf32>
    %328 = vector.extract_strided_slice %321 {offsets = [0, 13], sizes = [4, 1], strides = [1, 1]} : vector<4x16xf32> to vector<4x1xf32>
    %329 = tpu.concatenate %326, %327, %328 in 1 : vector<4x14xf32>, vector<4x1xf32>, vector<4x1xf32> -> vector<4x16xf32>
    %330 = tpu.concatenate %208, %204, %212, %190, %186, %194, %208, %204, %212 in 0 : vector<4x16xf32>, vector<4x16xf32>, vector<4x16xf32>, vector<4x16xf32>, vector<4x16xf32>, vector<4x16xf32>, vector<4x16xf32>, vector<4x16xf32>, vector<4x16xf32> -> vector<36x16xf32>
    %c0_26 = arith.constant 0 : index
    %c0_27 = arith.constant 0 : index
    %331 = vector.load %arg8[%c0_26, %c0_27] : memref<36x256xf32, #tpu.memory_space<vmem>>, vector<36x16xf32>
    tpu.vector_store %arg8[%c0_26, %c0_27], %330 {strides = array<i32>} : memref<36x256xf32, #tpu.memory_space<vmem>>, vector<36x16xf32>,
    %332 = tpu.concatenate %199, %195, %203, %199, %195, %203, %217, %213, %221 in 0 : vector<4x16xf32>, vector<4x16xf32>, vector<4x16xf32>, vector<4x16xf32>, vector<4x16xf32>, vector<4x16xf32>, vector<4x16xf32>, vector<4x16xf32>, vector<4x16xf32> -> vector<36x16xf32>
    %c0_28 = arith.constant 0 : index
    %c16_29 = arith.constant 16 : index
    %333 = vector.load %arg8[%c0_28, %c16_29] : memref<36x256xf32, #tpu.memory_space<vmem>>, vector<36x16xf32>
    tpu.vector_store %arg8[%c0_28, %c16_29], %332 {strides = array<i32>} : memref<36x256xf32, #tpu.memory_space<vmem>>, vector<36x16xf32>,
    %334 = tpu.concatenate %190, %186, %194, %208, %204, %212, %226, %222, %230 in 0 : vector<4x16xf32>, vector<4x16xf32>, vector<4x16xf32>, vector<4x16xf32>, vector<4x16xf32>, vector<4x16xf32>, vector<4x16xf32>, vector<4x16xf32>, vector<4x16xf32> -> vector<36x16xf32>
    %c0_30 = arith.constant 0 : index
    %c32_31 = arith.constant 32 : index
    %335 = vector.load %arg8[%c0_30, %c32_31] : memref<36x256xf32, #tpu.memory_space<vmem>>, vector<36x16xf32>
    tpu.vector_store %arg8[%c0_30, %c32_31], %334 {strides = array<i32>} : memref<36x256xf32, #tpu.memory_space<vmem>>, vector<36x16xf32>,
    %336 = tpu.concatenate %199, %195, %203, %217, %213, %221, %235, %231, %239 in 0 : vector<4x16xf32>, vector<4x16xf32>, vector<4x16xf32>, vector<4x16xf32>, vector<4x16xf32>, vector<4x16xf32>, vector<4x16xf32>, vector<4x16xf32>, vector<4x16xf32> -> vector<36x16xf32>
    %c0_32 = arith.constant 0 : index
    %c48_33 = arith.constant 48 : index
    %337 = vector.load %arg8[%c0_32, %c48_33] : memref<36x256xf32, #tpu.memory_space<vmem>>, vector<36x16xf32>
    tpu.vector_store %arg8[%c0_32, %c48_33], %336 {strides = array<i32>} : memref<36x256xf32, #tpu.memory_space<vmem>>, vector<36x16xf32>,
    %338 = tpu.concatenate %208, %204, %212, %226, %222, %230, %244, %240, %248 in 0 : vector<4x16xf32>, vector<4x16xf32>, vector<4x16xf32>, vector<4x16xf32>, vector<4x16xf32>, vector<4x16xf32>, vector<4x16xf32>, vector<4x16xf32>, vector<4x16xf32> -> vector<36x16xf32>
    %c0_34 = arith.constant 0 : index
    %c64_35 = arith.constant 64 : index
    %339 = vector.load %arg8[%c0_34, %c64_35] : memref<36x256xf32, #tpu.memory_space<vmem>>, vector<36x16xf32>
    tpu.vector_store %arg8[%c0_34, %c64_35], %338 {strides = array<i32>} : memref<36x256xf32, #tpu.memory_space<vmem>>, vector<36x16xf32>,
    %340 = tpu.concatenate %217, %213, %221, %235, %231, %239, %253, %249, %257 in 0 : vector<4x16xf32>, vector<4x16xf32>, vector<4x16xf32>, vector<4x16xf32>, vector<4x16xf32>, vector<4x16xf32>, vector<4x16xf32>, vector<4x16xf32>, vector<4x16xf32> -> vector<36x16xf32>
    %c0_36 = arith.constant 0 : index
    %c80_37 = arith.constant 80 : index
    %341 = vector.load %arg8[%c0_36, %c80_37] : memref<36x256xf32, #tpu.memory_space<vmem>>, vector<36x16xf32>
    tpu.vector_store %arg8[%c0_36, %c80_37], %340 {strides = array<i32>} : memref<36x256xf32, #tpu.memory_space<vmem>>, vector<36x16xf32>,
    %342 = tpu.concatenate %226, %222, %230, %244, %240, %248, %262, %258, %266 in 0 : vector<4x16xf32>, vector<4x16xf32>, vector<4x16xf32>, vector<4x16xf32>, vector<4x16xf32>, vector<4x16xf32>, vector<4x16xf32>, vector<4x16xf32>, vector<4x16xf32> -> vector<36x16xf32>
    %c0_38 = arith.constant 0 : index
    %c96_39 = arith.constant 96 : index
    %343 = vector.load %arg8[%c0_38, %c96_39] : memref<36x256xf32, #tpu.memory_space<vmem>>, vector<36x16xf32>
    tpu.vector_store %arg8[%c0_38, %c96_39], %342 {strides = array<i32>} : memref<36x256xf32, #tpu.memory_space<vmem>>, vector<36x16xf32>,
    %344 = tpu.concatenate %235, %231, %239, %253, %249, %257, %271, %267, %275 in 0 : vector<4x16xf32>, vector<4x16xf32>, vector<4x16xf32>, vector<4x16xf32>, vector<4x16xf32>, vector<4x16xf32>, vector<4x16xf32>, vector<4x16xf32>, vector<4x16xf32> -> vector<36x16xf32>
    %c0_40 = arith.constant 0 : index
    %c112_41 = arith.constant 112 : index
    %345 = vector.load %arg8[%c0_40, %c112_41] : memref<36x256xf32, #tpu.memory_space<vmem>>, vector<36x16xf32>
    tpu.vector_store %arg8[%c0_40, %c112_41], %344 {strides = array<i32>} : memref<36x256xf32, #tpu.memory_space<vmem>>, vector<36x16xf32>,
    %346 = tpu.concatenate %244, %240, %248, %262, %258, %266, %280, %276, %284 in 0 : vector<4x16xf32>, vector<4x16xf32>, vector<4x16xf32>, vector<4x16xf32>, vector<4x16xf32>, vector<4x16xf32>, vector<4x16xf32>, vector<4x16xf32>, vector<4x16xf32> -> vector<36x16xf32>
    %c0_42 = arith.constant 0 : index
    %c128_43 = arith.constant 128 : index
    %347 = vector.load %arg8[%c0_42, %c128_43] : memref<36x256xf32, #tpu.memory_space<vmem>>, vector<36x16xf32>
    tpu.vector_store %arg8[%c0_42, %c128_43], %346 {strides = array<i32>} : memref<36x256xf32, #tpu.memory_space<vmem>>, vector<36x16xf32>,
    %348 = tpu.concatenate %253, %249, %257, %271, %267, %275, %289, %285, %293 in 0 : vector<4x16xf32>, vector<4x16xf32>, vector<4x16xf32>, vector<4x16xf32>, vector<4x16xf32>, vector<4x16xf32>, vector<4x16xf32>, vector<4x16xf32>, vector<4x16xf32> -> vector<36x16xf32>
    %c0_44 = arith.constant 0 : index
    %c144_45 = arith.constant 144 : index
    %349 = vector.load %arg8[%c0_44, %c144_45] : memref<36x256xf32, #tpu.memory_space<vmem>>, vector<36x16xf32>
    tpu.vector_store %arg8[%c0_44, %c144_45], %348 {strides = array<i32>} : memref<36x256xf32, #tpu.memory_space<vmem>>, vector<36x16xf32>,
    %350 = tpu.concatenate %262, %258, %266, %280, %276, %284, %298, %294, %302 in 0 : vector<4x16xf32>, vector<4x16xf32>, vector<4x16xf32>, vector<4x16xf32>, vector<4x16xf32>, vector<4x16xf32>, vector<4x16xf32>, vector<4x16xf32>, vector<4x16xf32> -> vector<36x16xf32>
    %c0_46 = arith.constant 0 : index
    %c160_47 = arith.constant 160 : index
    %351 = vector.load %arg8[%c0_46, %c160_47] : memref<36x256xf32, #tpu.memory_space<vmem>>, vector<36x16xf32>
    tpu.vector_store %arg8[%c0_46, %c160_47], %350 {strides = array<i32>} : memref<36x256xf32, #tpu.memory_space<vmem>>, vector<36x16xf32>,
    %352 = tpu.concatenate %271, %267, %275, %289, %285, %293, %307, %303, %311 in 0 : vector<4x16xf32>, vector<4x16xf32>, vector<4x16xf32>, vector<4x16xf32>, vector<4x16xf32>, vector<4x16xf32>, vector<4x16xf32>, vector<4x16xf32>, vector<4x16xf32> -> vector<36x16xf32>
    %c0_48 = arith.constant 0 : index
    %c176_49 = arith.constant 176 : index
    %353 = vector.load %arg8[%c0_48, %c176_49] : memref<36x256xf32, #tpu.memory_space<vmem>>, vector<36x16xf32>
    tpu.vector_store %arg8[%c0_48, %c176_49], %352 {strides = array<i32>} : memref<36x256xf32, #tpu.memory_space<vmem>>, vector<36x16xf32>,
    %354 = tpu.concatenate %280, %276, %284, %298, %294, %302, %316, %312, %320 in 0 : vector<4x16xf32>, vector<4x16xf32>, vector<4x16xf32>, vector<4x16xf32>, vector<4x16xf32>, vector<4x16xf32>, vector<4x16xf32>, vector<4x16xf32>, vector<4x16xf32> -> vector<36x16xf32>
    %c0_50 = arith.constant 0 : index
    %c192_51 = arith.constant 192 : index
    %355 = vector.load %arg8[%c0_50, %c192_51] : memref<36x256xf32, #tpu.memory_space<vmem>>, vector<36x16xf32>
    tpu.vector_store %arg8[%c0_50, %c192_51], %354 {strides = array<i32>} : memref<36x256xf32, #tpu.memory_space<vmem>>, vector<36x16xf32>,
    %356 = tpu.concatenate %289, %285, %293, %307, %303, %311, %325, %321, %329 in 0 : vector<4x16xf32>, vector<4x16xf32>, vector<4x16xf32>, vector<4x16xf32>, vector<4x16xf32>, vector<4x16xf32>, vector<4x16xf32>, vector<4x16xf32>, vector<4x16xf32> -> vector<36x16xf32>
    %c0_52 = arith.constant 0 : index
    %c208_53 = arith.constant 208 : index
    %357 = vector.load %arg8[%c0_52, %c208_53] : memref<36x256xf32, #tpu.memory_space<vmem>>, vector<36x16xf32>
    tpu.vector_store %arg8[%c0_52, %c208_53], %356 {strides = array<i32>} : memref<36x256xf32, #tpu.memory_space<vmem>>, vector<36x16xf32>,
    %358 = tpu.concatenate %298, %294, %302, %316, %312, %320, %316, %312, %320 in 0 : vector<4x16xf32>, vector<4x16xf32>, vector<4x16xf32>, vector<4x16xf32>, vector<4x16xf32>, vector<4x16xf32>, vector<4x16xf32>, vector<4x16xf32>, vector<4x16xf32> -> vector<36x16xf32>
    %c0_54 = arith.constant 0 : index
    %c224_55 = arith.constant 224 : index
    %359 = vector.load %arg8[%c0_54, %c224_55] : memref<36x256xf32, #tpu.memory_space<vmem>>, vector<36x16xf32>
    tpu.vector_store %arg8[%c0_54, %c224_55], %358 {strides = array<i32>} : memref<36x256xf32, #tpu.memory_space<vmem>>, vector<36x16xf32>,
    %360 = tpu.concatenate %307, %303, %311, %325, %321, %329, %307, %303, %311 in 0 : vector<4x16xf32>, vector<4x16xf32>, vector<4x16xf32>, vector<4x16xf32>, vector<4x16xf32>, vector<4x16xf32>, vector<4x16xf32>, vector<4x16xf32>, vector<4x16xf32> -> vector<36x16xf32>
    %c0_56 = arith.constant 0 : index
    %c240_57 = arith.constant 240 : index
    %361 = vector.load %arg8[%c0_56, %c240_57] : memref<36x256xf32, #tpu.memory_space<vmem>>, vector<36x16xf32>
    tpu.vector_store %arg8[%c0_56, %c240_57], %360 {strides = array<i32>} : memref<36x256xf32, #tpu.memory_space<vmem>>, vector<36x16xf32>,
    %c0_58 = arith.constant 0 : index
    %c0_59 = arith.constant 0 : index
    %362 = vector.load %arg4[%c0_58, %c0_59] : memref<4x36xf32, #tpu.memory_space<vmem>>, vector<4x36xf32>
    %c0_60 = arith.constant 0 : index
    %c0_61 = arith.constant 0 : index
    %363 = vector.load %arg8[%c0_60, %c0_61] : memref<36x256xf32, #tpu.memory_space<vmem>>, vector<36x256xf32>
    %cst_62 = arith.constant dense<0.000000e+00> : vector<4x256xf32>
    %364 = tpu.matmul %362, %363, %cst_62 {dimension_numbers = #tpu.dot_dimension_numbers<[1], [0], [0], [1], [0, 0, 1, 1], [], []>} : vector<4x36xf32>, vector<36x256xf32>, vector<4x256xf32> -> vector<4x256xf32>
    %c0_63 = arith.constant 0 : index
    %c0_64 = arith.constant 0 : index
    %365 = vector.load %arg5[%c0_63, %c0_64] : memref<4x1xf32, #tpu.memory_space<vmem>>, vector<4x1xf32>
    %366 = vector.broadcast %365 : vector<4x1xf32> to vector<4x256xf32>
    %367 = arith.addf %364, %366 : vector<4x256xf32>
    %368 = arith.addf %367, %1 : vector<4x256xf32>
    %cst_65 = arith.constant 0.000000e+00 : f32
    %369 = vector.broadcast %cst_65 : f32 to vector<4x256xf32>
    %370 = arith.maximumf %368, %369 : vector<4x256xf32>
    %c0_66 = arith.constant 0 : index
    %c0_67 = arith.constant 0 : index
    %c0_68 = arith.constant 0 : index
    %371 = vector.load %arg6[%c0_66, %c0_67, %c0_68] : memref<1x4x256xf32, #tpu.memory_space<vmem>>, vector<1x4x256xf32>
    %372 = vector.shape_cast %371 : vector<1x4x256xf32> to vector<4x256xf32>
    %373 = vector.shape_cast %370 : vector<4x256xf32> to vector<1x4x256xf32>
    tpu.vector_store %arg6[%c0_66, %c0_67, %c0_68], %373 {strides = array<i32>} : memref<1x4x256xf32, #tpu.memory_space<vmem>>, vector<1x4x256xf32>,
    return
  }
  func.func @transform_0(%arg0: i32) -> (i32, i32, i32) {
    %c0_i32 = arith.constant 0 : i32
    %c0_i32_0 = arith.constant 0 : i32
    %c0_i32_1 = arith.constant 0 : i32
    return %arg0, %c0_i32, %c0_i32_0 : i32, i32, i32
  }
  func.func @transform_1(%arg0: i32) -> (i32, i32) {
    %c0_i32 = arith.constant 0 : i32
    %c0_i32_0 = arith.constant 0 : i32
    %c0_i32_1 = arith.constant 0 : i32
    return %c0_i32, %c0_i32_0 : i32, i32
  }
  func.func @transform_2(%arg0: i32) -> (i32, i32) {
    %c0_i32 = arith.constant 0 : i32
    %c0_i32_0 = arith.constant 0 : i32
    %c0_i32_1 = arith.constant 0 : i32
    return %c0_i32, %c0_i32_0 : i32, i32
  }
  func.func @transform_3(%arg0: i32) -> (i32, i32) {
    %c0_i32 = arith.constant 0 : i32
    %c0_i32_0 = arith.constant 0 : i32
    %c0_i32_1 = arith.constant 0 : i32
    return %c0_i32, %c0_i32_0 : i32, i32
  }
  func.func @transform_4(%arg0: i32) -> (i32, i32) {
    %c0_i32 = arith.constant 0 : i32
    %c0_i32_0 = arith.constant 0 : i32
    %c0_i32_1 = arith.constant 0 : i32
    return %c0_i32, %c0_i32_0 : i32, i32
  }
  func.func @transform_5(%arg0: i32) -> (i32, i32, i32) {
    %c0_i32 = arith.constant 0 : i32
    %c0_i32_0 = arith.constant 0 : i32
    %c0_i32_1 = arith.constant 0 : i32
    return %arg0, %c0_i32, %c0_i32_0 : i32, i32, i32
  }
}

</mosaic_0001>

<bundles_post_ra>
// kernel: dilated_residual_block.1
= control target key start
LH: loop header
LB: loop body
LE: loop exit
PB: predicated region body
PF: predicated region fallthrough
CT: control target
= control target key end

     0   :  { %s2072_s18 = smov 0   ;;  %s3485_s0 = inlined_call_operand.vmem [shape: f32[2,4,256], index: 0, kind: input, shape index: {}]   ;;  %s3486_s1 = inlined_call_operand.vmem [shape: f32[4,36], index: 1, kind: input, shape index: {}]   ;;  %s3487_s2 = inlined_call_operand.vmem [shape: f32[4,1], index: 2, kind: input, shape index: {}]   ;;  %s3488_s3 = inlined_call_operand.vmem [shape: f32[4,36], index: 3, kind: input, shape index: {}]   ;;  %s3489_s4 = inlined_call_operand.vmem [shape: f32[4,1], index: 4, kind: input, shape index: {}]   ;;  %s3490_s5 = inlined_call_operand.vmem [shape: f32[2,4,256], index: 5, kind: output, shape index: {}]  }
   0x1 LB: > { %s1936_s19 = sadd.s32 4294967295, %s2015_s18   ;;  %p1940_p0 = scmp.ge.s32.totalorder %s2015_s18, 1  ;;  %s2015_s18 = sphi %s2072_s18, %s15_s18  }
   0x2   : > { %p187_p1 = scmp.lt.s32.totalorder %s2015_s18, 3 }
   0x4   : > { %p188_p2 = pnand %p1940_p0, %p187_p1 }
   0x6   : > { %191 = sbr.rel (%p188_p2) target bundleno = 1374 (0x55e), region = 40 }
   0xd   : > { %p215_p3 = scmp.lt.s32.totalorder %s1936_s19, 1  ;;  %s2017_s24 = smov 110   ;;  %vm233_vm0 = vcmask 7168   ;;  %vm237_vm1 = vcmask 113664   ;;  %vm235_vm2 = vcmask 15360   ;;  %vm239_vm3 = vcmask 121856  }
   0xe   : > { %s2018_s25 = smov 112   ;;  %s2019_s26 = smov 94   ;;  %vm445_vm4 = vcmask 1043456   ;;  %vm454_vm5 = vcmask 125952   ;;  %vm449_vm6 = vcmask 130048   ;;  %vm492_vm7 = vcmask 261248  }
   0xf   : > { %s3577_s19 = smov (!%p215_p3, %s1936_s19), 1  ;;  %s2020_s27 = smov 114   ;;  %vm3502_vm8 = vcmask 392448   ;;  %vm3501_vm9 = vcmask 523648   ;;  %vm3498_vm10 = vcmask 654848   ;;  %vm3500_vm11 = vcmask 786048  }
  0x10   : > { %s3491_s20 = sshll.u32 %s3577_s19, 3  ;;  %s2021_s28 = smov 96   ;;  %vm3499_vm12 = vcmask 917248   ;;  %vm3503_vm13 = vcmask 1048448   ;;  %vm497_vm14 = vcmask 257152   ;;  %vm538_vm15 = vcmask 388352  }
  0x11   : > { %s2088_s23 = scalar_lea.vmem %s3485_s0, %s3491_s20  ;;  %s2022_s29 = smov 16  }
  0x12   : > { %v2091_v0 = vld [vmem:[%s2088_s23] sm:$0xff]  ;;  %s2023_s30 = smov 14   ;;  %s2024_s6 = smov 78  }
  0x13   : > { %241 = vrot.lane.b32.xlu1 %v2091_v0, %s2017_s24  ;;  %v2097_v1 = vcombine.high %v2091_v0, %v2091_v0  ;;  %s2025_s7 = smov 98   ;;  %s2026_s8 = smov 80   ;;  %v2157_v2 = vcombine.low %v2091_v0, %v2091_v0 }
  0x14   : > { %s2027_s9 = smov 126   ;;  %s3504_s10 = smov 18  }
  0x15   : > { %3509 = vst [vmem:[#allocation4_spill] sm:$0xff] %v2097_v1  ;;  %344 = vrot.lane.b32.xlu0 %v2097_v1, %s2017_s24  ;;  %s2029_s11 = smov 62   ;;  %s2030_s12 = smov 82  }
  0x16   : > { %s2031_s13 = smov 64   ;;  %s2032_s14 = smov 2  }
  0x17   : > { %244 = vrot.lane.b32.xlu1 %v2091_v0, %s2018_s25  ;;  %s3492_s15 = smov 46   ;;  %s2034_s16 = smov 66  }
  0x18   : > { %s2035_s17 = smov 48   ;;  %s2036_s21 = smov 30  }
  0x19   : > { %347 = vrot.lane.b32.xlu0 %v2097_v1, %s2018_s25  ;;  %s2037_s22 = smov 50   ;;  %s3496_s20 = smov 32  }
  0x1b   : > { %357 = vrot.lane.b32.xlu1 %v2097_v1, %s2019_s26 }
  0x1d   : > { %350 = vrot.lane.b32.xlu0 %v2097_v1, %s2020_s27 }
  0x1f   : > { %247 = vrot.lane.b32.xlu1 %v2091_v0, %s2020_s27 }
  0x21   : > { %360 = vrot.lane.b32.xlu0 %v2097_v1, %s2021_s28 }
  0x23   : > { %257 = vrot.lane.b32.xlu1 %v2091_v0, %s2021_s28 }
  0x25   : > { %254 = vrot.lane.b32.xlu0 %v2091_v0, %s2019_s26 }
  0x27   : > { %322 = vrot.lane.b32.xlu1 %v2091_v0, %s2022_s29 }
  0x29   : > { %319 = vrot.lane.b32.xlu0 %v2091_v0, %s2023_s30 }
  0x2b   : > { %370 = vrot.lane.b32.xlu1 %v2097_v1, %s2024_s6 }
  0x2d   : > { %363 = vrot.lane.b32.xlu0 %v2097_v1, %s2025_s7 }
  0x2f   : > { %260 = vrot.lane.b32.xlu1 %v2091_v0, %s2025_s7 }
  0x31   : > { %373 = vrot.lane.b32.xlu0 %v2097_v1, %s2026_s8 }
  0x33   : > { %270 = vrot.lane.b32.xlu1 %v2091_v0, %s2026_s8 }
  0x35   : > { %267 = vrot.lane.b32.xlu0 %v2091_v0, %s2024_s6 }
  0x37   : > { %333 = vrot.lane.b32.xlu1 %v2097_v1, %s2027_s9 }
  0x39   : > { %325 = vrot.lane.b32.xlu0 %v2091_v0, %s3504_s10 }
  0x3b   : > { %383 = vrot.lane.b32.xlu1 %v2097_v1, %s2029_s11 }
  0x3d   : > { %376 = vrot.lane.b32.xlu0 %v2097_v1, %s2030_s12 }
  0x3f   : > { %227 = vrot.lane.b32.xlu1 %v2091_v0, %s2027_s9 }
  0x41   : > { %386 = vrot.lane.b32.xlu0 %v2097_v1, %s2031_s13 }
  0x43   : > { %280 = vrot.lane.b32.xlu1 %v2091_v0, %s2029_s11 }
  0x45   : > { %273 = vrot.lane.b32.xlu0 %v2091_v0, %s2030_s12 }
  0x47   : > { %337 = vrot.lane.b32.xlu1 %v2097_v1, %s2032_s14 }
  0x49   : > { %283 = vrot.lane.b32.xlu0 %v2091_v0, %s2031_s13 }
  0x4b   : > { %396 = vrot.lane.b32.xlu1 %v2097_v1, %s3492_s15 }
  0x4d   : > { %389 = vrot.lane.b32.xlu0 %v2097_v1, %s2034_s16 }
  0x4f   : > { %620 = vrot.lane.b32.xlu1 %v2157_v2, %s2022_s29 }
  0x51   : > { %399 = vrot.lane.b32.xlu0 %v2097_v1, %s2035_s17 }
  0x53   : > { %286 = vrot.lane.b32.xlu1 %v2091_v0, %s2034_s16 }
  0x55   : > { %230 = vrot.lane.b32.xlu0 %v2091_v0, %s2032_s14 }
  0x57   : > { %296 = vrot.lane.b32.xlu1 %v2091_v0, %s2035_s17 }
  0x59   : > { %293 = vrot.lane.b32.xlu0 %v2091_v0, %s3492_s15  ;;  %s3494_s15 = smov 34  }
  0x5b   : > { %409 = vrot.lane.b32.xlu1 %v2097_v1, %s2036_s21 }
  0x5d   : > { %402 = vrot.lane.b32.xlu0 %v2097_v1, %s2037_s22 }
  0x5f   : > { %456 = vrot.lane.b32.xlu1 %v2157_v2, %s2018_s25 }
  0x61   : > { %412 = vrot.lane.b32.xlu0 %v2097_v1, %s3496_s20 }
  0x63   : > { %306 = vrot.lane.b32.xlu1 %v2091_v0, %s2036_s21 }
  0x65   : > { %299 = vrot.lane.b32.xlu0 %v2091_v0, %s2037_s22 }
  0x67   : > { %415 = vrot.lane.b32.xlu1 %v2097_v1, %s3494_s15 }
  0x69   : > { %309 = vrot.lane.b32.xlu0 %v2091_v0, %s3496_s20 }
  0x6b   : > { %425 = vrot.lane.b32.xlu1 %v2097_v1, %s2022_s29 }
  0x6d   : > { %422 = vrot.lane.b32.xlu0 %v2097_v1, %s2023_s30 }
  0x6f   : > { %428 = vrot.lane.b32.xlu1 %v2097_v1, %s3504_s10 }
  0x71   : > { %312 = vrot.lane.b32.xlu0 %v2091_v0, %s3494_s15  ;;  %s3511_s15 = smov 32  }
  0x73   : > { %465 = vrot.lane.b32.xlu1 %v2157_v2, %s2026_s8 }
  0x75   : > { %436 = vrot.lane.b32.xlu0 %v2157_v2, %s2021_s28 }
  0x77   : > { %545 = vrot.lane.b32.xlu1 %v2157_v2, %s2035_s17 }
  0x79   : > { %506 = vrot.lane.b32.xlu0 %v2157_v2, %s2031_s13 }
  0x7d   : > { %582 = vrot.lane.b32.xlu0 %v2157_v2, %s3496_s20 }
  0x85   : > { %v242_v3 = vpop.permute.xlu1 %241 }
  0x87   : > { %v2207_v4 = vpop.permute.xlu0 %344 }
  0x89   : > { %v2209_v5 = vpop.permute.xlu1 %244 }
  0x8a   : > { %v250_v9 = vsel %vm233_vm0, %v242_v3, %v2209_v5  ;;  %v252_v12 = vsel %vm237_vm1, %v242_v3, %v2209_v5 }
  0x8b   : > { %v2211_v6 = vpop.permute.xlu0 %347 }
  0x8d   : > { %v358_v7 = vpop.permute.xlu1 %357 }
  0x8f   : > { %v2213_v8 = vpop.permute.xlu0 %350 }
  0x91   : > { %v248_v10 = vpop.permute.xlu1 %247 }
  0x92   : > { %v2218_v11 = vsel %vm235_vm2, %v250_v9, %v248_v10  ;;  %v2226_v15 = vsel %vm239_vm3, %v252_v12, %v248_v10 }
  0x93   : > { %v460_v13 = vrot.slane %v2218_v11, 4  ;;  %v2223_v14 = vpop.permute.xlu0 %360 }
  0x94   : > { %v366_v22 = vsel %vm233_vm0, %v358_v7, %v2223_v14  ;;  %v368_v23 = vsel %vm237_vm1, %v358_v7, %v2223_v14 }
  0x95   : > { %v2228_v16 = vpop.permute.xlu1 %257  ;;  %v469_v17 = vsel %vm445_vm4, %v2226_v15, %v460_v13 }
  0x96   : > { %479 = vrot.lane.b32.xlu0 %v469_v17, %s2022_s29 }
  0x97   : > { %v255_v18 = vpop.permute.xlu0 %254 }
  0x98   : > { %v265_v27 = vsel %vm237_vm1, %v255_v18, %v2228_v16  ;;  %v263_v54 = vsel %vm233_vm0, %v255_v18, %v2228_v16  ;;  %v353_v18 = vsel %vm233_vm0, %v2207_v4, %v2211_v6 }
  0x99   : > { %v2233_v19 = vpop.permute.xlu1 %322 }
  0x9b   : > { %v2235_v20 = vpop.permute.xlu0 %319 }
  0x9c   : > { %v328_v50 = vsel %vm233_vm0, %v2235_v20, %v2233_v19 }
  0x9d   : > { %v2237_v21 = vpop.permute.xlu1 %370 }
  0x9f   : > { %v364_v24 = vpop.permute.xlu0 %363 }
  0xa0   : > { %v2244_v25 = vsel %vm235_vm2, %v366_v22, %v364_v24  ;;  %v2247_v26 = vsel %vm239_vm3, %v368_v23, %v364_v24 }
  0xa1   : > { %v261_v28 = vpop.permute.xlu1 %260  ;;  %v2254_v29 = vsel %vm445_vm4, %v2244_v25, %v2228_v16  ;;  %732 = vst.msk [vmem:[#allocation2 + $0x48] sm:$0xf] %vm454_vm5, %v2247_v26 }
  0xa2   : > { %v2259_v30 = vsel %vm239_vm3, %v265_v27, %v261_v28  ;;  %731 = vst.msk [vmem:[#allocation2 + $0x38] sm:$0xff] %vm449_vm6, %v2254_v29  ;;  %v2319_v56 = vsel %vm235_vm2, %v263_v54, %v261_v28  ;;  %v354_v27 = vsel %vm235_vm2, %v353_v18, %v2213_v8  ;;  %v330_v28 = vsel %vm237_vm1, %v2235_v20, %v2233_v19 }
  0xa3   : > { %v2263_v31 = vpop.permute.xlu0 %373  ;;  %455 = vst.msk [vmem:[#allocation2 + $0x40] sm:$0xf] %vm454_vm5, %v2259_v30  ;;  %v501_v60 = vrot.slane %v2319_v56, 4 }
  0xa5   : > { %v2267_v32 = vpop.permute.xlu1 %270 }
  0xa7   : > { %v2269_v33 = vpop.permute.xlu0 %267 }
  0xa8   : > { %v276_v57 = vsel %vm233_vm0, %v2269_v33, %v2267_v32 }
  0xa9   : > { %v2271_v34 = vpop.permute.xlu1 %333 }
  0xaa   : > { %v342_v42 = vsel %vm237_vm1, %v2271_v34, %v2097_v1 }
  0xab   : > { %v326_v35 = vpop.permute.xlu0 %325 }
  0xac   : > { %v2306_v51 = vsel %vm235_vm2, %v328_v50, %v326_v35 }
  0xad   : > { %v2273_v36 = vpop.permute.xlu1 %383 }
  0xaf   : > { %v2275_v37 = vpop.permute.xlu0 %376 }
  0xb1   : > { %v228_v38 = vpop.permute.xlu1 %227 }
  0xb2   : > { %v234_v61 = vsel %vm233_vm0, %v228_v38, %v2091_v0  ;;  %v238_v62 = vsel %vm237_vm1, %v228_v38, %v2091_v0 }
  0xb3   : > { %v2277_v39 = vpop.permute.xlu0 %386 }
  0xb5   : > { %v2279_v40 = vpop.permute.xlu1 %280 }
  0xb7   : > { %v2281_v41 = vpop.permute.xlu0 %273 }
  0xb8   : > { %v2328_v59 = vsel %vm235_vm2, %v276_v57, %v2281_v41 }
  0xb9   : > { %v2286_v43 = vpop.permute.xlu1 %337  ;;  %v541_v9 = vrot.slane %v2328_v59, 4 }
  0xba   : > { %v2290_v44 = vsel %vm239_vm3, %v342_v42, %v2286_v43 }
  0xbb   : > { %v723_v45 = vrot.slane %v2290_v44, 4  ;;  %v2293_v46 = vpop.permute.xlu0 %283  ;;  %v548_v42 = vsel %vm445_vm4, %v2226_v15, %v541_v9 }
  0xbd   : > { %v2295_v47 = vpop.permute.xlu1 %396  ;;  %v726_v48 = vsel %vm445_vm4, %v2097_v1, %v723_v45  ;;  %v2363_v45 = vsel %vm239_vm3, %v330_v28, %v326_v35 }
  0xbe   : > { %730 = vst.msk [vmem:[#allocation2 + $0x28] sm:$0xff] %vm449_vm6, %v726_v48  ;;  %v734_v48 = vrot.slane %v354_v27, 4 }
  0xbf   : > { %v2300_v49 = vpop.permute.xlu0 %389 }
  0xc0   : > { %v738_v20 = vsel %vm445_vm4, %v2363_v45, %v734_v48 }
  0xc1   : > { %v621_v52 = vpop.permute.xlu1 %620 }
  0xc2   : > { %v2310_v53 = vsel %vm445_vm4, %v2306_v51, %v621_v52  ;;  %v379_v52 = vsel %vm233_vm0, %v2237_v21, %v2263_v31 }
  0xc3   : > { %745 = vrot.lane.b32.xlu1 %v2310_v53, %s2022_s29  ;;  %v2316_v55 = vpop.permute.xlu0 %399  ;;  %v380_v57 = vsel %vm235_vm2, %v379_v52, %v2275_v37 }
  0xc5   : > { %v2324_v58 = vpop.permute.xlu1 %286 }
  0xc7   : > { %v231_v63 = vpop.permute.xlu0 %230 }
  0xc8   : > { %v236_v3 = vsel %vm235_vm2, %v234_v61, %v231_v63  ;;  %v240_v7 = vsel %vm239_vm3, %v238_v62, %v231_v63  ;;  %v799_v62 = vrot.slane %v380_v57, 4  ;;  %v392_v63 = vsel %vm233_vm0, %v2273_v36, %v2277_v39 }
  0xc9   : > { %v440_v10 = vrot.slane %v236_v3, 4  ;;  %v443_v12 = vrot.slane %v240_v7, 4  ;;  %v2338_v13 = vpop.permute.xlu1 %296  ;;  %v510_v17 = vsel %vm445_vm4, %v240_v7, %v501_v60  ;;  %v766_v60 = vrot.slane %v2244_v25, 4 }
  0xca   : > { %520 = vrot.lane.b32.xlu0 %v510_v17, %s3496_s20  ;;  %v355_v25 = vsel %vm237_vm1, %v2207_v4, %v2211_v6  ;;  %v340_v4 = vsel %vm233_vm0, %v2271_v34, %v2097_v1 }
  0xcb   : > { %v2345_v22 = vpop.permute.xlu0 %293  ;;  %v447_v23 = vsel %vm445_vm4, %v2259_v30, %v440_v10  ;;  %v448_v24 = vsel %vm445_vm4, %v2091_v0, %v443_v12  ;;  %v771_v9 = vsel %vm445_vm4, %v2290_v44, %v766_v60  ;;  %v2389_v10 = vsel %vm235_vm2, %v392_v63, %v2300_v49 }
  0xcc   : > { %451 = vst.msk [vmem:[#allocation2 + $0x10] sm:$0xff] %vm449_vm6, %v447_v23  ;;  %452 = vst.msk [vmem:[#allocation2 + $0x20] sm:$0xff] %vm449_vm6, %v448_v24  ;;  %v2402_v17 = vsel %vm239_vm3, %v355_v25, %v2213_v8  ;;  %v831_v18 = vrot.slane %v2389_v10, 4  ;;  %v289_v23 = vsel %vm233_vm0, %v2279_v40, %v2293_v46  ;;  %v341_v8 = vsel %vm235_vm2, %v340_v4, %v2286_v43 }
  0xcd   : > { %v2358_v38 = vpop.permute.xlu1 %409  ;;  %v2433_v34 = vsel %vm445_vm4, %v341_v8, %v2091_v0  ;;  %v2451_v0 = vsel %vm445_vm4, %v354_v27, %v2209_v5  ;;  %v721_v63 = vrot.slane %v341_v8, 4  ;;  %v302_v8 = vsel %vm233_vm0, %v2345_v22, %v2338_v13 }
  0xce   : > { %557 = vrot.lane.b32.xlu0 %v548_v42, %s2035_s17  ;;  %v835_v48 = vsel %vm445_vm4, %v2247_v26, %v831_v18  ;;  %v740_v18 = vsel %vm445_vm4, %v380_v57, %v2267_v32 }
  0xcf   : > { %v2366_v50 = vpop.permute.xlu0 %402 }
  0xd1   : > { %v457_v54 = vpop.permute.xlu1 %456 }
  0xd2   : > { %747 = vrot.lane.b32.xlu0 %v738_v20, %s2022_s29  ;;  %v468_v35 = vsel %vm445_vm4, %v2218_v11, %v457_v54  ;;  %v509_v11 = vsel %vm445_vm4, %v236_v3, %v2157_v2  ;;  %v803_v2 = vsel %vm445_vm4, %v2402_v17, %v799_v62  ;;  %v2417_v3 = vsel %vm235_vm2, %v289_v23, %v2324_v58 }
  0xd3   : > { %477 = vrot.lane.b32.xlu1 %v468_v35, %s2022_s29  ;;  %v2380_v61 = vpop.permute.xlu0 %412  ;;  %v578_v42 = vrot.slane %v2417_v3, 4  ;;  %v405_v54 = vsel %vm233_vm0, %v2295_v47, %v2316_v55  ;;  %v381_v23 = vsel %vm237_vm1, %v2237_v21, %v2263_v31 }
  0xd4   : > { %v2476_v4 = vsel %vm239_vm3, %v381_v23, %v2275_v37  ;;  %v418_v23 = vsel %vm233_vm0, %v2358_v38, %v2380_v61 }
  0xd5   : > { %v307_v7 = vpop.permute.xlu1 %306  ;;  %v585_v20 = vsel %vm445_vm4, %v2259_v30, %v578_v42 }
  0xd6   : > { %780 = vrot.lane.b32.xlu0 %v771_v9, %s3496_s20 }
  0xd7   : > { %518 = vrot.lane.b32.xlu1 %v509_v11, %s3496_s20  ;;  %v2398_v12 = vpop.permute.xlu0 %299 }
  0xd8   : > { %v2490_v37 = vsel %vm235_vm2, %v302_v8, %v2398_v12 }
  0xd9   : > { %v2408_v24 = vpop.permute.xlu1 %415 }
  0xda   : > { %812 = vrot.lane.b32.xlu0 %v803_v2, %s2035_s17 }
  0xdb   : > { %555 = vrot.lane.b32.xlu1 %v468_v35, %s2035_s17  ;;  %v2423_v28 = vpop.permute.xlu0 %309  ;;  %v2446_v35 = vsel %vm235_vm2, %v405_v54, %v2366_v50 }
  0xdc   : > { %v317_v60 = vsel %vm237_vm1, %v307_v7, %v2423_v28  ;;  %v864_v25 = vrot.slane %v2446_v35, 4 }
  0xdd   : > { %v2428_v52 = vpop.permute.xlu1 %425 }
  0xde   : > { %845 = vrot.lane.b32.xlu0 %v835_v48, %s2031_s13  ;;  %v868_v21 = vsel %vm445_vm4, %v2476_v4, %v864_v25  ;;  %v616_v48 = vrot.slane %v2490_v37, 4 }
  0xdf   : > { %778 = vrot.lane.b32.xlu1 %v2433_v34, %s3496_s20  ;;  %v2437_v43 = vpop.permute.xlu0 %422 }
  0xe1   : > { %v2457_v9 = vpop.permute.xlu1 %428 }
  0xe2   : > { %595 = vrot.lane.b32.xlu0 %v585_v20, %s2031_s13  ;;  %v315_v20 = vsel %vm233_vm0, %v307_v7, %v2423_v28 }
  0xe3   : > { %810 = vrot.lane.b32.xlu1 %v2451_v0, %s2035_s17  ;;  %v313_v62 = vpop.permute.xlu0 %312 }
  0xe4   : > { %v2460_v11 = vsel %vm239_vm3, %v317_v60, %v313_v62  ;;  %v316_v25 = vsel %vm235_vm2, %v315_v20, %v313_v62  ;;  %v419_v62 = vsel %vm235_vm2, %v418_v23, %v2408_v24  ;;  %v801_v20 = vrot.slane %v2476_v4, 4 }
  0xe5   : > { %v725_v27 = vsel %vm445_vm4, %v2460_v11, %v721_v63  ;;  %v466_v42 = vpop.permute.xlu1 %465  ;;  %v278_v63 = vsel %vm237_vm1, %v2269_v33, %v2267_v32  ;;  %v463_v33 = vrot.slane %v2226_v15, 4  ;;  %v394_v15 = vsel %vm237_vm1, %v2273_v36, %v2277_v39 }
  0xe6   : > { %751 = vrot.lane.b32.xlu0 %v740_v18, %s2022_s29  ;;  %729 = vst.msk [vmem:[#allocation2 + $0x18] sm:$0xff] %vm449_vm6, %v725_v27  ;;  %v471_v54 = vsel %vm445_vm4, %v2328_v59, %v466_v42  ;;  %v2509_v59 = vsel %vm239_vm3, %v278_v63, %v2281_v41  ;;  %v896_v41 = vrot.slane %v419_v62, 4  ;;  %v2535_v8 = vsel %vm239_vm3, %v394_v15, %v2300_v49 }
  0xe7   : > { %843 = vrot.lane.b32.xlu1 %v2254_v29, %s2031_s13  ;;  %v437_v2 = vpop.permute.xlu0 %436  ;;  %v736_v29 = vrot.slane %v2402_v17, 4  ;;  %v291_v49 = vsel %vm237_vm1, %v2279_v40, %v2293_v46  ;;  %v504_v40 = vrot.slane %v2259_v30, 4  ;;  %v804_v63 = vsel %vm445_vm4, %v2263_v31, %v801_v20 }
  0xe8   : > { %v446_v57 = vsel %vm445_vm4, %v2319_v56, %v437_v2  ;;  %v773_v2 = vsel %vm445_vm4, %v2389_v10, %v2293_v46  ;;  %v769_v10 = vrot.slane %v2247_v26, 4  ;;  %v431_v26 = vsel %vm233_vm0, %v2437_v43, %v2428_v52 }
  0xe9   : > { %450 = vst.msk [vmem:[#allocation2] sm:$0xff] %vm449_vm6, %v446_v57  ;;  %453 = vst.msk [vmem:[#allocation2 + $0x30] sm:$0xff] %vm449_vm6, %v446_v57  ;;  %v739_v60 = vsel %vm445_vm4, %v2211_v6, %v736_v29  ;;  %v623_v6 = vsel %vm445_vm4, %v2509_v59, %v616_v48  ;;  %v2556_v29 = vsel %vm239_vm3, %v291_v49, %v2324_v58 }
  0xea   : > { %877 = vrot.lane.b32.xlu0 %v868_v21, %s2026_s8  ;;  %v772_v36 = vsel %vm445_vm4, %v2223_v14, %v769_v10  ;;  %v432_v14 = vsel %vm235_vm2, %v431_v26, %v2457_v9  ;;  %v511_v58 = vsel %vm445_vm4, %v2228_v16, %v504_v40  ;;  %v407_v48 = vsel %vm237_vm1, %v2295_v47, %v2316_v55  ;;  %v546_v16 = vpop.permute.xlu1 %545 }
  0xeb   : > { %593 = vrot.lane.b32.xlu1 %v446_v57, %s2031_s13  ;;  %v507_v56 = vpop.permute.xlu0 %506  ;;  %v470_v57 = vsel %vm445_vm4, %v2209_v5, %v463_v33  ;;  %v653_v5 = vrot.slane %v316_v25, 4  ;;  %v925_v42 = vrot.slane %v432_v14, 4  ;;  %v2577_v30 = vsel %vm239_vm3, %v407_v48, %v2366_v50 }
  0xec   : > { %v512_v21 = vsel %vm445_vm4, %v2417_v3, %v507_v56  ;;  %v805_v56 = vsel %vm445_vm4, %v2446_v35, %v2338_v13  ;;  %v304_v47 = vsel %vm237_vm1, %v2345_v22, %v2338_v13  ;;  %v550_v50 = vsel %vm445_vm4, %v2490_v37, %v546_v16 }
  0xed   : > { %v657_v3 = vsel %vm445_vm4, %v2556_v29, %v653_v5  ;;  %v929_v35 = vsel %vm445_vm4, %v2577_v30, %v925_v42  ;;  %v543_v22 = vrot.slane %v2509_v59, 4  ;;  %v870_v37 = vsel %vm445_vm4, %v432_v14, %v2233_v19  ;;  %v961_v5 = vld [vmem:[%s3487_s2] sm:$0xf] }
  0xee   : > { %483 = vrot.lane.b32.xlu0 %v471_v54, %s2022_s29  ;;  %v580_v23 = vrot.slane %v2556_v29, 4  ;;  %v433_v33 = vsel %vm237_vm1, %v2437_v43, %v2428_v52 }
  0xef   : > { %749 = vrot.lane.b32.xlu1 %v739_v60, %s2022_s29  ;;  %v583_v27 = vpop.permute.xlu0 %582  ;;  %v2592_v60 = vsel %vm239_vm3, %v304_v47, %v2398_v12  ;;  %v837_v12 = vsel %vm445_vm4, %v419_v62, %v2423_v28  ;;  %v549_v31 = vsel %vm445_vm4, %v2267_v32, %v543_v22 }
  0xf0   : > { %v587_v7 = vsel %vm445_vm4, %v316_v25, %v583_v27  ;;  %v687_v25 = vrot.slane %v2306_v51, 4  ;;  %v833_v51 = vrot.slane %v2535_v8, 4  ;;  %v586_v32 = vsel %vm445_vm4, %v2293_v46, %v580_v23 }
  0xf1   : > { %728 = vst.msk [vmem:[#allocation2 + $0x8] sm:$0xff] %vm449_vm6, %v587_v7  ;;  %v618_v62 = vrot.slane %v2592_v60, 4 }
  0xf2   : > { %632 = vrot.lane.b32.xlu0 %v623_v6, %s2026_s8  ;;  %v691_v27 = vsel %vm445_vm4, %v2592_v60, %v687_v25  ;;  %v836_v6 = vsel %vm445_vm4, %v2277_v39, %v833_v51  ;;  %v420_v39 = vsel %vm237_vm1, %v2358_v38, %v2380_v61 }
  0xf3   : > { %875 = vrot.lane.b32.xlu1 %v740_v18, %s2026_s8  ;;  %v900_v18 = vsel %vm445_vm4, %v2535_v8, %v896_v41  ;;  %v421_v41 = vsel %vm239_vm3, %v420_v39, %v2408_v24  ;;  %v624_v38 = vsel %vm445_vm4, %v2338_v13, %v618_v62 }
  0xf6   : > { %784 = vrot.lane.b32.xlu0 %v773_v2, %s3496_s20 }
  0xf7   : > { %481 = vrot.lane.b32.xlu1 %v470_v57, %s2022_s29  ;;  %v655_v57 = vrot.slane %v2460_v11, 4 }
  0xf9   : > { %v658_v13 = vsel %vm445_vm4, %v2423_v28, %v655_v57 }
  0xfa   : > { %906 = vrot.lane.b32.xlu0 %v900_v18, %s2021_s28 }
  0xfb   : > { %630 = vrot.lane.b32.xlu1 %v471_v54, %s2026_s8 }
  0xfe   : > { %524 = vrot.lane.b32.xlu0 %v512_v21, %s3496_s20 }
  0xff   : > { %782 = vrot.lane.b32.xlu1 %v772_v36, %s3496_s20  ;;  %v2041_v36 = vmov 0  }
 0x100   : > { %2004 = vset.pattern.permute.xlu0 %v2041_v36  ;;  %2005 = vset.pattern.permute.xlu1 %v2041_v36 }
 0x102   : > { %666 = vrot.lane.b32.xlu0 %v657_v3, %s2021_s28 }
 0x103   : > { %904 = vrot.lane.b32.xlu1 %v773_v2, %s2021_s28  ;;  %v898_v2 = vrot.slane %v421_v41, 4 }
 0x105   : > { %v901_v24 = vsel %vm445_vm4, %v2380_v61, %v898_v2 }
 0x106   : > { %816 = vrot.lane.b32.xlu0 %v805_v56, %s2035_s17 }
 0x107   : > { %522 = vrot.lane.b32.xlu1 %v511_v58, %s3496_s20 }
 0x108   : > { %v480_v54 = vpop.permute.xlu0 %479 }
 0x109   : > { %494 = vst.msk [vmem:[#allocation2 + $0x10] sm:$0xff] %vm492_vm7, %v480_v54 }
 0x10a   : > { %935 = vrot.lane.b32.xlu0 %v929_v35, %s2018_s25 }
 0x10b   : > { %664 = vrot.lane.b32.xlu1 %v512_v21, %s2021_s28 }
 0x10e   : > { %561 = vrot.lane.b32.xlu0 %v550_v50, %s2035_s17 }
 0x10f   : > { %814 = vrot.lane.b32.xlu1 %v804_v63, %s2035_s17 }
 0x112   : > { %700 = vrot.lane.b32.xlu0 %v691_v27, %s2018_s25 }
 0x113   : > { %933 = vrot.lane.b32.xlu1 %v805_v56, %s2018_s25 }
 0x116   : > { %849 = vrot.lane.b32.xlu0 %v837_v12, %s2031_s13 }
 0x117   : > { %559 = vrot.lane.b32.xlu1 %v549_v31, %s2035_s17 }
 0x11a   : > { %599 = vrot.lane.b32.xlu0 %v587_v7, %s2031_s13  ;;  %v866_v7 = vrot.slane %v2577_v30, 4 }
 0x11b   : > { %698 = vrot.lane.b32.xlu1 %v550_v50, %s2018_s25 }
 0x11c   : > { %v869_v46 = vsel %vm445_vm4, %v2316_v55, %v866_v7 }
 0x11e   : > { %881 = vrot.lane.b32.xlu0 %v870_v37, %s2026_s8 }
 0x11f   : > { %847 = vrot.lane.b32.xlu1 %v836_v6, %s2031_s13 }
 0x122   : > { %636 = vrot.lane.b32.xlu0 %v2310_v53, %s2026_s8  ;;  %v434_v53 = vsel %vm239_vm3, %v433_v33, %v2457_v9  ;;  %v689_v9 = vrot.slane %v2363_v45, 4 }
 0x123   : > { %597 = vrot.lane.b32.xlu1 %v586_v32, %s2031_s13  ;;  %v927_v43 = vrot.slane %v434_v53, 4 }
 0x125   : > { %v930_v55 = vsel %vm445_vm4, %v2428_v52, %v927_v43 }
 0x126   : > { %910 = vrot.lane.b32.xlu0 %v837_v12, %s2021_s28 }
 0x127   : > { %879 = vrot.lane.b32.xlu1 %v869_v46, %s2026_s8 }
 0x12a   : > { %670 = vrot.lane.b32.xlu0 %v2433_v34, %s2021_s28  ;;  %v692_v34 = vsel %vm445_vm4, %v2233_v19, %v689_v9 }
 0x12b   : > { %634 = vrot.lane.b32.xlu1 %v624_v38, %s2026_s8 }
 0x12e   : > { %937 = vrot.lane.b32.xlu0 %v930_v55, %s2018_s25 }
 0x12f   : > { %908 = vrot.lane.b32.xlu1 %v901_v24, %s2021_s28 }
 0x132   : > { %702 = vrot.lane.b32.xlu0 %v692_v34, %s2018_s25 }
 0x133   : > { %668 = vrot.lane.b32.xlu1 %v658_v13, %s2021_s28 }
 0x135   : > { %v746_v52 = vpop.permute.xlu1 %745 }
 0x136   : > { %760 = vst.msk [vmem:[#allocation2 + $0x8] sm:$0xff] %vm492_vm7, %v746_v52  ;;  %786 = vrot.lane.b32.xlu0 %v2535_v8, %s3496_s20 }
 0x137   : > { %753 = vrot.lane.b32.xlu1 %v2476_v4, %s2022_s29 }
 0x13a   : > { %818 = vrot.lane.b32.xlu0 %v2577_v30, %s2035_s17 }
 0x13b   : > { %485 = vrot.lane.b32.xlu1 %v2509_v59, %s2022_s29 }
 0x13c   : > { %v521_v19 = vpop.permute.xlu0 %520 }
 0x13d   : > { %535 = vst.msk [vmem:[#allocation2 + $0x10] sm:$0xff] %vm3502_vm8, %v521_v19 }
 0x13e   : > { %851 = vrot.lane.b32.xlu0 %v421_v41, %s2031_s13 }
 0x13f   : > { %704 = vrot.lane.b32.xlu1 %v2451_v0, %s2018_s25 }
 0x140   : > { %v558_v61 = vpop.permute.xlu0 %557 }
 0x141   : > { %572 = vst.msk [vmem:[#allocation2 + $0x10] sm:$0xff] %vm3501_vm9, %v558_v61 }
 0x142   : > { %883 = vrot.lane.b32.xlu0 %v434_v53, %s2026_s8 }
 0x143   : > { %526 = vrot.lane.b32.xlu1 %v2556_v29, %s3496_s20  ;;  %s3510_s20 = smov 46  }
 0x144   : > { %v748_v28 = vpop.permute.xlu0 %747 }
 0x145   : > { %761 = vst.msk [vmem:[#allocation2 + $0x18] sm:$0xff] %vm492_vm7, %v748_v28  ;;  %v478_v4 = vpop.permute.xlu1 %477 }
 0x146   : > { %493 = vst.msk [vmem:[#allocation2] sm:$0xff] %vm492_vm7, %v478_v4  ;;  %912 = vrot.lane.b32.xlu0 %v421_v41, %s2021_s28 }
 0x147   : > { %563 = vrot.lane.b32.xlu1 %v2592_v60, %s2035_s17 }
 0x148   : > { %v781_v0 = vpop.permute.xlu0 %780 }
 0x149   : > { %794 = vst.msk [vmem:[#allocation2 + $0x18] sm:$0xff] %vm3502_vm8, %v781_v0  ;;  %v519_v59 = vpop.permute.xlu1 %518 }
 0x14a   : > { %534 = vst.msk [vmem:[#allocation2] sm:$0xff] %vm3502_vm8, %v519_v59  ;;  %939 = vrot.lane.b32.xlu0 %v2577_v30, %s2018_s25 }
 0x14b   : > { %601 = vrot.lane.b32.xlu1 %v2460_v11, %s2031_s13  ;;  %v2040_v11 = vmov 0.0  }
 0x14c   : > { %v813_v15 = vpop.permute.xlu0 %812  ;;  %1041 = vmatprep.mubr.f32.mxu0 %v2040_v11  ;;  %1865 = vmatprep.mubr.f32.mxu1 %v2040_v11 }
 0x14d   : > { %826 = vst.msk [vmem:[#allocation2 + $0x18] sm:$0xff] %vm3501_vm9, %v813_v15  ;;  %v556_v8 = vpop.permute.xlu1 %555 }
 0x14e   : > { %571 = vst.msk [vmem:[#allocation2] sm:$0xff] %vm3501_vm9, %v556_v8  ;;  %964 = vperm.xlu0 %2004, %v961_v5  }
 0x14f   : > { %638 = vrot.lane.b32.xlu1 %v2363_v45, %s2026_s8 }
 0x150   : > { %v846_v18 = vpop.permute.xlu0 %845 }
 0x151   : > { %859 = vst.msk [vmem:[#allocation2 + $0x18] sm:$0xff] %vm3498_vm10, %v846_v18  ;;  %v779_v10 = vpop.permute.xlu1 %778 }
 0x152   : > { %793 = vst.msk [vmem:[#allocation2 + $0x8] sm:$0xff] %vm3502_vm8, %v779_v10 }
 0x153   : > { %672 = vrot.lane.b32.xlu1 %v2290_v44, %s2021_s28 }
 0x154   : > { %v596_v21 = vpop.permute.xlu0 %595 }
 0x155   : > { %610 = vst.msk [vmem:[#allocation2 + $0x10] sm:$0xff] %vm3498_vm10, %v596_v21  ;;  %v811_v45 = vpop.permute.xlu1 %810 }
 0x156   : > { %825 = vst.msk [vmem:[#allocation2 + $0x8] sm:$0xff] %vm3501_vm9, %v811_v45 }
 0x157   : > { %706 = vrot.lane.b32.xlu1 %v2402_v17, %s2018_s25 }
 0x158   : > { %v752_v44 = vpop.permute.xlu0 %751 }
 0x159   : > { %763 = vst.msk [vmem:[#allocation2 + $0x38] sm:$0xff] %vm492_vm7, %v752_v44  ;;  %v844_v49 = vpop.permute.xlu1 %843 }
 0x15a   : > { %858 = vst.msk [vmem:[#allocation2 + $0x8] sm:$0xff] %vm3498_vm10, %v844_v49 }
 0x15c   : > { %v878_v26 = vpop.permute.xlu0 %877 }
 0x15d   : > { %891 = vst.msk [vmem:[#allocation2 + $0x18] sm:$0xff] %vm3500_vm11, %v878_v26  ;;  %v594_v29 = vpop.permute.xlu1 %593 }
 0x15e   : > { %609 = vst.msk [vmem:[#allocation2] sm:$0xff] %vm3498_vm10, %v594_v29 }
 0x160   : > { %v484_v3 = vpop.permute.xlu0 %483 }
 0x161   : > { %496 = vst.msk [vmem:[#allocation2 + $0x30] sm:$0xff] %vm492_vm7, %v484_v3  ;;  %v750_v14 = vpop.permute.xlu1 %749 }
 0x162   : > { %762 = vst.msk [vmem:[#allocation2 + $0x28] sm:$0xff] %vm492_vm7, %v750_v14  ;;  %v950_v14 = vld [vmem:[%s3486_s1] sm:$0xf] }
 0x164   : > { %v633_v17 = vpop.permute.xlu0 %632 }
 0x165   : > { %647 = vst.msk [vmem:[#allocation2 + $0x10] sm:$0xff] %vm3500_vm11, %v633_v17  ;;  %v876_v40 = vpop.permute.xlu1 %875 }
 0x166   : > { %890 = vst.msk [vmem:[#allocation2 + $0x8] sm:$0xff] %vm3500_vm11, %v876_v40 }
 0x168   : > { %v785_v42 = vpop.permute.xlu0 %784 }
 0x169   : > { %796 = vst.msk [vmem:[#allocation2 + $0x38] sm:$0xff] %vm3502_vm8, %v785_v42  ;;  %v482_v56 = vpop.permute.xlu1 %481 }
 0x16a   : > { %495 = vst.msk [vmem:[#allocation2 + $0x20] sm:$0xff] %vm492_vm7, %v482_v56 }
 0x16c   : > { %v907_v58 = vpop.permute.xlu0 %906 }
 0x16d   : > { %920 = vst.msk [vmem:[#allocation2 + $0x18] sm:$0xff] %vm3499_vm12, %v907_v58  ;;  %v631_v48 = vpop.permute.xlu1 %630 }
 0x16e   : > { %646 = vst.msk [vmem:[#allocation2] sm:$0xff] %vm3500_vm11, %v631_v48 }
 0x170   : > { %v525_v30 = vpop.permute.xlu0 %524 }
 0x171   : > { %537 = vst.msk [vmem:[#allocation2 + $0x30] sm:$0xff] %vm3502_vm8, %v525_v30  ;;  %v783_v54 = vpop.permute.xlu1 %782 }
 0x172   : > { %795 = vst.msk [vmem:[#allocation2 + $0x28] sm:$0xff] %vm3502_vm8, %v783_v54 }
 0x174   : > { %v667_v35 = vpop.permute.xlu0 %666 }
 0x175   : > { %681 = vst.msk [vmem:[#allocation2 + $0x10] sm:$0xff] %vm3499_vm12, %v667_v35  ;;  %v905_v20 = vpop.permute.xlu1 %904 }
 0x176   : > { %919 = vst.msk [vmem:[#allocation2 + $0x8] sm:$0xff] %vm3499_vm12, %v905_v20 }
 0x178   : > { %v817_v16 = vpop.permute.xlu0 %816 }
 0x179   : > { %828 = vst.msk [vmem:[#allocation2 + $0x38] sm:$0xff] %vm3501_vm9, %v817_v16  ;;  %v523_v47 = vpop.permute.xlu1 %522 }
 0x17a   : > { %536 = vst.msk [vmem:[#allocation2 + $0x20] sm:$0xff] %vm3502_vm8, %v523_v47  ;;  %vm718_vm8 = vcmask 1044352  }
 0x17c   : > { %v936_v50 = vpop.permute.xlu0 %935 }
 0x17d   : > { %946 = vst.msk [vmem:[#allocation2 + $0x18] sm:$0xff] %vm3503_vm13, %v936_v50  ;;  %v665_v60 = vpop.permute.xlu1 %664 }
 0x17e   : > { %680 = vst.msk [vmem:[#allocation2] sm:$0xff] %vm3499_vm12, %v665_v60 }
 0x180   : > { %v562_v63 = vpop.permute.xlu0 %561 }
 0x181   : > { %574 = vst.msk [vmem:[#allocation2 + $0x30] sm:$0xff] %vm3501_vm9, %v562_v63  ;;  %v815_v25 = vpop.permute.xlu1 %814 }
 0x182   : > { %827 = vst.msk [vmem:[#allocation2 + $0x28] sm:$0xff] %vm3501_vm9, %v815_v25 }
 0x184   : > { %v701_v27 = vpop.permute.xlu0 %700  ;;  %v954_v6 = vld [vmem:[#allocation2 + $0x18] sm:$0xff] }
 0x185   : > { %715 = vst.msk [vmem:[#allocation2 + $0x10] sm:$0xff] %vm3503_vm13, %v701_v27  ;;  %v934_v22 = vpop.permute.xlu1 %933 }
 0x186   : > { %945 = vst.msk [vmem:[#allocation2 + $0x8] sm:$0xff] %vm3503_vm13, %v934_v22 }
 0x188   : > { %v850_v12 = vpop.permute.xlu0 %849 }
 0x189   : > { %861 = vst.msk [vmem:[#allocation2 + $0x38] sm:$0xff] %vm3498_vm10, %v850_v12  ;;  %v560_v31 = vpop.permute.xlu1 %559 }
 0x18a   : > { %573 = vst.msk [vmem:[#allocation2 + $0x20] sm:$0xff] %vm3501_vm9, %v560_v31  ;;  %vm684_vm9 = vcmask 913152  }
 0x18c   : > { %v600_v51 = vpop.permute.xlu0 %599  ;;  %v953_v46 = vld [vmem:[#allocation2 + $0x10] sm:$0xff] }
 0x18d   : > { %612 = vst.msk [vmem:[#allocation2 + $0x30] sm:$0xff] %vm3498_vm10, %v600_v51  ;;  %v699_v37 = vpop.permute.xlu1 %698  ;;  %v952_v23 = vld [vmem:[#allocation2 + $0x8] sm:$0xff] }
 0x18e   : > { %714 = vst.msk [vmem:[#allocation2] sm:$0xff] %vm3503_vm13, %v699_v37  ;;  %v1955_v32 = vpack.c.bf16 %v954_v6, %v952_v23 }
 0x190   : > { %1956 = vmatprep.subr.bf16.mxu0 %v1955_v32  ;;  %v882_v7 = vpop.permute.xlu0 %881 }
 0x191   : > { %893 = vst.msk [vmem:[#allocation2 + $0x38] sm:$0xff] %vm3500_vm11, %v882_v7  ;;  %v848_v33 = vpop.permute.xlu1 %847 }
 0x192   : > { %860 = vst.msk [vmem:[#allocation2 + $0x28] sm:$0xff] %vm3498_vm10, %v848_v33 }
 0x194   : > { %v637_v62 = vpop.permute.xlu0 %636 }
 0x195   : > { %649 = vst.msk [vmem:[#allocation2 + $0x30] sm:$0xff] %vm3500_vm11, %v637_v62  ;;  %v598_v39 = vpop.permute.xlu1 %597  ;;  %v951_v53 = vld [vmem:[#allocation2] sm:$0xff] }
 0x196   : > { %611 = vst.msk [vmem:[#allocation2 + $0x20] sm:$0xff] %vm3498_vm10, %v598_v39  ;;  %v1957_v41 = vpack.c.bf16 %v953_v46, %v951_v53  ;;  %vm575_vm10 = vcmask 519552  }
 0x198   : > { %1958 = vmatpush1.bf16.msra.mxu0 %v1957_v41  ;;  %v911_v43 = vpop.permute.xlu0 %910 }
 0x199   : > { %922 = vst.msk [vmem:[#allocation2 + $0x38] sm:$0xff] %vm3499_vm12, %v911_v43  ;;  %v880_v2 = vpop.permute.xlu1 %879 }
 0x19a   : > { %948 = vst.msk [vmem:[#allocation2 + $0x38] sm:$0xff] %vm3503_vm13, %v934_v22 }
 0x19b   : > { %892 = vst.msk [vmem:[#allocation2 + $0x28] sm:$0xff] %vm3500_vm11, %v880_v2 }
 0x19c   : > { %v671_v38 = vpop.permute.xlu0 %670 }
 0x19d   : > { %683 = vst.msk [vmem:[#allocation2 + $0x30] sm:$0xff] %vm3499_vm12, %v671_v38  ;;  %v635_v9 = vpop.permute.xlu1 %634 }
 0x19e   : > { %648 = vst.msk [vmem:[#allocation2 + $0x20] sm:$0xff] %vm3500_vm11, %v635_v9  ;;  %vm650_vm11 = vcmask 781952  }
 0x1a0   : > { %v938_v55 = vpop.permute.xlu0 %937 }
 0x1a1   : > { %v909_v57 = vpop.permute.xlu1 %908  ;;  %v958_v61 = vld [vmem:[#allocation2 + $0x38] sm:$0xff] }
 0x1a2   : > { %921 = vst.msk [vmem:[#allocation2 + $0x28] sm:$0xff] %vm3499_vm12, %v909_v57 }
 0x1a3   : > { %947 = vst.msk [vmem:[#allocation2 + $0x28] sm:$0xff] %vm3503_vm13, %v938_v55 }
 0x1a4   : > { %v703_v24 = vpop.permute.xlu0 %702 }
 0x1a5   : > { %v669_v34 = vpop.permute.xlu1 %668 }
 0x1a6   : > { %682 = vst.msk [vmem:[#allocation2 + $0x20] sm:$0xff] %vm3499_vm12, %v669_v34  ;;  %vm613_vm12 = vcmask 650752  }
 0x1a7   : > { %716 = vst.msk [vmem:[#allocation2 + $0x20] sm:$0xff] %vm3503_vm13, %v703_v24 }
 0x1a8   : > { %v787_v13 = vpop.permute.xlu0 %786 }
 0x1a9   : > { %v754_v52 = vpop.permute.xlu1 %753 }
 0x1aa   : > { %764 = vst.msk [vmem:[#allocation2 + $0x48] sm:$0xf] %vm497_vm14, %v754_v52  ;;  %v956_v19 = vld [vmem:[#allocation2 + $0x28] sm:$0xff] }
 0x1ab   : > { %797 = vst.msk [vmem:[#allocation2 + $0x48] sm:$0xf] %vm538_vm15, %v787_v13  ;;  %v1959_v28 = vpack.c.bf16 %v958_v61, %v956_v19 }
 0x1ac   : > { %v819_v4 = vpop.permute.xlu0 %818 }
 0x1ad   : > { %829 = vst.msk [vmem:[#allocation2 + $0x48] sm:$0xf] %vm575_vm10, %v819_v4  ;;  %v486_v0 = vpop.permute.xlu1 %485  ;;  %1960 = vmatprep.subr.bf16.mxu0 %v1959_v28 }
 0x1ae   : > { %498 = vst.msk [vmem:[#allocation2 + $0x40] sm:$0xf] %vm497_vm14, %v486_v0  ;;  %v955_v5 = vld [vmem:[#allocation2 + $0x20] sm:$0xff] }
 0x1b0   : > { %v852_v59 = vpop.permute.xlu0 %851 }
 0x1b1   : > { %862 = vst.msk [vmem:[#allocation2 + $0x48] sm:$0xf] %vm613_vm12, %v852_v59  ;;  %v705_v15 = vpop.permute.xlu1 %704 }
 0x1b2   : > { %717 = vst.msk [vmem:[#allocation2 + $0x30] sm:$0xff] %vm3503_vm13, %v705_v15  ;;  %vm967_vm13 = vcmask 293888  }
 0x1b4   : > { %v884_v8 = vpop.permute.xlu0 %883 }
 0x1b5   : > { %894 = vst.msk [vmem:[#allocation2 + $0x48] sm:$0xf] %vm650_vm11, %v884_v8  ;;  %v527_v18 = vpop.permute.xlu1 %526 }
 0x1b6   : > { %539 = vst.msk [vmem:[#allocation2 + $0x40] sm:$0xf] %vm538_vm15, %v527_v18 }
 0x1b8   : > { %v913_v10 = vpop.permute.xlu0 %912 }
 0x1b9   : > { %923 = vst.msk [vmem:[#allocation2 + $0x48] sm:$0xf] %vm684_vm9, %v913_v10  ;;  %v564_v11 = vpop.permute.xlu1 %563  ;;  %v957_v21 = vld [vmem:[#allocation2 + $0x30] sm:$0xff] }
 0x1ba   : > { %576 = vst.msk [vmem:[#allocation2 + $0x40] sm:$0xf] %vm575_vm10, %v564_v11  ;;  %v1961_v36 = vpack.c.bf16 %v957_v21, %v955_v5 }
 0x1bc   : > { %1962 = vmatpush1.bf16.msra.mxu0 %v1961_v36  ;;  %v940_v45 = vpop.permute.xlu0 %939 }
 0x1bd   : > { %949 = vst.msk [vmem:[#allocation2 + $0x48] sm:$0xf] %vm718_vm8, %v940_v45  ;;  %v602_v44 = vpop.permute.xlu1 %601 }
 0x1be   : > { %614 = vst.msk [vmem:[#allocation2 + $0x40] sm:$0xf] %vm613_vm12, %v602_v44 }
 0x1c1   : > { %v639_v49 = vpop.permute.xlu1 %638 }
 0x1c2   : > { %651 = vst.msk [vmem:[#allocation2 + $0x40] sm:$0xf] %vm650_vm11, %v639_v49 }
 0x1c4   : > { %v960_v26 = vld [vmem:[#allocation2 + $0x48] sm:$0xf] }
 0x1c5   : > { %v673_v29 = vpop.permute.xlu1 %672  ;;  %1945 = vmatprep.subr.msk.mxu0 %vm445_vm4, %v960_v26 }
 0x1c6   : > { %685 = vst.msk [vmem:[#allocation2 + $0x40] sm:$0xf] %vm684_vm9, %v673_v29 }
 0x1c9   : > { %v707_v3 = vpop.permute.xlu1 %706 }
 0x1ca   : > { %719 = vst.msk [vmem:[#allocation2 + $0x40] sm:$0xf] %vm718_vm8, %v707_v3 }
 0x1cd   : > { %v965_v40 = vpop.permute.xlu0 %964 }
 0x1d1   : > { %v959_v17 = vld [vmem:[#allocation2 + $0x40] sm:$0xf] }
 0x1d2   : > { %1946 = vmatpush1.msk.msra.mxu0 %vm445_vm4, %v959_v17 }
 0x1d3   : > { %1947 = vmatmul.mubr.msk.f32.vlgmr.msra.gmra.mrb[0].mxu0 %vm967_vm13, %v950_v14 }
 0x2a6   : > { %v1043_v42 = vpop.f32.mrb[0].mxu0 }
 0x2a7   : > { %v1044_v56 = vadd.f32 %v1043_v42, %v965_v40  ;;  %v1045_v58 = vpop.f32.mrb[1].mxu0 }
 0x2a8   : > { %v1046_v30 = vadd.f32 %v1045_v58, %v965_v40 }
 0x2a9   : > { %v2765_v48 = vmax.f32 %v1044_v56, 0.0 }
 0x2aa   : > { %v2811_v54 = vmax.f32 %v1046_v30, 0.0 }
 0x2ab   : > { %1064 = vrot.lane.b32.xlu1 %v2765_v48, %s2018_s25  ;;  %1061 = vrot.lane.b32.xlu0 %v2765_v48, %s2017_s24  ;;  %v1254_v35 = vrot.slane %v2765_v48, 4 }
 0x2ac   : > { %v2867_v20 = vrot.slane %v2811_v54, 4 }
 0x2af   : > { %1067 = vrot.lane.b32.xlu1 %v2765_v48, %s2020_s27  ;;  %1074 = vrot.lane.b32.xlu0 %v2765_v48, %s2019_s26 }
 0x2b3   : > { %1077 = vrot.lane.b32.xlu1 %v2765_v48, %s2021_s28  ;;  %1139 = vrot.lane.b32.xlu0 %v2765_v48, %s2023_s30 }
 0x2b7   : > { %1142 = vrot.lane.b32.xlu1 %v2765_v48, %s2022_s29  ;;  %1087 = vrot.lane.b32.xlu0 %v2765_v48, %s2024_s6 }
 0x2bb   : > { %1080 = vrot.lane.b32.xlu1 %v2765_v48, %s2025_s7  ;;  %1145 = vrot.lane.b32.xlu0 %v2765_v48, %s3504_s10  ;;  %s3512_s10 = smov 34  }
 0x2bf   : > { %1090 = vrot.lane.b32.xlu1 %v2765_v48, %s2026_s8  ;;  %1093 = vrot.lane.b32.xlu0 %v2765_v48, %s2030_s12 }
 0x2c3   : > { %1051 = vrot.lane.b32.xlu1 %v2765_v48, %s2027_s9  ;;  %1103 = vrot.lane.b32.xlu0 %v2765_v48, %s2031_s13 }
 0x2c7   : > { %1100 = vrot.lane.b32.xlu1 %v2765_v48, %s2029_s11  ;;  %1054 = vrot.lane.b32.xlu0 %v2765_v48, %s2032_s14 }
 0x2cb   : > { %1106 = vrot.lane.b32.xlu1 %v2765_v48, %s2034_s16  ;;  %1113 = vrot.lane.b32.xlu0 %v2765_v48, %s3510_s20 }
 0x2cf   : > { %1116 = vrot.lane.b32.xlu1 %v2765_v48, %s2035_s17  ;;  %1119 = vrot.lane.b32.xlu0 %v2765_v48, %s2037_s22 }
 0x2d3   : > { %1126 = vrot.lane.b32.xlu1 %v2765_v48, %s2036_s21  ;;  %1129 = vrot.lane.b32.xlu0 %v2765_v48, %s3511_s15 }
 0x2d7   : > { %1132 = vrot.lane.b32.xlu1 %v2765_v48, %s3512_s10  ;;  %1169 = vrot.lane.b32.xlu0 %v2811_v54, %s2020_s27 }
 0x2db   : > { %1163 = vrot.lane.b32.xlu1 %v2811_v54, %s2017_s24  ;;  %1179 = vrot.lane.b32.xlu0 %v2811_v54, %s2021_s28  ;;  %s3513_s24 = smov 18  }
 0x2df   : > { %1166 = vrot.lane.b32.xlu1 %v2811_v54, %s2018_s25  ;;  %1182 = vrot.lane.b32.xlu0 %v2811_v54, %s2025_s7 }
 0x2e3   : > { %1176 = vrot.lane.b32.xlu1 %v2811_v54, %s2019_s26  ;;  %1192 = vrot.lane.b32.xlu0 %v2811_v54, %s2026_s8 }
 0x2e7   : > { %1189 = vrot.lane.b32.xlu1 %v2811_v54, %s2024_s6  ;;  %1195 = vrot.lane.b32.xlu0 %v2811_v54, %s2030_s12 }
 0x2eb   : > { %1153 = vrot.lane.b32.xlu1 %v2811_v54, %s2027_s9  ;;  %1205 = vrot.lane.b32.xlu0 %v2811_v54, %s2031_s13 }
 0x2ef   : > { %1202 = vrot.lane.b32.xlu1 %v2811_v54, %s2029_s11  ;;  %1208 = vrot.lane.b32.xlu0 %v2811_v54, %s2034_s16 }
 0x2f3   : > { %1156 = vrot.lane.b32.xlu1 %v2811_v54, %s2032_s14  ;;  %1218 = vrot.lane.b32.xlu0 %v2811_v54, %s2035_s17 }
 0x2f7   : > { %1215 = vrot.lane.b32.xlu1 %v2811_v54, %s3510_s20  ;;  %1221 = vrot.lane.b32.xlu0 %v2811_v54, %s2037_s22 }
 0x2fb   : > { %1228 = vrot.lane.b32.xlu1 %v2811_v54, %s2036_s21  ;;  %1231 = vrot.lane.b32.xlu0 %v2811_v54, %s3511_s15 }
 0x2ff   : > { %1234 = vrot.lane.b32.xlu1 %v2811_v54, %s3512_s10  ;;  %1241 = vrot.lane.b32.xlu0 %v2811_v54, %s2023_s30 }
 0x303   : > { %1244 = vrot.lane.b32.xlu1 %v2811_v54, %s2022_s29  ;;  %1247 = vrot.lane.b32.xlu0 %v2811_v54, %s3513_s24 }
 0x307   : > { %1255 = vrot.lane.b32.xlu0 %v1254_v35, %s2021_s28  ;;  %1428 = vrot.lane.b32.xlu1 %v1254_v35, %s2022_s29 }
 0x30b   : > { %1281 = vrot.lane.b32.xlu0 %v1254_v35, %s2026_s8  ;;  %1272 = vrot.lane.b32.xlu1 %v1254_v35, %s2018_s25 }
 0x30f   : > { %1320 = vrot.lane.b32.xlu0 %v1254_v35, %s2031_s13  ;;  %1532 = vrot.lane.b32.xlu1 %v2867_v20, %s2021_s28 }
 0x313   : > { %1357 = vrot.lane.b32.xlu0 %v1254_v35, %s2035_s17  ;;  %1548 = vrot.lane.b32.xlu1 %v2867_v20, %s2026_s8 }
 0x317   : > { %1392 = vrot.lane.b32.xlu0 %v1254_v35, %s3511_s15  ;;  %1584 = vrot.lane.b32.xlu1 %v2867_v20, %s2031_s13 }
 0x31b   : > { %1497 = vrot.lane.b32.xlu0 %v2867_v20, %s2018_s25  ;;  %1619 = vrot.lane.b32.xlu1 %v2867_v20, %s2035_s17 }
 0x31d   : > { %v2882_v16 = vpop.permute.xlu1 %1064  ;;  %v2884_v47 = vpop.permute.xlu0 %1061 }
 0x31f   : > { %1654 = vrot.lane.b32.xlu1 %v2867_v20, %s3511_s15 }
 0x321   : > { %v2888_v50 = vpop.permute.xlu1 %1067  ;;  %v2890_v60 = vpop.permute.xlu0 %1074 }
 0x323   : > { %1690 = vrot.lane.b32.xlu1 %v2867_v20, %s2022_s29 }
 0x325   : > { %v2894_v63 = vpop.permute.xlu1 %1077  ;;  %v2896_v25 = vpop.permute.xlu0 %1139 }
 0x326   : > { %v1085_v31 = vsel %vm237_vm1, %v2890_v60, %v2894_v63 }
 0x329   : > { %v2898_v27 = vpop.permute.xlu1 %1142  ;;  %v2900_v22 = vpop.permute.xlu0 %1087 }
 0x32a   : > { %3514 = vst [vmem:[#allocation5_spill] sm:$0xff] %v2898_v27  ;;  %v1150_v49 = vsel %vm237_vm1, %v2896_v25, %v2898_v27 }
 0x32d   : > { %v2902_v12 = vpop.permute.xlu1 %1080  ;;  %v2907_v51 = vpop.permute.xlu0 %1145 }
 0x32e   : > { %v2911_v37 = vsel %vm239_vm3, %v1085_v31, %v2902_v12  ;;  %v3006_v29 = vsel %vm239_vm3, %v1150_v49, %v2907_v51 }
 0x32f   : > { %1271 = vst.msk [vmem:[#allocation3 + $0x40] sm:$0xf] %vm454_vm5, %v2911_v37 }
 0x331   : > { %v2915_v23 = vpop.permute.xlu1 %1090  ;;  %v2917_v6 = vpop.permute.xlu0 %1093 }
 0x332   : > { %v1098_v32 = vsel %vm237_vm1, %v2900_v22, %v2915_v23 }
 0x333   : > { %v2924_v7 = vsel %vm239_vm3, %v1098_v32, %v2917_v6 }
 0x334   : > { %1301 = vrot.lane.b32.xlu0 %v2924_v7, %s2022_s29 }
 0x335   : > { %v1052_v33 = vpop.permute.xlu1 %1051  ;;  %v2928_v62 = vpop.permute.xlu0 %1103 }
 0x336   : > { %v1057_v39 = vsel %vm233_vm0, %v1052_v33, %v2765_v48  ;;  %v1059_v53 = vsel %vm237_vm1, %v1052_v33, %v2765_v48 }
 0x339   : > { %v2934_v46 = vpop.permute.xlu1 %1100  ;;  %v1055_v41 = vpop.permute.xlu0 %1054 }
 0x33a   : > { %v1058_v43 = vsel %vm235_vm2, %v1057_v39, %v1055_v41  ;;  %v2938_v2 = vsel %vm239_vm3, %v1059_v53, %v1055_v41  ;;  %v1111_v57 = vsel %vm237_vm1, %v2934_v46, %v2928_v62 }
 0x33b   : > { %v1259_v38 = vrot.slane %v1058_v43, 4  ;;  %v1262_v9 = vrot.slane %v2938_v2, 4  ;;  %v2942_v55 = vsel %vm445_vm4, %v1058_v43, %v1254_v35 }
 0x33d   : > { %v2947_v24 = vpop.permute.xlu1 %1106  ;;  %v2949_v34 = vpop.permute.xlu0 %1113  ;;  %v1266_v13 = vsel %vm445_vm4, %v2765_v48, %v1262_v9  ;;  %v1265_v52 = vsel %vm445_vm4, %v2911_v37, %v1259_v38 }
 0x33e   : > { %v2957_v19 = vsel %vm239_vm3, %v1111_v57, %v2947_v24  ;;  %1269 = vst.msk [vmem:[#allocation3 + $0x20] sm:$0xff] %vm449_vm6, %v1266_v13  ;;  %1268 = vst.msk [vmem:[#allocation3 + $0x10] sm:$0xff] %vm449_vm6, %v1265_v52 }
 0x33f   : > { %1340 = vrot.lane.b32.xlu0 %v2957_v19, %s3511_s15 }
 0x341   : > { %v2963_v61 = vpop.permute.xlu1 %1116  ;;  %v2965_v28 = vpop.permute.xlu0 %1119 }
 0x342   : > { %v1124_v4 = vsel %vm237_vm1, %v2949_v34, %v2963_v61 }
 0x343   : > { %v2972_v0 = vsel %vm239_vm3, %v1124_v4, %v2965_v28 }
 0x344   : > { %1375 = vrot.lane.b32.xlu0 %v2972_v0, %s2035_s17 }
 0x345   : > { %v1127_v59 = vpop.permute.xlu1 %1126  ;;  %v2976_v15 = vpop.permute.xlu0 %1129 }
 0x346   : > { %v1135_v18 = vsel %vm233_vm0, %v1127_v59, %v2976_v15  ;;  %v1137_v11 = vsel %vm237_vm1, %v1127_v59, %v2976_v15 }
 0x349   : > { %v1133_v8 = vpop.permute.xlu1 %1132  ;;  %v2980_v10 = vpop.permute.xlu0 %1169 }
 0x34a   : > { %v2985_v5 = vsel %vm235_vm2, %v1135_v18, %v1133_v8  ;;  %v2988_v21 = vsel %vm239_vm3, %v1137_v11, %v1133_v8 }
 0x34b   : > { %v1459_v36 = vrot.slane %v2985_v5, 4  ;;  %1411 = vrot.lane.b32.xlu0 %v2988_v21, %s2031_s13 }
 0x34d   : > { %v2993_v45 = vpop.permute.xlu1 %1163  ;;  %v2995_v44 = vpop.permute.xlu0 %1179  ;;  %v3002_v26 = vsel %vm445_vm4, %v2957_v19, %v1459_v36 }
 0x34f   : > { %1446 = vrot.lane.b32.xlu0 %v3006_v29, %s2026_s8 }
 0x351   : > { %v3010_v3 = vpop.permute.xlu1 %1166  ;;  %v3012_v14 = vpop.permute.xlu0 %1182 }
 0x355   : > { %v3014_v17 = vpop.permute.xlu1 %1176  ;;  %v3016_v40 = vpop.permute.xlu0 %1192 }
 0x356   : > { %v1187_v42 = vsel %vm237_vm1, %v3014_v17, %v2995_v44 }
 0x357   : > { %v3023_v56 = vsel %vm239_vm3, %v1187_v42, %v3012_v14 }
 0x358   : > { %1542 = vst.msk [vmem:[#allocation3 + $0x48] sm:$0xf] %vm454_vm5, %v3023_v56  ;;  %vm3532_vm5 = vcmask 654848  }
 0x359   : > { %v3027_v58 = vpop.permute.xlu1 %1189  ;;  %v3029_v48 = vpop.permute.xlu0 %1195 }
 0x35d   : > { %v1154_v30 = vpop.permute.xlu1 %1153  ;;  %v1206_v35 = vpop.permute.xlu0 %1205 }
 0x35e   : > { %v1159_v9 = vsel %vm233_vm0, %v1154_v30, %v2811_v54  ;;  %v1161_v57 = vsel %vm237_vm1, %v1154_v30, %v2811_v54 }
 0x361   : > { %v1203_v31 = vpop.permute.xlu1 %1202  ;;  %v1209_v32 = vpop.permute.xlu0 %1208 }
 0x362   : > { %v1211_v33 = vsel %vm233_vm0, %v1203_v31, %v1206_v35  ;;  %v1213_v39 = vsel %vm237_vm1, %v1203_v31, %v1206_v35 }
 0x363   : > { %v3034_v53 = vsel %vm235_vm2, %v1211_v33, %v1209_v32  ;;  %v3037_v41 = vsel %vm239_vm3, %v1213_v39, %v1209_v32 }
 0x364   : > { %v1650_v43 = vrot.slane %v3034_v53, 4  ;;  %v1652_v38 = vrot.slane %v3037_v41, 4 }
 0x365   : > { %v1157_v13 = vpop.permute.xlu1 %1156  ;;  %v3045_v52 = vpop.permute.xlu0 %1218 }
 0x366   : > { %v3048_v4 = vsel %vm235_vm2, %v1159_v9, %v1157_v13  ;;  %v3051_v59 = vsel %vm239_vm3, %v1161_v57, %v1157_v13  ;;  %v3054_v8 = vsel %vm445_vm4, %v1206_v35, %v1652_v38  ;;  %v3058_v18 = vsel %vm445_vm4, %v3023_v56, %v1650_v43 }
 0x367   : > { %3515 = vst [vmem:[#allocation6_spill] sm:$0xff] %v3051_v59  ;;  %3516 = vst [vmem:[#allocation7_spill] sm:$0xff] %v3054_v8  ;;  %v1528_v11 = vrot.slane %v3048_v4, 4  ;;  %v1530_v36 = vrot.slane %v3051_v59, 4  ;;  %v1200_v35 = vsel %vm237_vm1, %v3027_v58, %v3016_v40 }
 0x368   : > { %3517 = vst [vmem:[#allocation8_spill] sm:$0xff] %v3058_v18  ;;  %v3085_v39 = vsel %vm239_vm3, %v1200_v35, %v3029_v48 }
 0x369   : > { %v3062_v49 = vpop.permute.xlu1 %1215  ;;  %v3064_v42 = vpop.permute.xlu0 %1221  ;;  %v1536_v30 = vsel %vm445_vm4, %v2811_v54, %v1530_v36  ;;  %v1535_v31 = vsel %vm445_vm4, %v2988_v21, %v1528_v11 }
 0x36a   : > { %v1224_v32 = vsel %vm233_vm0, %v3062_v49, %v3045_v52  ;;  %1540 = vst.msk [vmem:[#allocation3 + $0x28] sm:$0xff] %vm449_vm6, %v1536_v30  ;;  %1539 = vst.msk [vmem:[#allocation3 + $0x18] sm:$0xff] %vm449_vm6, %v1535_v31 }
 0x36b   : > { %v3080_v33 = vsel %vm235_vm2, %v1224_v32, %v3064_v42 }
 0x36c   : > { %v1686_v54 = vrot.slane %v3080_v33, 4 }
 0x36d   : > { %v3087_v43 = vpop.permute.xlu1 %1228  ;;  %v3089_v38 = vpop.permute.xlu0 %1231 }
 0x36e   : > { %v3093_v9 = vsel %vm445_vm4, %v3085_v39, %v1686_v54  ;;  %v1237_v57 = vsel %vm233_vm0, %v3087_v43, %v3089_v38 }
 0x36f   : > { %3518 = vst [vmem:[#allocation9_spill] sm:$0xff] %v3093_v9  ;;  %v1148_v9 = vsel %vm233_vm0, %v2896_v25, %v2898_v27 }
 0x371   : > { %v3098_v13 = vpop.permute.xlu1 %1234  ;;  %v3100_v11 = vpop.permute.xlu0 %1241 }
 0x372   : > { %v3104_v36 = vsel %vm235_vm2, %v1237_v57, %v3098_v13  ;;  %v1083_v57 = vsel %vm233_vm0, %v2890_v60, %v2894_v63  ;;  %v1096_v60 = vsel %vm233_vm0, %v2900_v22, %v2915_v23  ;;  %v1070_v22 = vsel %vm233_vm0, %v2884_v47, %v2882_v16 }
 0x373   : > { %v1721_v30 = vrot.slane %v3104_v36, 4 }
 0x375   : > { %v3107_v31 = vpop.permute.xlu1 %1244  ;;  %v3109_v35 = vpop.permute.xlu0 %1247  ;;  %v3113_v32 = vsel %vm445_vm4, %v3037_v41, %v1721_v30  ;;  %v3131_v30 = vsel %vm235_vm2, %v1083_v57, %v2902_v12  ;;  %v1185_v57 = vsel %vm233_vm0, %v3014_v17, %v2995_v44 }
 0x376   : > { %3519 = vst [vmem:[#allocation10_spill] sm:$0xff] %v3113_v32  ;;  %v1252_v54 = vsel %vm237_vm1, %v3100_v11, %v3107_v31  ;;  %v3135_v32 = vsel %vm235_vm2, %v1148_v9, %v2907_v51  ;;  %v3156_v51 = vsel %vm235_vm2, %v1070_v22, %v2888_v50  ;;  %v3180_v17 = vsel %vm235_vm2, %v1185_v57, %v3012_v14 }
 0x377   : > { %v3120_v1 = vsel %vm239_vm3, %v1252_v54, %v3109_v35 }
 0x378   : > { %v1752_v18 = vrot.slane %v3120_v1, 4 }
 0x379   : > { %v1256_v54 = vpop.permute.xlu0 %1255  ;;  %v1429_v59 = vpop.permute.xlu1 %1428 }
 0x37a   : > { %v1264_v8 = vsel %vm445_vm4, %v3131_v30, %v1256_v54  ;;  %v1433_v25 = vsel %vm445_vm4, %v3135_v32, %v1429_v59  ;;  %v3146_v12 = vsel %vm445_vm4, %v3107_v31, %v1752_v18  ;;  %v3160_v59 = vsel %vm235_vm2, %v1096_v60, %v2917_v6 }
 0x37b   : > { %3520 = vst [vmem:[#allocation11_spill] sm:$0xff] %v3146_v12  ;;  %1267 = vst.msk [vmem:[#allocation3] sm:$0xff] %vm449_vm6, %v1264_v8  ;;  %1558 = vrot.lane.b32.xlu0 %v1433_v25, %s2022_s29  ;;  %v1109_v6 = vsel %vm233_vm0, %v2934_v46, %v2928_v62 }
 0x37c   : > { %1270 = vst.msk [vmem:[#allocation3 + $0x30] sm:$0xff] %vm449_vm6, %v1264_v8  ;;  %v3176_v60 = vsel %vm235_vm2, %v1109_v6, %v2947_v24 }
 0x37d   : > { %v1282_v18 = vpop.permute.xlu0 %1281  ;;  %v1273_v9 = vpop.permute.xlu1 %1272 }
 0x37e   : > { %v1287_v54 = vsel %vm445_vm4, %v3160_v59, %v1282_v18  ;;  %v1284_v12 = vsel %vm445_vm4, %v3156_v51, %v1273_v9  ;;  %v1122_v9 = vsel %vm233_vm0, %v2949_v34, %v2963_v61 }
 0x37f   : > { %1299 = vrot.lane.b32.xlu1 %v1287_v54, %s2022_s29  ;;  %1293 = vrot.lane.b32.xlu0 %v1284_v12, %s2022_s29  ;;  %v3195_v24 = vsel %vm235_vm2, %v1122_v9, %v2965_v28 }
 0x381   : > { %v1321_v22 = vpop.permute.xlu0 %1320  ;;  %v1533_v18 = vpop.permute.xlu1 %1532 }
 0x382   : > { %v1326_v27 = vsel %vm445_vm4, %v3176_v60, %v1321_v22  ;;  %v1537_v46 = vsel %vm445_vm4, %v3180_v17, %v1533_v18  ;;  %v1250_v18 = vsel %vm233_vm0, %v3100_v11, %v3107_v31 }
 0x383   : > { %1541 = vst.msk [vmem:[#allocation3 + $0x38] sm:$0xff] %vm449_vm6, %v1537_v46  ;;  %1338 = vrot.lane.b32.xlu1 %v1326_v27, %s3511_s15  ;;  %1332 = vrot.lane.b32.xlu0 %v2942_v55, %s3511_s15  ;;  %v1226_v55 = vsel %vm237_vm1, %v3062_v49, %v3045_v52 }
 0x384   : > { %v3216_v28 = vsel %vm239_vm3, %v1226_v55, %v3064_v42  ;;  %v1198_v42 = vsel %vm233_vm0, %v3027_v58, %v3016_v40 }
 0x385   : > { %v1358_v14 = vpop.permute.xlu0 %1357 }
 0x386   : > { %v1362_v34 = vsel %vm445_vm4, %v3195_v24, %v1358_v14  ;;  %v1072_v14 = vsel %vm237_vm1, %v2884_v47, %v2882_v16  ;;  %v1276_v47 = vrot.slane %v3156_v51, 4 }
 0x387   : > { %1373 = vrot.lane.b32.xlu1 %v1362_v34, %s2035_s17  ;;  %1367 = vrot.lane.b32.xlu0 %v1284_v12, %s2035_s17 }
 0x389   : > { %v1393_v57 = vpop.permute.xlu0 %1392 }
 0x38a   : > { %v1397_v6 = vsel %vm445_vm4, %v2985_v5, %v1393_v57  ;;  %v1549_v5 = vpop.permute.xlu1 %1548 }
 0x38b   : > { %1538 = vst.msk [vmem:[#allocation3 + $0x8] sm:$0xff] %vm449_vm6, %v1397_v6  ;;  %1409 = vrot.lane.b32.xlu1 %v1397_v6, %s2031_s13  ;;  %1403 = vrot.lane.b32.xlu0 %v1264_v8, %s2031_s13  ;;  %v1239_v8 = vsel %vm237_vm1, %v3087_v43, %v3089_v38  ;;  %v1467_v43 = vsel %vm445_vm4, %v3048_v4, %v2867_v20  ;;  %v1355_v6 = vrot.slane %v2924_v7, 4  ;;  %vm3533_vm6 = vmmov %vm3532_vm5 }
 0x38c   : > { %v3226_v49 = vsel %vm239_vm3, %v1239_v8, %v3098_v13  ;;  %v1353_v8 = vrot.slane %v3160_v59, 4 }
 0x38d   : > { %v1498_v13 = vpop.permute.xlu0 %1497 }
 0x38f   : > { %1444 = vrot.lane.b32.xlu1 %v1433_v25, %s2026_s8  ;;  %1438 = vrot.lane.b32.xlu0 %v1287_v54, %s2026_s8  ;;  %v3246_v25 = vsel %vm235_vm2, %v1198_v42, %v3029_v48  ;;  %v1361_v42 = vsel %vm445_vm4, %v2915_v23, %v1355_v6  ;;  %v1174_v23 = vsel %vm237_vm1, %v2993_v45, %v3010_v3 }
 0x390   : > { %v1553_v58 = vsel %vm445_vm4, %v3246_v25, %v1549_v5 }
 0x393   : > { %1602 = vrot.lane.b32.xlu1 %v3037_v41, %s3511_s15  ;;  %1472 = vrot.lane.b32.xlu0 %v1326_v27, %s2021_s28  ;;  %v1585_v27 = vpop.permute.xlu1 %1584  ;;  %v1172_v41 = vsel %vm233_vm0, %v2993_v45, %v3010_v3  ;;  %vm3527_vm0 = vcmask 392448  }
 0x394   : > { %v3250_v12 = vsel %vm235_vm2, %v1172_v41, %v2980_v10  ;;  %vm3528_vm1 = vmmov %vm3527_vm0 }
 0x395   : > { %v1502_v20 = vsel %vm445_vm4, %v3250_v12, %v1498_v13 }
 0x397   : > { %1637 = vrot.lane.b32.xlu1 %v3216_v28, %s2035_s17  ;;  %1507 = vrot.lane.b32.xlu0 %v1362_v34, %s2018_s25  ;;  %v1620_v4 = vpop.permute.xlu1 %1619  ;;  %v1318_v34 = vrot.slane %v2911_v37, 4 }
 0x398   : > { %v1624_v22 = vsel %vm445_vm4, %v3080_v33, %v1620_v4  ;;  %v1615_v4 = vrot.slane %v3246_v25, 4  ;;  %v3525_v25 = vld [vmem:[#allocation9_spill] sm:$0xff] }
 0x399   : > { %v1325_v5 = vsel %vm445_vm4, %v2894_v63, %v1318_v34  ;;  %v1388_v63 = vrot.slane %v3176_v60, 4 }
 0x39b   : > { %1673 = vrot.lane.b32.xlu1 %v3226_v49, %s2031_s13  ;;  %1566 = vrot.lane.b32.xlu0 %v3085_v39, %s2022_s29  ;;  %v1655_v54 = vpop.permute.xlu1 %1654  ;;  %v1395_v60 = vsel %vm445_vm4, %v2911_v37, %v1388_v63 }
 0x39f   : > { %1708 = vrot.lane.b32.xlu1 %v3120_v1, %s2026_s8  ;;  %1594 = vrot.lane.b32.xlu0 %v1467_v43, %s3511_s15  ;;  %v1589_v1 = vsel %vm445_vm4, %v3034_v53, %v1585_v27  ;;  %v1659_v53 = vsel %vm445_vm4, %v3104_v36, %v1655_v54  ;;  %v1691_v9 = vpop.permute.xlu1 %1690  ;;  %v1073_v36 = vsel %vm239_vm3, %v1072_v14, %v2888_v50  ;;  %v1390_v27 = vrot.slane %v2957_v19, 4 }
 0x3a0   : > { %v1279_v31 = vrot.slane %v1073_v36, 4  ;;  %v1285_v55 = vsel %vm445_vm4, %v1073_v36, %v1276_v47  ;;  %v1360_v59 = vsel %vm445_vm4, %v1073_v36, %v1353_v8 }
 0x3a1   : > { %v1396_v19 = vsel %vm445_vm4, %v2928_v62, %v1390_v27  ;;  %v1175_v62 = vsel %vm239_vm3, %v1174_v23, %v2980_v10  ;;  %v1495_v10 = vrot.slane %v3006_v29, 4 }
 0x3a2   : > { %v1286_v57 = vsel %vm445_vm4, %v2882_v16, %v1279_v31  ;;  %v1315_v16 = vrot.slane %v3131_v30, 4  ;;  %v1426_v30 = vrot.slane %v2972_v0, 4  ;;  %v3531_v31 = vld [vmem:[#allocation11_spill] sm:$0xff] }
 0x3a3   : > { %1564 = vrot.lane.b32.xlu1 %v1553_v58, %s2022_s29  ;;  %1629 = vrot.lane.b32.xlu0 %v1502_v20, %s2035_s17 }
 0x3a4   : > { %v1324_v41 = vsel %vm445_vm4, %v2938_v2, %v1315_v16  ;;  %v1424_v2 = vrot.slane %v3195_v24, 4  ;;  %v1432_v13 = vsel %vm445_vm4, %v2963_v61, %v1426_v30  ;;  %v1582_v61 = vrot.slane %v3023_v56, 4 }
 0x3a6   : > { %v1302_v48 = vpop.permute.xlu0 %1301  ;;  %v1431_v45 = vsel %vm445_vm4, %v2924_v7, %v1424_v2  ;;  %v1493_v7 = vrot.slane %v3135_v32, 4 }
 0x3a7   : > { %1312 = vst.msk [vmem:[#allocation3 + $0x40] sm:$0xf] %vm497_vm14, %v1302_v48  ;;  %1600 = vrot.lane.b32.xlu1 %v1589_v1, %s3511_s15  ;;  %1665 = vrot.lane.b32.xlu0 %v1537_v46, %s2031_s13  ;;  %v3276_v46 = vsel %vm235_vm2, %v1250_v18, %v3109_v35  ;;  %vm3529_vm2 = vcmask 523648  }
 0x3a8   : > { %v1695_v11 = vsel %vm445_vm4, %v3276_v46, %v1691_v9  ;;  %v3526_v9 = vld [vmem:[#allocation10_spill] sm:$0xff]  ;;  %vm3530_vm3 = vmmov %vm3529_vm2 }
 0x3ab   : > { %1635 = vrot.lane.b32.xlu1 %v1624_v22, %s2035_s17  ;;  %1700 = vrot.lane.b32.xlu0 %v1553_v58, %s2026_s8  ;;  %v1500_v58 = vsel %vm445_vm4, %v2972_v0, %v1493_v7  ;;  %v1688_v0 = vrot.slane %v3216_v28, 4 }
 0x3ad   : > { %v1694_v54 = vsel %vm445_vm4, %v3045_v52, %v1688_v0 }
 0x3af   : > { %1671 = vrot.lane.b32.xlu1 %v1659_v53, %s2031_s13  ;;  %1729 = vrot.lane.b32.xlu0 %v1589_v1, %s2021_s28  ;;  %v3523_v1 = vld [vmem:[#allocation6_spill] sm:$0xff] }
 0x3b1   : > { %v1341_v33 = vpop.permute.xlu0 %1340 }
 0x3b2   : > { %1351 = vst.msk [vmem:[#allocation3 + $0x40] sm:$0xf] %vm538_vm15, %v1341_v33 }
 0x3b3   : > { %1706 = vrot.lane.b32.xlu1 %v1695_v11, %s2026_s8  ;;  %1758 = vrot.lane.b32.xlu0 %v1624_v22, %s2018_s25 }
 0x3b6   : > { %v1376_v35 = vpop.permute.xlu0 %1375 }
 0x3b7   : > { %1386 = vst.msk [vmem:[#allocation3 + $0x40] sm:$0xf] %vm575_vm10, %v1376_v35  ;;  %1735 = vrot.lane.b32.xlu1 %v1659_v53, %s2021_s28  ;;  %1513 = vrot.lane.b32.xlu0 %v1502_v20, %s2018_s25  ;;  %v1588_v20 = vsel %vm445_vm4, %v2995_v44, %v1582_v61  ;;  %v1750_v53 = vrot.slane %v3276_v46, 4 }
 0x3b9   : > { %v1754_v11 = vsel %vm445_vm4, %v3216_v28, %v1750_v53 }
 0x3bb   : > { %1478 = vrot.lane.b32.xlu1 %v1467_v43, %s2021_s28  ;;  %1297 = vrot.lane.b32.xlu0 %v1286_v57, %s2022_s29  ;;  %v1461_v43 = vrot.slane %v2988_v21, 4  ;;  %v1546_v21 = vrot.slane %v1175_v62, 4 }
 0x3bd   : > { %v1412_v50 = vpop.permute.xlu0 %1411  ;;  %v1466_v24 = vsel %vm445_vm4, %v2976_v15, %v1461_v43  ;;  %v1552_v37 = vsel %vm445_vm4, %v3010_v3, %v1546_v21  ;;  %v1617_v15 = vrot.slane %v3085_v39, 4  ;;  %v3521_v3 = vld [vmem:[#allocation5_spill] sm:$0xff]  ;;  %v3522_v39 = vld [vmem:[#allocation7_spill] sm:$0xff] }
 0x3be   : > { %1422 = vst.msk [vmem:[#allocation3 + $0x40] sm:$0xf] %vm613_vm12, %v1412_v50  ;;  %v1501_v56 = vsel %vm445_vm4, %v3521_v3, %v1495_v10  ;;  %v1786_v50 = vld [vmem:[%s3489_s4] sm:$0xf] }
 0x3bf   : > { %1295 = vrot.lane.b32.xlu1 %v1285_v55, %s2022_s29  ;;  %1336 = vrot.lane.b32.xlu0 %v1325_v5, %s3511_s15  ;;  %v1623_v32 = vsel %vm445_vm4, %v3016_v40, %v1617_v15  ;;  %v1723_v40 = vrot.slane %v3226_v49, 4 }
 0x3c1   : > { %v1447_v51 = vpop.permute.xlu0 %1446  ;;  %v1726_v22 = vsel %vm445_vm4, %v3089_v38, %v1723_v40 }
 0x3c2   : > { %1457 = vst.msk [vmem:[#allocation3 + $0x40] sm:$0xf] %vm650_vm11, %v1447_v51 }
 0x3c3   : > { %1334 = vrot.lane.b32.xlu1 %v1324_v41, %s3511_s15  ;;  %1371 = vrot.lane.b32.xlu0 %v1361_v42, %s2035_s17 }
 0x3c7   : > { %1369 = vrot.lane.b32.xlu1 %v1360_v59, %s2035_s17  ;;  %1407 = vrot.lane.b32.xlu0 %v1396_v19, %s2031_s13 }
 0x3cb   : > { %1405 = vrot.lane.b32.xlu1 %v1395_v60, %s2031_s13  ;;  %1442 = vrot.lane.b32.xlu0 %v1432_v13, %s2026_s8 }
 0x3cf   : > { %1440 = vrot.lane.b32.xlu1 %v1431_v45, %s2026_s8  ;;  %1476 = vrot.lane.b32.xlu0 %v1466_v24, %s2021_s28 }
 0x3d3   : > { %1474 = vrot.lane.b32.xlu1 %v3002_v26, %s2021_s28  ;;  %1562 = vrot.lane.b32.xlu0 %v1552_v37, %s2022_s29  ;;  %v1544_v26 = vrot.slane %v3250_v12, 4  ;;  %v1579_v12 = vrot.slane %v3180_v17, 4  ;;  %v3524_v17 = vld [vmem:[#allocation8_spill] sm:$0xff] }
 0x3d5   : > { %v1551_v44 = vsel %vm445_vm4, %v3006_v29, %v1544_v26  ;;  %v1587_v48 = vsel %vm445_vm4, %v3523_v1, %v1579_v12  ;;  %v1622_v29 = vsel %vm445_vm4, %v1175_v62, %v1615_v4 }
 0x3d7   : > { %1509 = vrot.lane.b32.xlu1 %v1500_v58, %s2018_s25  ;;  %1598 = vrot.lane.b32.xlu0 %v1588_v20, %s3511_s15 }
 0x3db   : > { %1511 = vrot.lane.b32.xlu1 %v1501_v56, %s2018_s25  ;;  %1633 = vrot.lane.b32.xlu0 %v1623_v32, %s2035_s17 }
 0x3df   : > { %1560 = vrot.lane.b32.xlu1 %v1551_v44, %s2022_s29  ;;  %1669 = vrot.lane.b32.xlu0 %v3522_v39, %s2031_s13  ;;  %s3575_s29 = sshll.u32 %s3577_s19, 3 }
 0x3e0   : > { %s224_s7 = scalar_lea.vmem %s3490_s5, %s3575_s29 }
 0x3e3   : > { %1596 = vrot.lane.b32.xlu1 %v1587_v48, %s3511_s15  ;;  %1704 = vrot.lane.b32.xlu0 %v1694_v54, %s2026_s8 }
 0x3e7   : > { %1631 = vrot.lane.b32.xlu1 %v1622_v29, %s2035_s17  ;;  %1733 = vrot.lane.b32.xlu0 %v1726_v22, %s2021_s28 }
 0x3eb   : > { %1667 = vrot.lane.b32.xlu1 %v3524_v17, %s2031_s13  ;;  %1480 = vrot.lane.b32.xlu0 %v3523_v1, %s2021_s28 }
 0x3ed   : > { %v1559_v52 = vpop.permute.xlu0 %1558 }
 0x3ee   : > { %1573 = vst.msk [vmem:[#allocation3 + $0x8] sm:$0xff] %vm492_vm7, %v1559_v52 }
 0x3ef   : > { %1702 = vrot.lane.b32.xlu1 %v3525_v25, %s2026_s8  ;;  %1515 = vrot.lane.b32.xlu0 %v1175_v62, %s2018_s25 }
 0x3f1   : > { %v1294_v18 = vpop.permute.xlu0 %1293  ;;  %v1300_v38 = vpop.permute.xlu1 %1299 }
 0x3f2   : > { %1308 = vst.msk [vmem:[#allocation3] sm:$0xff] %vm492_vm7, %v1294_v18  ;;  %1311 = vst.msk [vmem:[#allocation3 + $0x30] sm:$0xff] %vm492_vm7, %v1300_v38 }
 0x3f3   : > { %1731 = vrot.lane.b32.xlu1 %v3526_v9, %s2021_s28 }
 0x3f5   : > { %v1339_v33 = vpop.permute.xlu1 %1338  ;;  %v1333_v14 = vpop.permute.xlu0 %1332 }
 0x3f6   : > { %1350 = vst.msk [vmem:[#allocation3 + $0x30] sm:$0xff] %vm3527_vm0, %v1339_v33  ;;  %vm3534_vm0 = vcmask 786048  }
 0x3f7   : > { %1347 = vst.msk [vmem:[#allocation3] sm:$0xff] %vm3528_vm1, %v1333_v14  ;;  %1760 = vrot.lane.b32.xlu1 %v1754_v11, %s2018_s25  ;;  %vm3535_vm1 = vmmov %vm3534_vm0 }
 0x3f9   : > { %v1374_v36 = vpop.permute.xlu1 %1373  ;;  %v1368_v46 = vpop.permute.xlu0 %1367 }
 0x3fa   : > { %1385 = vst.msk [vmem:[#allocation3 + $0x30] sm:$0xff] %vm3529_vm2, %v1374_v36  ;;  %vm3536_vm2 = vcmask 917248  }
 0x3fb   : > { %1382 = vst.msk [vmem:[#allocation3] sm:$0xff] %vm3530_vm3, %v1368_v46  ;;  %1762 = vrot.lane.b32.xlu1 %v3531_v31, %s2018_s25  ;;  %vm3537_vm3 = vcmask 1048448  }
 0x3fd   : > { %v1410_v35 = vpop.permute.xlu1 %1409  ;;  %v1404_v47 = vpop.permute.xlu0 %1403 }
 0x3fe   : > { %1421 = vst.msk [vmem:[#allocation3 + $0x30] sm:$0xff] %vm3532_vm5, %v1410_v35  ;;  %vm3538_vm5 = vcmask 392448  }
 0x3ff   : > { %1418 = vst.msk [vmem:[#allocation3] sm:$0xff] %vm3533_vm6, %v1404_v47  ;;  %1737 = vrot.lane.b32.xlu1 %v3226_v49, %s2021_s28  ;;  %vm3539_vm6 = vcmask 523648  }
 0x401   : > { %v1445_v34 = vpop.permute.xlu1 %1444  ;;  %v1439_v57 = vpop.permute.xlu0 %1438 }
 0x402   : > { %1456 = vst.msk [vmem:[#allocation3 + $0x30] sm:$0xff] %vm3534_vm0, %v1445_v34 }
 0x403   : > { %1453 = vst.msk [vmem:[#allocation3] sm:$0xff] %vm3535_vm1, %v1439_v57  ;;  %1764 = vrot.lane.b32.xlu1 %v3216_v28, %s2018_s25 }
 0x405   : > { %v1603_v6 = vpop.permute.xlu1 %1602  ;;  %v1473_v55 = vpop.permute.xlu0 %1472 }
 0x406   : > { %1487 = vst.msk [vmem:[#allocation3] sm:$0xff] %vm3536_vm2, %v1473_v55 }
 0x407   : > { %1789 = vperm.xlu1 %2005, %v1786_v50  }
 0x409   : > { %v1638_v5 = vpop.permute.xlu1 %1637  ;;  %v1508_v49 = vpop.permute.xlu0 %1507 }
 0x40a   : > { %1522 = vst.msk [vmem:[#allocation3] sm:$0xff] %vm3537_vm3, %v1508_v49 }
 0x40d   : > { %v1674_v16 = vpop.permute.xlu1 %1673  ;;  %v1567_v51 = vpop.permute.xlu0 %1566 }
 0x40e   : > { %1577 = vst.msk [vmem:[#allocation3 + $0x48] sm:$0xf] %vm497_vm14, %v1567_v51  ;;  %vm3540_vm14 = vmmov %vm3538_vm5 }
 0x40f   : > { %1613 = vst.msk [vmem:[#allocation3 + $0x48] sm:$0xf] %vm538_vm15, %v1603_v6  ;;  %vm3541_vm15 = vcmask 654848  }
 0x410   : > { %1648 = vst.msk [vmem:[#allocation3 + $0x48] sm:$0xf] %vm575_vm10, %v1638_v5  ;;  %vm3542_vm10 = vmmov %vm3539_vm6  ;;  %v1775_v5 = vld [vmem:[%s3488_s3] sm:$0xf] }
 0x411   : > { %v1709_v28 = vpop.permute.xlu1 %1708  ;;  %1684 = vst.msk [vmem:[#allocation3 + $0x48] sm:$0xf] %vm613_vm12, %v1674_v16  ;;  %v1595_v8 = vpop.permute.xlu0 %1594  ;;  %vm3543_vm12 = vmmov %vm3534_vm0  ;;  %v1776_v36 = vld [vmem:[#allocation3] sm:$0xff] }
 0x412   : > { %1719 = vst.msk [vmem:[#allocation3 + $0x48] sm:$0xf] %vm650_vm11, %v1709_v28  ;;  %vm3544_vm11 = vmmov %vm3541_vm15 }
 0x413   : > { %1609 = vst.msk [vmem:[#allocation3 + $0x8] sm:$0xff] %vm3538_vm5, %v1595_v8  ;;  %vm3545_vm0 = vmmov %vm3536_vm2 }
 0x414   : > { %vm3546_vm2 = vmmov %vm3537_vm3 }
 0x415   : > { %v1565_v27 = vpop.permute.xlu1 %1564  ;;  %v1630_v41 = vpop.permute.xlu0 %1629  ;;  %vm3547_vm3 = vmmov %vm3545_vm0 }
 0x416   : > { %1576 = vst.msk [vmem:[#allocation3 + $0x38] sm:$0xff] %vm492_vm7, %v1565_v27  ;;  %vm3548_vm5 = vmmov %vm3546_vm2 }
 0x417   : > { %1644 = vst.msk [vmem:[#allocation3 + $0x8] sm:$0xff] %vm3539_vm6, %v1630_v41  ;;  %vm3549_vm6 = vmmov %vm3545_vm0  ;;  %v2008_v41 = vld [vmem:[%s2088_s23] sm:$0xff] }
 0x419   : > { %v1601_v42 = vpop.permute.xlu1 %1600  ;;  %v1666_v63 = vpop.permute.xlu0 %1665 }
 0x41a   : > { %1612 = vst.msk [vmem:[#allocation3 + $0x38] sm:$0xff] %vm3540_vm14, %v1601_v42  ;;  %vm3550_vm14 = vmmov %vm3546_vm2 }
 0x41b   : > { %1680 = vst.msk [vmem:[#allocation3 + $0x8] sm:$0xff] %vm3541_vm15, %v1666_v63  ;;  %vm3551_vm15 = vcmask 392448   ;;  %v3574_v63 = vld [vmem:[#allocation4_spill] sm:$0xff] }
 0x41d   : > { %v1636_v30 = vpop.permute.xlu1 %1635  ;;  %v1701_v59 = vpop.permute.xlu0 %1700 }
 0x41e   : > { %1647 = vst.msk [vmem:[#allocation3 + $0x38] sm:$0xff] %vm3542_vm10, %v1636_v30  ;;  %vm3552_vm10 = vmmov %vm3551_vm15 }
 0x41f   : > { %1715 = vst.msk [vmem:[#allocation3 + $0x8] sm:$0xff] %vm3543_vm12, %v1701_v59  ;;  %vm3553_vm12 = vcmask 523648  }
 0x421   : > { %v1672_v19 = vpop.permute.xlu1 %1671  ;;  %v1730_v23 = vpop.permute.xlu0 %1729 }
 0x422   : > { %1683 = vst.msk [vmem:[#allocation3 + $0x38] sm:$0xff] %vm3544_vm11, %v1672_v19  ;;  %vm3554_vm11 = vmmov %vm3553_vm12 }
 0x423   : > { %1744 = vst.msk [vmem:[#allocation3 + $0x8] sm:$0xff] %vm3545_vm0, %v1730_v23  ;;  %vm3555_vm0 = vcmask 654848  }
 0x425   : > { %v1707_v2 = vpop.permute.xlu1 %1706  ;;  %v1759_v43 = vpop.permute.xlu0 %1758 }
 0x426   : > { %1718 = vst.msk [vmem:[#allocation3 + $0x38] sm:$0xff] %vm3535_vm1, %v1707_v2  ;;  %vm3556_vm1 = vmmov %vm3555_vm0 }
 0x427   : > { %1770 = vst.msk [vmem:[#allocation3 + $0x8] sm:$0xff] %vm3546_vm2, %v1759_v43  ;;  %vm3557_vm2 = vcmask 786048  }
 0x429   : > { %v1736_v60 = vpop.permute.xlu1 %1735  ;;  %v1514_v13 = vpop.permute.xlu0 %1513 }
 0x42a   : > { %1747 = vst.msk [vmem:[#allocation3 + $0x38] sm:$0xff] %vm3547_vm3, %v1736_v60  ;;  %vm3558_vm3 = vmmov %vm3557_vm2 }
 0x42b   : > { %1773 = vst.msk [vmem:[#allocation3 + $0x38] sm:$0xff] %vm3548_vm5, %v1759_v43  ;;  %vm3559_vm5 = vmmov %vm3549_vm6 }
 0x42d   : > { %v1479_v62 = vpop.permute.xlu1 %1478  ;;  %v1298_v45 = vpop.permute.xlu0 %1297 }
 0x42e   : > { %1490 = vst.msk [vmem:[#allocation3 + $0x30] sm:$0xff] %vm3549_vm6, %v1479_v62  ;;  %vm3560_vm6 = vmmov %vm3559_vm5  ;;  %v1777_v33 = vld [vmem:[#allocation3 + $0x8] sm:$0xff] }
 0x42f   : > { %1310 = vst.msk [vmem:[#allocation3 + $0x20] sm:$0xff] %vm492_vm7, %v1298_v45 }
 0x430   : > { %1525 = vst.msk [vmem:[#allocation3 + $0x30] sm:$0xff] %vm3550_vm14, %v1514_v13 }
 0x431   : > { %v1296_v24 = vpop.permute.xlu1 %1295  ;;  %v1337_v21 = vpop.permute.xlu0 %1336 }
 0x432   : > { %1309 = vst.msk [vmem:[#allocation3 + $0x10] sm:$0xff] %vm492_vm7, %v1296_v24  ;;  %v1783_v34 = vld [vmem:[#allocation3 + $0x38] sm:$0xff] }
 0x433   : > { %1349 = vst.msk [vmem:[#allocation3 + $0x20] sm:$0xff] %vm3551_vm15, %v1337_v21  ;;  %vm3561_vm15 = vmmov %vm3552_vm10 }
 0x435   : > { %v1335_v37 = vpop.permute.xlu1 %1334  ;;  %v1372_v61 = vpop.permute.xlu0 %1371 }
 0x436   : > { %1348 = vst.msk [vmem:[#allocation3 + $0x10] sm:$0xff] %vm3552_vm10, %v1335_v37  ;;  %vm3562_vm10 = vmmov %vm3550_vm14 }
 0x437   : > { %1384 = vst.msk [vmem:[#allocation3 + $0x20] sm:$0xff] %vm3553_vm12, %v1372_v61  ;;  %vm3563_vm12 = vmmov %vm3554_vm11  ;;  %v1782_v50 = vld [vmem:[#allocation3 + $0x30] sm:$0xff] }
 0x439   : > { %v1370_v7 = vpop.permute.xlu1 %1369  ;;  %v1408_v10 = vpop.permute.xlu0 %1407 }
 0x43a   : > { %1383 = vst.msk [vmem:[#allocation3 + $0x10] sm:$0xff] %vm3554_vm11, %v1370_v7  ;;  %vm3564_vm11 = vmmov %vm3555_vm0 }
 0x43b   : > { %1420 = vst.msk [vmem:[#allocation3 + $0x20] sm:$0xff] %vm3555_vm0, %v1408_v10  ;;  %vm3565_vm0 = vmmov %vm3561_vm15 }
 0x43d   : > { %v1406_v15 = vpop.permute.xlu1 %1405  ;;  %v1443_v58 = vpop.permute.xlu0 %1442 }
 0x43e   : > { %1419 = vst.msk [vmem:[#allocation3 + $0x10] sm:$0xff] %vm3556_vm1, %v1406_v15  ;;  %vm3566_vm1 = vmmov %vm3557_vm2 }
 0x43f   : > { %1455 = vst.msk [vmem:[#allocation3 + $0x20] sm:$0xff] %vm3557_vm2, %v1443_v58  ;;  %vm3567_vm2 = vmmov %vm3563_vm12 }
 0x441   : > { %v1441_v20 = vpop.permute.xlu1 %1440  ;;  %v1477_v26 = vpop.permute.xlu0 %1476 }
 0x442   : > { %1454 = vst.msk [vmem:[#allocation3 + $0x10] sm:$0xff] %vm3558_vm3, %v1441_v20  ;;  %vm3568_vm3 = vmmov %vm3559_vm5 }
 0x443   : > { %1489 = vst.msk [vmem:[#allocation3 + $0x20] sm:$0xff] %vm3559_vm5, %v1477_v26  ;;  %vm3569_vm5 = vmmov %vm3564_vm11 }
 0x445   : > { %v1475_v3 = vpop.permute.xlu1 %1474  ;;  %v1563_v56 = vpop.permute.xlu0 %1562 }
 0x446   : > { %1488 = vst.msk [vmem:[#allocation3 + $0x10] sm:$0xff] %vm3560_vm6, %v1475_v3  ;;  %vm3571_vm6 = vmmov %vm3568_vm3 }
 0x447   : > { %1575 = vst.msk [vmem:[#allocation3 + $0x28] sm:$0xff] %vm492_vm7, %v1563_v56 }
 0x449   : > { %v1510_v32 = vpop.permute.xlu1 %1509  ;;  %v1599_v0 = vpop.permute.xlu0 %1598 }
 0x44a   : > { %1523 = vst.msk [vmem:[#allocation3 + $0x10] sm:$0xff] %vm3550_vm14, %v1510_v32  ;;  %vm3572_vm14 = vmmov %vm3562_vm10 }
 0x44b   : > { %1611 = vst.msk [vmem:[#allocation3 + $0x28] sm:$0xff] %vm3561_vm15, %v1599_v0  ;;  %vm3573_vm15 = vmmov %vm3562_vm10 }
 0x44d   : > { %v1512_v44 = vpop.permute.xlu1 %1511  ;;  %v1634_v39 = vpop.permute.xlu0 %1633 }
 0x44e   : > { %1524 = vst.msk [vmem:[#allocation3 + $0x20] sm:$0xff] %vm3562_vm10, %v1512_v44 }
 0x44f   : > { %1646 = vst.msk [vmem:[#allocation3 + $0x28] sm:$0xff] %vm3563_vm12, %v1634_v39 }
 0x451   : > { %v1561_v12 = vpop.permute.xlu1 %1560  ;;  %v1670_v4 = vpop.permute.xlu0 %1669  ;;  %v1778_v53 = vld [vmem:[#allocation3 + $0x10] sm:$0xff] }
 0x452   : > { %1574 = vst.msk [vmem:[#allocation3 + $0x18] sm:$0xff] %vm492_vm7, %v1561_v12  ;;  %vm3570_vm7 = vmmov %vm3566_vm1  ;;  %v1965_v46 = vpack.c.bf16 %v1778_v53, %v1776_v36 }
 0x453   : > { %1682 = vst.msk [vmem:[#allocation3 + $0x28] sm:$0xff] %vm3564_vm11, %v1670_v4 }
 0x455   : > { %v1597_v40 = vpop.permute.xlu1 %1596  ;;  %v1705_v1 = vpop.permute.xlu0 %1704  ;;  %v1780_v31 = vld [vmem:[#allocation3 + $0x20] sm:$0xff] }
 0x456   : > { %1610 = vst.msk [vmem:[#allocation3 + $0x18] sm:$0xff] %vm3565_vm0, %v1597_v40  ;;  %v1969_v6 = vpack.c.bf16 %v1782_v50, %v1780_v31 }
 0x457   : > { %1717 = vst.msk [vmem:[#allocation3 + $0x28] sm:$0xff] %vm3566_vm1, %v1705_v1 }
 0x459   : > { %v1632_v48 = vpop.permute.xlu1 %1631  ;;  %v1734_v54 = vpop.permute.xlu0 %1733 }
 0x45a   : > { %1645 = vst.msk [vmem:[#allocation3 + $0x18] sm:$0xff] %vm3567_vm2, %v1632_v48 }
 0x45b   : > { %1746 = vst.msk [vmem:[#allocation3 + $0x28] sm:$0xff] %vm3568_vm3, %v1734_v54 }
 0x45d   : > { %v1668_v29 = vpop.permute.xlu1 %1667  ;;  %v1481_v22 = vpop.permute.xlu0 %1480 }
 0x45e   : > { %1681 = vst.msk [vmem:[#allocation3 + $0x18] sm:$0xff] %vm3569_vm5, %v1668_v29 }
 0x45f   : > { %1491 = vst.msk [vmem:[#allocation3 + $0x40] sm:$0xf] %vm684_vm9, %v1481_v22 }
 0x461   : > { %v1703_v17 = vpop.permute.xlu1 %1702  ;;  %v1516_v52 = vpop.permute.xlu0 %1515 }
 0x462   : > { %1716 = vst.msk [vmem:[#allocation3 + $0x18] sm:$0xff] %vm3570_vm7, %v1703_v17 }
 0x463   : > { %1526 = vst.msk [vmem:[#allocation3 + $0x40] sm:$0xf] %vm718_vm8, %v1516_v52 }
 0x465   : > { %v1732_v25 = vpop.permute.xlu1 %1731 }
 0x466   : > { %1745 = vst.msk [vmem:[#allocation3 + $0x18] sm:$0xff] %vm3571_vm6, %v1732_v25 }
 0x469   : > { %v1761_v18 = vpop.permute.xlu1 %1760 }
 0x46a   : > { %1771 = vst.msk [vmem:[#allocation3 + $0x18] sm:$0xff] %vm3572_vm14, %v1761_v18  ;;  %v1784_v49 = vld [vmem:[#allocation3 + $0x40] sm:$0xf] }
 0x46d   : > { %v1763_v38 = vpop.permute.xlu1 %1762 }
 0x46e   : > { %1772 = vst.msk [vmem:[#allocation3 + $0x28] sm:$0xff] %vm3573_vm15, %v1763_v38 }
 0x471   : > { %v1738_v9 = vpop.permute.xlu1 %1737  ;;  %v1779_v14 = vld [vmem:[#allocation3 + $0x18] sm:$0xff] }
 0x472   : > { %1748 = vst.msk [vmem:[#allocation3 + $0x48] sm:$0xf] %vm684_vm9, %v1738_v9  ;;  %v1963_v11 = vpack.c.bf16 %v1779_v14, %v1777_v33 }
 0x474   : > { %1964 = vmatprep.subr.bf16.mxu1 %v1963_v11 }
 0x475   : > { %v1765_v35 = vpop.permute.xlu1 %1764  ;;  %1966 = vmatpush1.bf16.msra.mxu1 %v1965_v46  ;;  %v1781_v47 = vld [vmem:[#allocation3 + $0x28] sm:$0xff] }
 0x476   : > { %1774 = vst.msk [vmem:[#allocation3 + $0x48] sm:$0xf] %vm718_vm8, %v1765_v35  ;;  %v1967_v57 = vpack.c.bf16 %v1783_v34, %v1781_v47 }
 0x478   : > { %1968 = vmatprep.subr.bf16.mxu1 %v1967_v57 }
 0x479   : > { %1970 = vmatpush1.bf16.msra.mxu1 %v1969_v6 }
 0x47d   : > { %v1785_v55 = vld [vmem:[#allocation3 + $0x48] sm:$0xf] }
 0x47e   : > { %1948 = vmatprep.subr.msk.mxu1 %vm445_vm4, %v1785_v55 }
 0x47f   : > { %1949 = vmatpush1.msk.msra.mxu1 %vm445_vm4, %v1784_v49 }
 0x480   : > { %1950 = vmatmul.mubr.msk.f32.vlgmr.msra.gmra.mrb[0].mxu1 %vm967_vm13, %v1775_v5 }
 0x486   : > { %v1790_v16 = vpop.permute.xlu1 %1789 }
 0x553   : > { %v1867_v51 = vpop.f32.mrb[0].mxu1 }
 0x554   : > { %v1868_v28 = vadd.f32 %v1867_v51, %v1790_v16  ;;  %v1869_v8 = vpop.f32.mrb[1].mxu1 }
 0x555   : > { %v1870_v27 = vadd.f32 %v1869_v8, %v1790_v16 }
 0x556   : > { %v1872_v42 = vadd.f32 %v2008_v41, %v1868_v28 }
 0x557   : > { %v1873_v30 = vadd.f32 %v1870_v27, %v3574_v63 }
 0x558   : > { %v1874_v59 = vmax.f32 %v1872_v42, 0.0 }
 0x559   : > { %v1875_v19 = vmax.f32 %v1873_v30, 0.0 }
 0x55b   : > { %v1878_v23 = vcombine.low %v1874_v59, %v1875_v19 }
 0x55d   : > { %1880 = vst [vmem:[%s224_s7] sm:$0xff] %v1878_v23 }
 0x55e PF: > { %s15_s18 = sadd.s32 1, %s2015_s18  }
 0x55f   : > { %p12_p4 = scmp.ge.s32.totalorder %s15_s18, 4  }
 0x561   :  { %14 = sbr.rel (!%p12_p4) target bundleno = 1 (0x1), region = 70 }

</bundles_post_ra>
